<compile_context>
chip_gen: v7x
topology: tpu7x:2x2x1
jax: 0.10.0
libtpu: 0.0.40
codegen_flags: <defaults>
</compile_context>

<pallas_src>
import jax
import jax.numpy as jnp
from jax.experimental import pallas as pl
from jax.experimental.pallas import tpu as pltpu

# Model hyperparameters (c=12, pred2=False branch of the PyTorch forward).
C_IN = 12          # self.c
L_SEQ = 400        # forward slices x[..., :400]
CH = 32            # hidden channels of the causal CNN
RED = 32           # reduced_size before mean/logvar linears
LATENT = 8         # latent_dim
KSIZE = 3          # causal conv kernel size
DEC_CH = 16        # decoder hidden channels
NEG_SLOPE = 0.01   # LeakyReLU(0.01)
DILATIONS = (1, 2, 4)
PAD = (KSIZE - 1) * max(DILATIONS)   # 8 columns of causal left zero-padding

W_KEYS = ("w1", "b1", "w2", "b2", "wr", "br", "wm", "bm", "wv", "bv",
          "wreg", "breg", "wdec", "bdec", "wcv", "bcv")


def _leaky_relu(x):
    return jnp.where(x > 0, x, NEG_SLOPE * x)


# ------------------------------ fused kernel -------------------------------


def fused_vae_kernel(x_ref, eps_ref,
                     w1_ref, b1_ref, w2_ref, b2_ref, wr_ref, br_ref,
                     wm_ref, bm_ref, wv_ref, bv_ref,
                     wreg_ref, breg_ref, wdec_ref, bdec_ref, wcv_ref, bcv_ref,
                     enc_ref, zm_ref, zlv_ref, dec_ref, pred_ref,
                     pad_ref):
    """Whole VAE_XAI forward for one batch element, channel-major (C, L)."""
    # Causal left-pad region of the shared staging scratch -> zeros.
    pad_ref[:, :PAD] = jnp.zeros((CH, PAD), jnp.float32)

    def causal_conv(h, w_ref, b_ref, dilation):
        # h: (Cin, L) channel-major; w_ref: (K, Cout, Cin); returns (Cout, L).
        cin = h.shape[0]
        pad_ref[:cin, PAD:] = h                        # stage once per layer
        acc = None
        for t in range(KSIZE):
            off = PAD - (KSIZE - 1 - t) * dilation     # static lane offset
            xs = pad_ref[:cin, off:off + L_SEQ]        # zero-padded causal tap
            term = jnp.dot(w_ref[t], xs, preferred_element_type=jnp.float32)
            acc = term if acc is None else acc + term  # init with first tap
        return acc + b_ref[...]                        # (Cout,1) lane-broadcast

    x_full = x_ref[0]                                  # (C_IN, 401) NCL tile
    x = x_full[:, :L_SEQ]                              # (12, 400)
    r0 = x_full[0:1, L_SEQ:L_SEQ + 1]                  # rri = x[:, [0, 6], 400]
    r6 = x_full[6:7, L_SEQ:L_SEQ + 1]

    # ---- encoder: dilated causal CNN -> AdaptiveMaxPool1d(1) -> mean/logvar
    h = _leaky_relu(causal_conv(x, w1_ref, b1_ref, DILATIONS[0]))   # (32, 400)
    h = _leaky_relu(causal_conv(h, w2_ref, b2_ref, DILATIONS[1]))   # (32, 400)
    h = _leaky_relu(causal_conv(h, wr_ref, br_ref, DILATIONS[2]))   # (32, 400)
    pooled = jnp.max(h, axis=1, keepdims=True)                      # (RED, 1)
    pooled_b = jnp.broadcast_to(pooled, (RED, LATENT))              # lane bcast
    z_mean = (jnp.sum(wm_ref[...] * pooled_b, axis=0, keepdims=True)
              + bm_ref[...])                                        # (1, 8)
    z_log_var = (jnp.sum(wv_ref[...] * pooled_b, axis=0, keepdims=True)
                 + bv_ref[...])                                     # (1, 8)

    # ---- reparameterize + regressor(cat(encoded, rri)) head
    eps = eps_ref[0]                                                # (1, 8)
    encoded = z_mean + eps * jnp.exp(0.5 * z_log_var)               # (1, 8)
    pred = (jnp.dot(encoded, wreg_ref[:LATENT, :],
                    preferred_element_type=jnp.float32)
            + r0 * wreg_ref[LATENT:LATENT + 1, :]
            + r6 * wreg_ref[LATENT + 1:LATENT + 2, :]
            + breg_ref[...])                                        # (1, 3)

    # ---- decoder: linear(latent -> DEC_CH x L, channel-major) + causal conv
    enc_b = jnp.broadcast_to(encoded, (DEC_CH, LATENT))             # (16, 8)
    hdec = None
    for k in range(LATENT):
        term = enc_b[:, k:k + 1] * wdec_ref[k]        # (16,1)*(16,400)
        hdec = term if hdec is None else hdec + term
    hdec = _leaky_relu(hdec + bdec_ref[...])          # (16, 400)
    dec = causal_conv(hdec, wcv_ref, bcv_ref, 1)      # (12, 400) NCL directly

    enc_ref[0] = encoded
    zm_ref[0] = z_mean
    zlv_ref[0] = z_log_var
    pred_ref[0] = pred
    dec_ref[0] = dec


# ------------------------------ pallas wrapper ------------------------------


def _const_spec(arr):
    zeros = (0,) * arr.ndim
    return pl.BlockSpec(arr.shape, lambda b, _z=zeros: _z)


def vae_xai_fused(x_ncl, eps, params):
    """x_ncl: (B, C_IN, L>=401) NCL float32."""
    B, _, Lx = x_ncl.shape
    in_specs = ([pl.BlockSpec((1, C_IN, Lx), lambda b: (b, 0, 0)),
                 pl.BlockSpec((1, 1, LATENT), lambda b: (b, 0, 0))]
                + [_const_spec(params[k]) for k in W_KEYS])
    out_shape = (
        jax.ShapeDtypeStruct((B, 1, LATENT), jnp.float32),    # encoded
        jax.ShapeDtypeStruct((B, 1, LATENT), jnp.float32),    # z_mean
        jax.ShapeDtypeStruct((B, 1, LATENT), jnp.float32),    # z_log_var
        jax.ShapeDtypeStruct((B, C_IN, L_SEQ), jnp.float32),  # decoded (NCL)
        jax.ShapeDtypeStruct((B, 1, 3), jnp.float32),         # prediction
    )
    out_specs = (
        pl.BlockSpec((1, 1, LATENT), lambda b: (b, 0, 0)),
        pl.BlockSpec((1, 1, LATENT), lambda b: (b, 0, 0)),
        pl.BlockSpec((1, 1, LATENT), lambda b: (b, 0, 0)),
        pl.BlockSpec((1, C_IN, L_SEQ), lambda b: (b, 0, 0)),
        pl.BlockSpec((1, 1, 3), lambda b: (b, 0, 0)),
    )
    enc, zm, zlv, dec, pred = pl.pallas_call(
        fused_vae_kernel,
        out_shape=out_shape,
        grid=(B,),
        in_specs=in_specs,
        out_specs=out_specs,
        scratch_shapes=[pltpu.VMEM((CH, PAD + L_SEQ), jnp.float32)],
        compiler_params=pltpu.CompilerParams(
            dimension_semantics=("parallel",)),
    )(x_ncl, eps, *[params[k] for k in W_KEYS])
    return enc[:, 0, :], zm[:, 0, :], zlv[:, 0, :], dec, pred[:, 0, :]


# ------------------------------ model glue ---------------------------------


def init_params(key):
    ks = jax.random.split(key, 8)
    s = 0.05

    def w(k, shape):
        return (s * jax.random.normal(k, shape)).astype(jnp.float32)

    def z(shape):
        return jnp.zeros(shape, jnp.float32)

    # channel-major layouts: conv weights (K, Cout, Cin), biases (Cout, 1)
    return {
        "w1": w(ks[0], (KSIZE, CH, C_IN)),        "b1": z((CH, 1)),
        "w2": w(ks[1], (KSIZE, CH, CH)),          "b2": z((CH, 1)),
        "wr": w(ks[2], (KSIZE, RED, CH)),         "br": z((RED, 1)),
        "wm": w(ks[3], (RED, LATENT)),            "bm": z((1, LATENT)),
        "wv": w(ks[4], (RED, LATENT)),            "bv": z((1, LATENT)),
        "wreg": w(ks[5], (LATENT + 2, 3)),        "breg": z((1, 3)),
        "wdec": w(ks[6], (LATENT, DEC_CH, L_SEQ)), "bdec": z((DEC_CH, 1)),
        "wcv": w(ks[7], (KSIZE, C_IN, DEC_CH)),   "bcv": z((C_IN, 1)),
    }


def vae_xai_forward(x, params, eps_key):
    """x: (B, 12, 401) NCL float32, same layout the PyTorch module expects."""
    x = x.astype(jnp.float32)
    xc = x[:, :C_IN, :]                                       # (B, 12, 401)
    B = xc.shape[0]
    eps = jax.random.normal(eps_key, (B, 1, LATENT), dtype=jnp.float32)

    encoded, z_mean, z_log_var, decoded, prediction = vae_xai_fused(
        xc, eps, params)                                      # fused kernel

    rri = x[:, jnp.array([0, 6]), L_SEQ]                      # (B, 2)
    pred_inf_input = jnp.concatenate([z_mean, rri], axis=1)   # (B, LATENT+2)

    # pred2=False and c=12 branch; decoded is already NCL (B, 12, 400).
    return encoded, z_mean, z_log_var, decoded, prediction, pred_inf_input


if __name__ == "__main__":
    params = init_params(jax.random.PRNGKey(42))
    kx, keps = jax.random.split(jax.random.PRNGKey(0))
    x = jax.random.normal(kx, (2, C_IN, 401), dtype=jnp.float32)

    outs = jax.jit(vae_xai_forward)(x, params, keps)
    jax.block_until_ready(outs)

    encoded, z_mean, z_log_var, decoded, prediction, pred_inf_input = outs
    assert encoded.shape == (2, LATENT)
    assert z_mean.shape == (2, LATENT) and z_log_var.shape == (2, LATENT)
    assert decoded.shape == (2, C_IN, L_SEQ)
    assert prediction.shape == (2, 3)
    assert pred_inf_input.shape == (2, LATENT + 2)
    assert all(bool(jnp.all(jnp.isfinite(o))) for o in outs)
    print("KERNEL_OK")
</pallas_src>

<mosaic_0001>
module attributes {stable_mosaic.version = 11 : i64} {
  func.func @fused_vae_kernel(%arg0: i32, %arg1: memref<1x12x401xf32, #tpu.memory_space<vmem>>, %arg2: memref<1x1x8xf32, #tpu.memory_space<vmem>>, %arg3: memref<3x32x12xf32, #tpu.memory_space<vmem>>, %arg4: memref<32x1xf32, #tpu.memory_space<vmem>>, %arg5: memref<3x32x32xf32, #tpu.memory_space<vmem>>, %arg6: memref<32x1xf32, #tpu.memory_space<vmem>>, %arg7: memref<3x32x32xf32, #tpu.memory_space<vmem>>, %arg8: memref<32x1xf32, #tpu.memory_space<vmem>>, %arg9: memref<32x8xf32, #tpu.memory_space<vmem>>, %arg10: memref<1x8xf32, #tpu.memory_space<vmem>>, %arg11: memref<32x8xf32, #tpu.memory_space<vmem>>, %arg12: memref<1x8xf32, #tpu.memory_space<vmem>>, %arg13: memref<10x3xf32, #tpu.memory_space<vmem>>, %arg14: memref<1x3xf32, #tpu.memory_space<vmem>>, %arg15: memref<8x16x400xf32, #tpu.memory_space<vmem>>, %arg16: memref<16x1xf32, #tpu.memory_space<vmem>>, %arg17: memref<3x12x16xf32, #tpu.memory_space<vmem>>, %arg18: memref<12x1xf32, #tpu.memory_space<vmem>>, %arg19: memref<1x1x8xf32, #tpu.memory_space<vmem>>, %arg20: memref<1x1x8xf32, #tpu.memory_space<vmem>>, %arg21: memref<1x1x8xf32, #tpu.memory_space<vmem>>, %arg22: memref<1x12x400xf32, #tpu.memory_space<vmem>>, %arg23: memref<1x1x3xf32, #tpu.memory_space<vmem>>, %arg24: memref<32x408xf32, #tpu.memory_space<vmem>>) attributes {dimension_semantics = [#tpu.dimension_semantics<parallel>], iteration_bounds = array<i64: 2>, scalar_prefetch = 0 : i64, scratch_operands = 1 : i64, tpu.core_type = #tpu.core_type<tc>, window_params = [{transform_indices = @transform_0, window_bounds = array<i64: 1, 12, 401>}, {transform_indices = @transform_1, window_bounds = array<i64: 1, 1, 8>}, {pipeline_mode = #tpu.pipeline_mode<synchronous>, transform_indices = @transform_2, window_bounds = array<i64: 3, 32, 12>}, {pipeline_mode = #tpu.pipeline_mode<synchronous>, transform_indices = @transform_3, window_bounds = array<i64: 32, 1>}, {pipeline_mode = #tpu.pipeline_mode<synchronous>, transform_indices = @transform_4, window_bounds = array<i64: 3, 32, 32>}, {pipeline_mode = #tpu.pipeline_mode<synchronous>, transform_indices = @transform_5, window_bounds = array<i64: 32, 1>}, {pipeline_mode = #tpu.pipeline_mode<synchronous>, transform_indices = @transform_6, window_bounds = array<i64: 3, 32, 32>}, {pipeline_mode = #tpu.pipeline_mode<synchronous>, transform_indices = @transform_7, window_bounds = array<i64: 32, 1>}, {pipeline_mode = #tpu.pipeline_mode<synchronous>, transform_indices = @transform_8, window_bounds = array<i64: 32, 8>}, {pipeline_mode = #tpu.pipeline_mode<synchronous>, transform_indices = @transform_9, window_bounds = array<i64: 1, 8>}, {pipeline_mode = #tpu.pipeline_mode<synchronous>, transform_indices = @transform_10, window_bounds = array<i64: 32, 8>}, {pipeline_mode = #tpu.pipeline_mode<synchronous>, transform_indices = @transform_11, window_bounds = array<i64: 1, 8>}, {pipeline_mode = #tpu.pipeline_mode<synchronous>, transform_indices = @transform_12, window_bounds = array<i64: 10, 3>}, {pipeline_mode = #tpu.pipeline_mode<synchronous>, transform_indices = @transform_13, window_bounds = array<i64: 1, 3>}, {pipeline_mode = #tpu.pipeline_mode<synchronous>, transform_indices = @transform_14, window_bounds = array<i64: 8, 16, 400>}, {pipeline_mode = #tpu.pipeline_mode<synchronous>, transform_indices = @transform_15, window_bounds = array<i64: 16, 1>}, {pipeline_mode = #tpu.pipeline_mode<synchronous>, transform_indices = @transform_16, window_bounds = array<i64: 3, 12, 16>}, {pipeline_mode = #tpu.pipeline_mode<synchronous>, transform_indices = @transform_17, window_bounds = array<i64: 12, 1>}, {transform_indices = @transform_18, window_bounds = array<i64: 1, 1, 8>}, {transform_indices = @transform_19, window_bounds = array<i64: 1, 1, 8>}, {transform_indices = @transform_20, window_bounds = array<i64: 1, 1, 8>}, {transform_indices = @transform_21, window_bounds = array<i64: 1, 12, 400>}, {transform_indices = @transform_22, window_bounds = array<i64: 1, 1, 3>}]} {
    %cst = arith.constant 0.000000e+00 : f32
    %0 = vector.broadcast %cst : f32 to vector<32x8xf32>
    %c0 = arith.constant 0 : index
    %c0_0 = arith.constant 0 : index
    %1 = vector.load %arg24[%c0, %c0_0] : memref<32x408xf32, #tpu.memory_space<vmem>>, vector<32x8xf32>
    tpu.vector_store %arg24[%c0, %c0_0], %0 {strides = array<i32>} : memref<32x408xf32, #tpu.memory_space<vmem>>, vector<32x8xf32>,
    %c0_1 = arith.constant 0 : index
    %c0_2 = arith.constant 0 : index
    %c0_3 = arith.constant 0 : index
    %2 = vector.load %arg1[%c0_1, %c0_2, %c0_3] : memref<1x12x401xf32, #tpu.memory_space<vmem>>, vector<1x12x401xf32>
    %3 = vector.shape_cast %2 : vector<1x12x401xf32> to vector<12x401xf32>
    %4 = vector.extract_strided_slice %3 {offsets = [0, 0], sizes = [12, 400], strides = [1, 1]} : vector<12x401xf32> to vector<12x400xf32>
    %5 = vector.extract_strided_slice %3 {offsets = [0, 400], sizes = [1, 1], strides = [1, 1]} : vector<12x401xf32> to vector<1x1xf32>
    %6 = vector.extract_strided_slice %3 {offsets = [6, 400], sizes = [1, 1], strides = [1, 1]} : vector<12x401xf32> to vector<1x1xf32>
    %c0_4 = arith.constant 0 : index
    %c8 = arith.constant 8 : index
    %7 = vector.load %arg24[%c0_4, %c8] : memref<32x408xf32, #tpu.memory_space<vmem>>, vector<12x400xf32>
    tpu.vector_store %arg24[%c0_4, %c8], %4 {strides = array<i32>} : memref<32x408xf32, #tpu.memory_space<vmem>>, vector<12x400xf32>,
    %c0_5 = arith.constant 0 : index
    %c6 = arith.constant 6 : index
    %8 = vector.load %arg24[%c0_5, %c6] : memref<32x408xf32, #tpu.memory_space<vmem>>, vector<12x400xf32>
    %c0_6 = arith.constant 0 : index
    %c0_7 = arith.constant 0 : index
    %c0_8 = arith.constant 0 : index
    %9 = vector.load %arg3[%c0_6, %c0_7, %c0_8] : memref<3x32x12xf32, #tpu.memory_space<vmem>>, vector<1x32x12xf32>
    %10 = vector.shape_cast %9 : vector<1x32x12xf32> to vector<32x12xf32>
    %cst_9 = arith.constant dense<0.000000e+00> : vector<32x400xf32>
    %11 = tpu.matmul %10, %8, %cst_9 {dimension_numbers = #tpu.dot_dimension_numbers<[1], [0], [0], [1], [0, 0, 1, 1], [], []>} : vector<32x12xf32>, vector<12x400xf32>, vector<32x400xf32> -> vector<32x400xf32>
    %c0_10 = arith.constant 0 : index
    %c7 = arith.constant 7 : index
    %12 = vector.load %arg24[%c0_10, %c7] : memref<32x408xf32, #tpu.memory_space<vmem>>, vector<12x400xf32>
    %c1 = arith.constant 1 : index
    %c0_11 = arith.constant 0 : index
    %c0_12 = arith.constant 0 : index
    %13 = vector.load %arg3[%c1, %c0_11, %c0_12] : memref<3x32x12xf32, #tpu.memory_space<vmem>>, vector<1x32x12xf32>
    %14 = vector.shape_cast %13 : vector<1x32x12xf32> to vector<32x12xf32>
    %cst_13 = arith.constant dense<0.000000e+00> : vector<32x400xf32>
    %15 = tpu.matmul %14, %12, %cst_13 {dimension_numbers = #tpu.dot_dimension_numbers<[1], [0], [0], [1], [0, 0, 1, 1], [], []>} : vector<32x12xf32>, vector<12x400xf32>, vector<32x400xf32> -> vector<32x400xf32>
    %16 = arith.addf %11, %15 : vector<32x400xf32>
    %c0_14 = arith.constant 0 : index
    %c8_15 = arith.constant 8 : index
    %17 = vector.load %arg24[%c0_14, %c8_15] : memref<32x408xf32, #tpu.memory_space<vmem>>, vector<12x400xf32>
    %c2 = arith.constant 2 : index
    %c0_16 = arith.constant 0 : index
    %c0_17 = arith.constant 0 : index
    %18 = vector.load %arg3[%c2, %c0_16, %c0_17] : memref<3x32x12xf32, #tpu.memory_space<vmem>>, vector<1x32x12xf32>
    %19 = vector.shape_cast %18 : vector<1x32x12xf32> to vector<32x12xf32>
    %cst_18 = arith.constant dense<0.000000e+00> : vector<32x400xf32>
    %20 = tpu.matmul %19, %17, %cst_18 {dimension_numbers = #tpu.dot_dimension_numbers<[1], [0], [0], [1], [0, 0, 1, 1], [], []>} : vector<32x12xf32>, vector<12x400xf32>, vector<32x400xf32> -> vector<32x400xf32>
    %21 = arith.addf %16, %20 : vector<32x400xf32>
    %c0_19 = arith.constant 0 : index
    %c0_20 = arith.constant 0 : index
    %22 = vector.load %arg4[%c0_19, %c0_20] : memref<32x1xf32, #tpu.memory_space<vmem>>, vector<32x1xf32>
    %23 = vector.broadcast %22 : vector<32x1xf32> to vector<32x400xf32>
    %24 = arith.addf %21, %23 : vector<32x400xf32>
    %cst_21 = arith.constant 0.000000e+00 : f32
    %25 = vector.broadcast %cst_21 : f32 to vector<32x400xf32>
    %26 = arith.cmpf ogt, %24, %25 : vector<32x400xf32>
    %cst_22 = arith.constant 0.00999999977 : f32
    %27 = vector.broadcast %cst_22 : f32 to vector<32x400xf32>
    %28 = arith.mulf %27, %24 : vector<32x400xf32>
    %29 = arith.select %26, %24, %28 : vector<32x400xi1>, vector<32x400xf32>
    %c0_23 = arith.constant 0 : index
    %c8_24 = arith.constant 8 : index
    %30 = vector.load %arg24[%c0_23, %c8_24] : memref<32x408xf32, #tpu.memory_space<vmem>>, vector<32x400xf32>
    tpu.vector_store %arg24[%c0_23, %c8_24], %29 {strides = array<i32>} : memref<32x408xf32, #tpu.memory_space<vmem>>, vector<32x400xf32>,
    %c0_25 = arith.constant 0 : index
    %c4 = arith.constant 4 : index
    %31 = vector.load %arg24[%c0_25, %c4] : memref<32x408xf32, #tpu.memory_space<vmem>>, vector<32x400xf32>
    %c0_26 = arith.constant 0 : index
    %c0_27 = arith.constant 0 : index
    %c0_28 = arith.constant 0 : index
    %32 = vector.load %arg5[%c0_26, %c0_27, %c0_28] : memref<3x32x32xf32, #tpu.memory_space<vmem>>, vector<1x32x32xf32>
    %33 = vector.shape_cast %32 : vector<1x32x32xf32> to vector<32x32xf32>
    %cst_29 = arith.constant dense<0.000000e+00> : vector<32x400xf32>
    %34 = tpu.matmul %33, %31, %cst_29 {dimension_numbers = #tpu.dot_dimension_numbers<[1], [0], [0], [1], [0, 0, 1, 1], [], []>} : vector<32x32xf32>, vector<32x400xf32>, vector<32x400xf32> -> vector<32x400xf32>
    %c0_30 = arith.constant 0 : index
    %c6_31 = arith.constant 6 : index
    %35 = vector.load %arg24[%c0_30, %c6_31] : memref<32x408xf32, #tpu.memory_space<vmem>>, vector<32x400xf32>
    %c1_32 = arith.constant 1 : index
    %c0_33 = arith.constant 0 : index
    %c0_34 = arith.constant 0 : index
    %36 = vector.load %arg5[%c1_32, %c0_33, %c0_34] : memref<3x32x32xf32, #tpu.memory_space<vmem>>, vector<1x32x32xf32>
    %37 = vector.shape_cast %36 : vector<1x32x32xf32> to vector<32x32xf32>
    %cst_35 = arith.constant dense<0.000000e+00> : vector<32x400xf32>
    %38 = tpu.matmul %37, %35, %cst_35 {dimension_numbers = #tpu.dot_dimension_numbers<[1], [0], [0], [1], [0, 0, 1, 1], [], []>} : vector<32x32xf32>, vector<32x400xf32>, vector<32x400xf32> -> vector<32x400xf32>
    %39 = arith.addf %34, %38 : vector<32x400xf32>
    %c0_36 = arith.constant 0 : index
    %c8_37 = arith.constant 8 : index
    %40 = vector.load %arg24[%c0_36, %c8_37] : memref<32x408xf32, #tpu.memory_space<vmem>>, vector<32x400xf32>
    %c2_38 = arith.constant 2 : index
    %c0_39 = arith.constant 0 : index
    %c0_40 = arith.constant 0 : index
    %41 = vector.load %arg5[%c2_38, %c0_39, %c0_40] : memref<3x32x32xf32, #tpu.memory_space<vmem>>, vector<1x32x32xf32>
    %42 = vector.shape_cast %41 : vector<1x32x32xf32> to vector<32x32xf32>
    %cst_41 = arith.constant dense<0.000000e+00> : vector<32x400xf32>
    %43 = tpu.matmul %42, %40, %cst_41 {dimension_numbers = #tpu.dot_dimension_numbers<[1], [0], [0], [1], [0, 0, 1, 1], [], []>} : vector<32x32xf32>, vector<32x400xf32>, vector<32x400xf32> -> vector<32x400xf32>
    %44 = arith.addf %39, %43 : vector<32x400xf32>
    %c0_42 = arith.constant 0 : index
    %c0_43 = arith.constant 0 : index
    %45 = vector.load %arg6[%c0_42, %c0_43] : memref<32x1xf32, #tpu.memory_space<vmem>>, vector<32x1xf32>
    %46 = vector.broadcast %45 : vector<32x1xf32> to vector<32x400xf32>
    %47 = arith.addf %44, %46 : vector<32x400xf32>
    %cst_44 = arith.constant 0.000000e+00 : f32
    %48 = vector.broadcast %cst_44 : f32 to vector<32x400xf32>
    %49 = arith.cmpf ogt, %47, %48 : vector<32x400xf32>
    %cst_45 = arith.constant 0.00999999977 : f32
    %50 = vector.broadcast %cst_45 : f32 to vector<32x400xf32>
    %51 = arith.mulf %50, %47 : vector<32x400xf32>
    %52 = arith.select %49, %47, %51 : vector<32x400xi1>, vector<32x400xf32>
    %c0_46 = arith.constant 0 : index
    %c8_47 = arith.constant 8 : index
    %53 = vector.load %arg24[%c0_46, %c8_47] : memref<32x408xf32, #tpu.memory_space<vmem>>, vector<32x400xf32>
    tpu.vector_store %arg24[%c0_46, %c8_47], %52 {strides = array<i32>} : memref<32x408xf32, #tpu.memory_space<vmem>>, vector<32x400xf32>,
    %c0_48 = arith.constant 0 : index
    %c0_49 = arith.constant 0 : index
    %54 = vector.load %arg24[%c0_48, %c0_49] : memref<32x408xf32, #tpu.memory_space<vmem>>, vector<32x400xf32>
    %c0_50 = arith.constant 0 : index
    %c0_51 = arith.constant 0 : index
    %c0_52 = arith.constant 0 : index
    %55 = vector.load %arg7[%c0_50, %c0_51, %c0_52] : memref<3x32x32xf32, #tpu.memory_space<vmem>>, vector<1x32x32xf32>
    %56 = vector.shape_cast %55 : vector<1x32x32xf32> to vector<32x32xf32>
    %cst_53 = arith.constant dense<0.000000e+00> : vector<32x400xf32>
    %57 = tpu.matmul %56, %54, %cst_53 {dimension_numbers = #tpu.dot_dimension_numbers<[1], [0], [0], [1], [0, 0, 1, 1], [], []>} : vector<32x32xf32>, vector<32x400xf32>, vector<32x400xf32> -> vector<32x400xf32>
    %c0_54 = arith.constant 0 : index
    %c4_55 = arith.constant 4 : index
    %58 = vector.load %arg24[%c0_54, %c4_55] : memref<32x408xf32, #tpu.memory_space<vmem>>, vector<32x400xf32>
    %c1_56 = arith.constant 1 : index
    %c0_57 = arith.constant 0 : index
    %c0_58 = arith.constant 0 : index
    %59 = vector.load %arg7[%c1_56, %c0_57, %c0_58] : memref<3x32x32xf32, #tpu.memory_space<vmem>>, vector<1x32x32xf32>
    %60 = vector.shape_cast %59 : vector<1x32x32xf32> to vector<32x32xf32>
    %cst_59 = arith.constant dense<0.000000e+00> : vector<32x400xf32>
    %61 = tpu.matmul %60, %58, %cst_59 {dimension_numbers = #tpu.dot_dimension_numbers<[1], [0], [0], [1], [0, 0, 1, 1], [], []>} : vector<32x32xf32>, vector<32x400xf32>, vector<32x400xf32> -> vector<32x400xf32>
    %62 = arith.addf %57, %61 : vector<32x400xf32>
    %c0_60 = arith.constant 0 : index
    %c8_61 = arith.constant 8 : index
    %63 = vector.load %arg24[%c0_60, %c8_61] : memref<32x408xf32, #tpu.memory_space<vmem>>, vector<32x400xf32>
    %c2_62 = arith.constant 2 : index
    %c0_63 = arith.constant 0 : index
    %c0_64 = arith.constant 0 : index
    %64 = vector.load %arg7[%c2_62, %c0_63, %c0_64] : memref<3x32x32xf32, #tpu.memory_space<vmem>>, vector<1x32x32xf32>
    %65 = vector.shape_cast %64 : vector<1x32x32xf32> to vector<32x32xf32>
    %cst_65 = arith.constant dense<0.000000e+00> : vector<32x400xf32>
    %66 = tpu.matmul %65, %63, %cst_65 {dimension_numbers = #tpu.dot_dimension_numbers<[1], [0], [0], [1], [0, 0, 1, 1], [], []>} : vector<32x32xf32>, vector<32x400xf32>, vector<32x400xf32> -> vector<32x400xf32>
    %67 = arith.addf %62, %66 : vector<32x400xf32>
    %c0_66 = arith.constant 0 : index
    %c0_67 = arith.constant 0 : index
    %68 = vector.load %arg8[%c0_66, %c0_67] : memref<32x1xf32, #tpu.memory_space<vmem>>, vector<32x1xf32>
    %69 = vector.broadcast %68 : vector<32x1xf32> to vector<32x400xf32>
    %70 = arith.addf %67, %69 : vector<32x400xf32>
    %cst_68 = arith.constant 0.000000e+00 : f32
    %71 = vector.broadcast %cst_68 : f32 to vector<32x400xf32>
    %72 = arith.cmpf ogt, %70, %71 : vector<32x400xf32>
    %cst_69 = arith.constant 0.00999999977 : f32
    %73 = vector.broadcast %cst_69 : f32 to vector<32x400xf32>
    %74 = arith.mulf %73, %70 : vector<32x400xf32>
    %75 = arith.select %72, %70, %74 : vector<32x400xi1>, vector<32x400xf32>
    %cst_70 = arith.constant dense<0xFF800000> : vector<32xf32>
    %76 = vector.multi_reduction <maximumf>, %75, %cst_70 [1] : vector<32x400xf32> to vector<32xf32>
    %77 = vector.shape_cast %76 : vector<32xf32> to vector<32x1xf32>
    %78 = vector.shape_cast %77 : vector<32x1xf32> to vector<32x1xf32>
    %79 = vector.broadcast %78 : vector<32x1xf32> to vector<32x8xf32>
    %c0_71 = arith.constant 0 : index
    %c0_72 = arith.constant 0 : index
    %80 = vector.load %arg9[%c0_71, %c0_72] : memref<32x8xf32, #tpu.memory_space<vmem>>, vector<32x8xf32>
    %81 = arith.mulf %80, %79 : vector<32x8xf32>
    %cst_73 = arith.constant dense<0.000000e+00> : vector<8xf32>
    %82 = vector.multi_reduction <add>, %81, %cst_73 [0] : vector<32x8xf32> to vector<8xf32>
    %83 = vector.shape_cast %82 : vector<8xf32> to vector<1x8xf32>
    %c0_74 = arith.constant 0 : index
    %c0_75 = arith.constant 0 : index
    %84 = vector.load %arg10[%c0_74, %c0_75] : memref<1x8xf32, #tpu.memory_space<vmem>>, vector<1x8xf32>
    %85 = arith.addf %83, %84 : vector<1x8xf32>
    %c0_76 = arith.constant 0 : index
    %c0_77 = arith.constant 0 : index
    %86 = vector.load %arg11[%c0_76, %c0_77] : memref<32x8xf32, #tpu.memory_space<vmem>>, vector<32x8xf32>
    %87 = arith.mulf %86, %79 : vector<32x8xf32>
    %cst_78 = arith.constant dense<0.000000e+00> : vector<8xf32>
    %88 = vector.multi_reduction <add>, %87, %cst_78 [0] : vector<32x8xf32> to vector<8xf32>
    %89 = vector.shape_cast %88 : vector<8xf32> to vector<1x8xf32>
    %c0_79 = arith.constant 0 : index
    %c0_80 = arith.constant 0 : index
    %90 = vector.load %arg12[%c0_79, %c0_80] : memref<1x8xf32, #tpu.memory_space<vmem>>, vector<1x8xf32>
    %91 = arith.addf %89, %90 : vector<1x8xf32>
    %c0_81 = arith.constant 0 : index
    %c0_82 = arith.constant 0 : index
    %c0_83 = arith.constant 0 : index
    %92 = vector.load %arg2[%c0_81, %c0_82, %c0_83] : memref<1x1x8xf32, #tpu.memory_space<vmem>>, vector<1x1x8xf32>
    %93 = vector.shape_cast %92 : vector<1x1x8xf32> to vector<1x8xf32>
    %cst_84 = arith.constant 5.000000e-01 : f32
    %94 = vector.broadcast %cst_84 : f32 to vector<1x8xf32>
    %95 = arith.mulf %94, %91 : vector<1x8xf32>
    %96 = math.exp %95 : vector<1x8xf32>
    %97 = arith.mulf %93, %96 : vector<1x8xf32>
    %98 = arith.addf %85, %97 : vector<1x8xf32>
    %c0_85 = arith.constant 0 : index
    %c0_86 = arith.constant 0 : index
    %99 = vector.load %arg13[%c0_85, %c0_86] : memref<10x3xf32, #tpu.memory_space<vmem>>, vector<8x3xf32>
    %cst_87 = arith.constant dense<0.000000e+00> : vector<1x3xf32>
    %100 = tpu.matmul %98, %99, %cst_87 {dimension_numbers = #tpu.dot_dimension_numbers<[1], [0], [0], [1], [0, 0, 1, 1], [], []>} : vector<1x8xf32>, vector<8x3xf32>, vector<1x3xf32> -> vector<1x3xf32>
    %c8_88 = arith.constant 8 : index
    %c0_89 = arith.constant 0 : index
    %101 = vector.load %arg13[%c8_88, %c0_89] : memref<10x3xf32, #tpu.memory_space<vmem>>, vector<1x3xf32>
    %102 = vector.broadcast %5 : vector<1x1xf32> to vector<1x3xf32>
    %103 = arith.mulf %102, %101 : vector<1x3xf32>
    %104 = arith.addf %100, %103 : vector<1x3xf32>
    %c9 = arith.constant 9 : index
    %c0_90 = arith.constant 0 : index
    %105 = vector.load %arg13[%c9, %c0_90] : memref<10x3xf32, #tpu.memory_space<vmem>>, vector<1x3xf32>
    %106 = vector.broadcast %6 : vector<1x1xf32> to vector<1x3xf32>
    %107 = arith.mulf %106, %105 : vector<1x3xf32>
    %108 = arith.addf %104, %107 : vector<1x3xf32>
    %c0_91 = arith.constant 0 : index
    %c0_92 = arith.constant 0 : index
    %109 = vector.load %arg14[%c0_91, %c0_92] : memref<1x3xf32, #tpu.memory_space<vmem>>, vector<1x3xf32>
    %110 = arith.addf %108, %109 : vector<1x3xf32>
    %111 = vector.shape_cast %98 : vector<1x8xf32> to vector<1x8xf32>
    %112 = vector.broadcast %111 : vector<1x8xf32> to vector<16x8xf32>
    %113 = vector.extract_strided_slice %112 {offsets = [0, 0], sizes = [16, 1], strides = [1, 1]} : vector<16x8xf32> to vector<16x1xf32>
    %c0_93 = arith.constant 0 : index
    %c0_94 = arith.constant 0 : index
    %c0_95 = arith.constant 0 : index
    %114 = vector.load %arg15[%c0_93, %c0_94, %c0_95] : memref<8x16x400xf32, #tpu.memory_space<vmem>>, vector<1x16x400xf32>
    %115 = vector.shape_cast %114 : vector<1x16x400xf32> to vector<16x400xf32>
    %116 = vector.broadcast %113 : vector<16x1xf32> to vector<16x400xf32>
    %117 = arith.mulf %116, %115 : vector<16x400xf32>
    %118 = vector.extract_strided_slice %112 {offsets = [0, 1], sizes = [16, 1], strides = [1, 1]} : vector<16x8xf32> to vector<16x1xf32>
    %c1_96 = arith.constant 1 : index
    %c0_97 = arith.constant 0 : index
    %c0_98 = arith.constant 0 : index
    %119 = vector.load %arg15[%c1_96, %c0_97, %c0_98] : memref<8x16x400xf32, #tpu.memory_space<vmem>>, vector<1x16x400xf32>
    %120 = vector.shape_cast %119 : vector<1x16x400xf32> to vector<16x400xf32>
    %121 = vector.broadcast %118 : vector<16x1xf32> to vector<16x400xf32>
    %122 = arith.mulf %121, %120 : vector<16x400xf32>
    %123 = arith.addf %117, %122 : vector<16x400xf32>
    %124 = vector.extract_strided_slice %112 {offsets = [0, 2], sizes = [16, 1], strides = [1, 1]} : vector<16x8xf32> to vector<16x1xf32>
    %c2_99 = arith.constant 2 : index
    %c0_100 = arith.constant 0 : index
    %c0_101 = arith.constant 0 : index
    %125 = vector.load %arg15[%c2_99, %c0_100, %c0_101] : memref<8x16x400xf32, #tpu.memory_space<vmem>>, vector<1x16x400xf32>
    %126 = vector.shape_cast %125 : vector<1x16x400xf32> to vector<16x400xf32>
    %127 = vector.broadcast %124 : vector<16x1xf32> to vector<16x400xf32>
    %128 = arith.mulf %127, %126 : vector<16x400xf32>
    %129 = arith.addf %123, %128 : vector<16x400xf32>
    %130 = vector.extract_strided_slice %112 {offsets = [0, 3], sizes = [16, 1], strides = [1, 1]} : vector<16x8xf32> to vector<16x1xf32>
    %c3 = arith.constant 3 : index
    %c0_102 = arith.constant 0 : index
    %c0_103 = arith.constant 0 : index
    %131 = vector.load %arg15[%c3, %c0_102, %c0_103] : memref<8x16x400xf32, #tpu.memory_space<vmem>>, vector<1x16x400xf32>
    %132 = vector.shape_cast %131 : vector<1x16x400xf32> to vector<16x400xf32>
    %133 = vector.broadcast %130 : vector<16x1xf32> to vector<16x400xf32>
    %134 = arith.mulf %133, %132 : vector<16x400xf32>
    %135 = arith.addf %129, %134 : vector<16x400xf32>
    %136 = vector.extract_strided_slice %112 {offsets = [0, 4], sizes = [16, 1], strides = [1, 1]} : vector<16x8xf32> to vector<16x1xf32>
    %c4_104 = arith.constant 4 : index
    %c0_105 = arith.constant 0 : index
    %c0_106 = arith.constant 0 : index
    %137 = vector.load %arg15[%c4_104, %c0_105, %c0_106] : memref<8x16x400xf32, #tpu.memory_space<vmem>>, vector<1x16x400xf32>
    %138 = vector.shape_cast %137 : vector<1x16x400xf32> to vector<16x400xf32>
    %139 = vector.broadcast %136 : vector<16x1xf32> to vector<16x400xf32>
    %140 = arith.mulf %139, %138 : vector<16x400xf32>
    %141 = arith.addf %135, %140 : vector<16x400xf32>
    %142 = vector.extract_strided_slice %112 {offsets = [0, 5], sizes = [16, 1], strides = [1, 1]} : vector<16x8xf32> to vector<16x1xf32>
    %c5 = arith.constant 5 : index
    %c0_107 = arith.constant 0 : index
    %c0_108 = arith.constant 0 : index
    %143 = vector.load %arg15[%c5, %c0_107, %c0_108] : memref<8x16x400xf32, #tpu.memory_space<vmem>>, vector<1x16x400xf32>
    %144 = vector.shape_cast %143 : vector<1x16x400xf32> to vector<16x400xf32>
    %145 = vector.broadcast %142 : vector<16x1xf32> to vector<16x400xf32>
    %146 = arith.mulf %145, %144 : vector<16x400xf32>
    %147 = arith.addf %141, %146 : vector<16x400xf32>
    %148 = vector.extract_strided_slice %112 {offsets = [0, 6], sizes = [16, 1], strides = [1, 1]} : vector<16x8xf32> to vector<16x1xf32>
    %c6_109 = arith.constant 6 : index
    %c0_110 = arith.constant 0 : index
    %c0_111 = arith.constant 0 : index
    %149 = vector.load %arg15[%c6_109, %c0_110, %c0_111] : memref<8x16x400xf32, #tpu.memory_space<vmem>>, vector<1x16x400xf32>
    %150 = vector.shape_cast %149 : vector<1x16x400xf32> to vector<16x400xf32>
    %151 = vector.broadcast %148 : vector<16x1xf32> to vector<16x400xf32>
    %152 = arith.mulf %151, %150 : vector<16x400xf32>
    %153 = arith.addf %147, %152 : vector<16x400xf32>
    %154 = vector.extract_strided_slice %112 {offsets = [0, 7], sizes = [16, 1], strides = [1, 1]} : vector<16x8xf32> to vector<16x1xf32>
    %c7_112 = arith.constant 7 : index
    %c0_113 = arith.constant 0 : index
    %c0_114 = arith.constant 0 : index
    %155 = vector.load %arg15[%c7_112, %c0_113, %c0_114] : memref<8x16x400xf32, #tpu.memory_space<vmem>>, vector<1x16x400xf32>
    %156 = vector.shape_cast %155 : vector<1x16x400xf32> to vector<16x400xf32>
    %157 = vector.broadcast %154 : vector<16x1xf32> to vector<16x400xf32>
    %158 = arith.mulf %157, %156 : vector<16x400xf32>
    %159 = arith.addf %153, %158 : vector<16x400xf32>
    %c0_115 = arith.constant 0 : index
    %c0_116 = arith.constant 0 : index
    %160 = vector.load %arg16[%c0_115, %c0_116] : memref<16x1xf32, #tpu.memory_space<vmem>>, vector<16x1xf32>
    %161 = vector.broadcast %160 : vector<16x1xf32> to vector<16x400xf32>
    %162 = arith.addf %159, %161 : vector<16x400xf32>
    %cst_117 = arith.constant 0.000000e+00 : f32
    %163 = vector.broadcast %cst_117 : f32 to vector<16x400xf32>
    %164 = arith.cmpf ogt, %162, %163 : vector<16x400xf32>
    %cst_118 = arith.constant 0.00999999977 : f32
    %165 = vector.broadcast %cst_118 : f32 to vector<16x400xf32>
    %166 = arith.mulf %165, %162 : vector<16x400xf32>
    %167 = arith.select %164, %162, %166 : vector<16x400xi1>, vector<16x400xf32>
    %c0_119 = arith.constant 0 : index
    %c8_120 = arith.constant 8 : index
    %168 = vector.load %arg24[%c0_119, %c8_120] : memref<32x408xf32, #tpu.memory_space<vmem>>, vector<16x400xf32>
    tpu.vector_store %arg24[%c0_119, %c8_120], %167 {strides = array<i32>} : memref<32x408xf32, #tpu.memory_space<vmem>>, vector<16x400xf32>,
    %c0_121 = arith.constant 0 : index
    %c6_122 = arith.constant 6 : index
    %169 = vector.load %arg24[%c0_121, %c6_122] : memref<32x408xf32, #tpu.memory_space<vmem>>, vector<16x400xf32>
    %c0_123 = arith.constant 0 : index
    %c0_124 = arith.constant 0 : index
    %c0_125 = arith.constant 0 : index
    %170 = vector.load %arg17[%c0_123, %c0_124, %c0_125] : memref<3x12x16xf32, #tpu.memory_space<vmem>>, vector<1x12x16xf32>
    %171 = vector.shape_cast %170 : vector<1x12x16xf32> to vector<12x16xf32>
    %cst_126 = arith.constant dense<0.000000e+00> : vector<12x400xf32>
    %172 = tpu.matmul %171, %169, %cst_126 {dimension_numbers = #tpu.dot_dimension_numbers<[1], [0], [0], [1], [0, 0, 1, 1], [], []>} : vector<12x16xf32>, vector<16x400xf32>, vector<12x400xf32> -> vector<12x400xf32>
    %c0_127 = arith.constant 0 : index
    %c7_128 = arith.constant 7 : index
    %173 = vector.load %arg24[%c0_127, %c7_128] : memref<32x408xf32, #tpu.memory_space<vmem>>, vector<16x400xf32>
    %c1_129 = arith.constant 1 : index
    %c0_130 = arith.constant 0 : index
    %c0_131 = arith.constant 0 : index
    %174 = vector.load %arg17[%c1_129, %c0_130, %c0_131] : memref<3x12x16xf32, #tpu.memory_space<vmem>>, vector<1x12x16xf32>
    %175 = vector.shape_cast %174 : vector<1x12x16xf32> to vector<12x16xf32>
    %cst_132 = arith.constant dense<0.000000e+00> : vector<12x400xf32>
    %176 = tpu.matmul %175, %173, %cst_132 {dimension_numbers = #tpu.dot_dimension_numbers<[1], [0], [0], [1], [0, 0, 1, 1], [], []>} : vector<12x16xf32>, vector<16x400xf32>, vector<12x400xf32> -> vector<12x400xf32>
    %177 = arith.addf %172, %176 : vector<12x400xf32>
    %c0_133 = arith.constant 0 : index
    %c8_134 = arith.constant 8 : index
    %178 = vector.load %arg24[%c0_133, %c8_134] : memref<32x408xf32, #tpu.memory_space<vmem>>, vector<16x400xf32>
    %c2_135 = arith.constant 2 : index
    %c0_136 = arith.constant 0 : index
    %c0_137 = arith.constant 0 : index
    %179 = vector.load %arg17[%c2_135, %c0_136, %c0_137] : memref<3x12x16xf32, #tpu.memory_space<vmem>>, vector<1x12x16xf32>
    %180 = vector.shape_cast %179 : vector<1x12x16xf32> to vector<12x16xf32>
    %cst_138 = arith.constant dense<0.000000e+00> : vector<12x400xf32>
    %181 = tpu.matmul %180, %178, %cst_138 {dimension_numbers = #tpu.dot_dimension_numbers<[1], [0], [0], [1], [0, 0, 1, 1], [], []>} : vector<12x16xf32>, vector<16x400xf32>, vector<12x400xf32> -> vector<12x400xf32>
    %182 = arith.addf %177, %181 : vector<12x400xf32>
    %c0_139 = arith.constant 0 : index
    %c0_140 = arith.constant 0 : index
    %183 = vector.load %arg18[%c0_139, %c0_140] : memref<12x1xf32, #tpu.memory_space<vmem>>, vector<12x1xf32>
    %184 = vector.broadcast %183 : vector<12x1xf32> to vector<12x400xf32>
    %185 = arith.addf %182, %184 : vector<12x400xf32>
    %c0_141 = arith.constant 0 : index
    %c0_142 = arith.constant 0 : index
    %c0_143 = arith.constant 0 : index
    %186 = vector.load %arg19[%c0_141, %c0_142, %c0_143] : memref<1x1x8xf32, #tpu.memory_space<vmem>>, vector<1x1x8xf32>
    %187 = vector.shape_cast %186 : vector<1x1x8xf32> to vector<1x8xf32>
    %188 = vector.shape_cast %98 : vector<1x8xf32> to vector<1x1x8xf32>
    tpu.vector_store %arg19[%c0_141, %c0_142, %c0_143], %188 {strides = array<i32>} : memref<1x1x8xf32, #tpu.memory_space<vmem>>, vector<1x1x8xf32>,
    %c0_144 = arith.constant 0 : index
    %c0_145 = arith.constant 0 : index
    %c0_146 = arith.constant 0 : index
    %189 = vector.load %arg20[%c0_144, %c0_145, %c0_146] : memref<1x1x8xf32, #tpu.memory_space<vmem>>, vector<1x1x8xf32>
    %190 = vector.shape_cast %189 : vector<1x1x8xf32> to vector<1x8xf32>
    %191 = vector.shape_cast %85 : vector<1x8xf32> to vector<1x1x8xf32>
    tpu.vector_store %arg20[%c0_144, %c0_145, %c0_146], %191 {strides = array<i32>} : memref<1x1x8xf32, #tpu.memory_space<vmem>>, vector<1x1x8xf32>,
    %c0_147 = arith.constant 0 : index
    %c0_148 = arith.constant 0 : index
    %c0_149 = arith.constant 0 : index
    %192 = vector.load %arg21[%c0_147, %c0_148, %c0_149] : memref<1x1x8xf32, #tpu.memory_space<vmem>>, vector<1x1x8xf32>
    %193 = vector.shape_cast %192 : vector<1x1x8xf32> to vector<1x8xf32>
    %194 = vector.shape_cast %91 : vector<1x8xf32> to vector<1x1x8xf32>
    tpu.vector_store %arg21[%c0_147, %c0_148, %c0_149], %194 {strides = array<i32>} : memref<1x1x8xf32, #tpu.memory_space<vmem>>, vector<1x1x8xf32>,
    %c0_150 = arith.constant 0 : index
    %c0_151 = arith.constant 0 : index
    %c0_152 = arith.constant 0 : index
    %195 = vector.load %arg23[%c0_150, %c0_151, %c0_152] : memref<1x1x3xf32, #tpu.memory_space<vmem>>, vector<1x1x3xf32>
    %196 = vector.shape_cast %195 : vector<1x1x3xf32> to vector<1x3xf32>
    %197 = vector.shape_cast %110 : vector<1x3xf32> to vector<1x1x3xf32>
    tpu.vector_store %arg23[%c0_150, %c0_151, %c0_152], %197 {strides = array<i32>} : memref<1x1x3xf32, #tpu.memory_space<vmem>>, vector<1x1x3xf32>,
    %c0_153 = arith.constant 0 : index
    %c0_154 = arith.constant 0 : index
    %c0_155 = arith.constant 0 : index
    %198 = vector.load %arg22[%c0_153, %c0_154, %c0_155] : memref<1x12x400xf32, #tpu.memory_space<vmem>>, vector<1x12x400xf32>
    %199 = vector.shape_cast %198 : vector<1x12x400xf32> to vector<12x400xf32>
    %200 = vector.shape_cast %185 : vector<12x400xf32> to vector<1x12x400xf32>
    tpu.vector_store %arg22[%c0_153, %c0_154, %c0_155], %200 {strides = array<i32>} : memref<1x12x400xf32, #tpu.memory_space<vmem>>, vector<1x12x400xf32>,
    return
  }
  func.func @transform_0(%arg0: i32) -> (i32, i32, i32) {
    %c0_i32 = arith.constant 0 : i32
    %c0_i32_0 = arith.constant 0 : i32
    %c0_i32_1 = arith.constant 0 : i32
    return %arg0, %c0_i32, %c0_i32_0 : i32, i32, i32
  }
  func.func @transform_1(%arg0: i32) -> (i32, i32, i32) {
    %c0_i32 = arith.constant 0 : i32
    %c0_i32_0 = arith.constant 0 : i32
    %c0_i32_1 = arith.constant 0 : i32
    return %arg0, %c0_i32, %c0_i32_0 : i32, i32, i32
  }
  func.func @transform_2(%arg0: i32) -> (i32, i32, i32) {
    %c0_i32 = arith.constant 0 : i32
    %c0_i32_0 = arith.constant 0 : i32
    %c0_i32_1 = arith.constant 0 : i32
    %c0_i32_2 = arith.constant 0 : i32
    return %c0_i32, %c0_i32_0, %c0_i32_1 : i32, i32, i32
  }
  func.func @transform_3(%arg0: i32) -> (i32, i32) {
    %c0_i32 = arith.constant 0 : i32
    %c0_i32_0 = arith.constant 0 : i32
    %c0_i32_1 = arith.constant 0 : i32
    return %c0_i32, %c0_i32_0 : i32, i32
  }
  func.func @transform_4(%arg0: i32) -> (i32, i32, i32) {
    %c0_i32 = arith.constant 0 : i32
    %c0_i32_0 = arith.constant 0 : i32
    %c0_i32_1 = arith.constant 0 : i32
    %c0_i32_2 = arith.constant 0 : i32
    return %c0_i32, %c0_i32_0, %c0_i32_1 : i32, i32, i32
  }
  func.func @transform_5(%arg0: i32) -> (i32, i32) {
    %c0_i32 = arith.constant 0 : i32
    %c0_i32_0 = arith.constant 0 : i32
    %c0_i32_1 = arith.constant 0 : i32
    return %c0_i32, %c0_i32_0 : i32, i32
  }
  func.func @transform_6(%arg0: i32) -> (i32, i32, i32) {
    %c0_i32 = arith.constant 0 : i32
    %c0_i32_0 = arith.constant 0 : i32
    %c0_i32_1 = arith.constant 0 : i32
    %c0_i32_2 = arith.constant 0 : i32
    return %c0_i32, %c0_i32_0, %c0_i32_1 : i32, i32, i32
  }
  func.func @transform_7(%arg0: i32) -> (i32, i32) {
    %c0_i32 = arith.constant 0 : i32
    %c0_i32_0 = arith.constant 0 : i32
    %c0_i32_1 = arith.constant 0 : i32
    return %c0_i32, %c0_i32_0 : i32, i32
  }
  func.func @transform_8(%arg0: i32) -> (i32, i32) {
    %c0_i32 = arith.constant 0 : i32
    %c0_i32_0 = arith.constant 0 : i32
    %c0_i32_1 = arith.constant 0 : i32
    return %c0_i32, %c0_i32_0 : i32, i32
  }
  func.func @transform_9(%arg0: i32) -> (i32, i32) {
    %c0_i32 = arith.constant 0 : i32
    %c0_i32_0 = arith.constant 0 : i32
    %c0_i32_1 = arith.constant 0 : i32
    return %c0_i32, %c0_i32_0 : i32, i32
  }
  func.func @transform_10(%arg0: i32) -> (i32, i32) {
    %c0_i32 = arith.constant 0 : i32
    %c0_i32_0 = arith.constant 0 : i32
    %c0_i32_1 = arith.constant 0 : i32
    return %c0_i32, %c0_i32_0 : i32, i32
  }
  func.func @transform_11(%arg0: i32) -> (i32, i32) {
    %c0_i32 = arith.constant 0 : i32
    %c0_i32_0 = arith.constant 0 : i32
    %c0_i32_1 = arith.constant 0 : i32
    return %c0_i32, %c0_i32_0 : i32, i32
  }
  func.func @transform_12(%arg0: i32) -> (i32, i32) {
    %c0_i32 = arith.constant 0 : i32
    %c0_i32_0 = arith.constant 0 : i32
    %c0_i32_1 = arith.constant 0 : i32
    return %c0_i32, %c0_i32_0 : i32, i32
  }
  func.func @transform_13(%arg0: i32) -> (i32, i32) {
    %c0_i32 = arith.constant 0 : i32
    %c0_i32_0 = arith.constant 0 : i32
    %c0_i32_1 = arith.constant 0 : i32
    return %c0_i32, %c0_i32_0 : i32, i32
  }
  func.func @transform_14(%arg0: i32) -> (i32, i32, i32) {
    %c0_i32 = arith.constant 0 : i32
    %c0_i32_0 = arith.constant 0 : i32
    %c0_i32_1 = arith.constant 0 : i32
    %c0_i32_2 = arith.constant 0 : i32
    return %c0_i32, %c0_i32_0, %c0_i32_1 : i32, i32, i32
  }
  func.func @transform_15(%arg0: i32) -> (i32, i32) {
    %c0_i32 = arith.constant 0 : i32
    %c0_i32_0 = arith.constant 0 : i32
    %c0_i32_1 = arith.constant 0 : i32
    return %c0_i32, %c0_i32_0 : i32, i32
  }
  func.func @transform_16(%arg0: i32) -> (i32, i32, i32) {
    %c0_i32 = arith.constant 0 : i32
    %c0_i32_0 = arith.constant 0 : i32
    %c0_i32_1 = arith.constant 0 : i32
    %c0_i32_2 = arith.constant 0 : i32
    return %c0_i32, %c0_i32_0, %c0_i32_1 : i32, i32, i32
  }
  func.func @transform_17(%arg0: i32) -> (i32, i32) {
    %c0_i32 = arith.constant 0 : i32
    %c0_i32_0 = arith.constant 0 : i32
    %c0_i32_1 = arith.constant 0 : i32
    return %c0_i32, %c0_i32_0 : i32, i32
  }
  func.func @transform_18(%arg0: i32) -> (i32, i32, i32) {
    %c0_i32 = arith.constant 0 : i32
    %c0_i32_0 = arith.constant 0 : i32
    %c0_i32_1 = arith.constant 0 : i32
    return %arg0, %c0_i32, %c0_i32_0 : i32, i32, i32
  }
  func.func @transform_19(%arg0: i32) -> (i32, i32, i32) {
    %c0_i32 = arith.constant 0 : i32
    %c0_i32_0 = arith.constant 0 : i32
    %c0_i32_1 = arith.constant 0 : i32
    return %arg0, %c0_i32, %c0_i32_0 : i32, i32, i32
  }
  func.func @transform_20(%arg0: i32) -> (i32, i32, i32) {
    %c0_i32 = arith.constant 0 : i32
    %c0_i32_0 = arith.constant 0 : i32
    %c0_i32_1 = arith.constant 0 : i32
    return %arg0, %c0_i32, %c0_i32_0 : i32, i32, i32
  }
  func.func @transform_21(%arg0: i32) -> (i32, i32, i32) {
    %c0_i32 = arith.constant 0 : i32
    %c0_i32_0 = arith.constant 0 : i32
    %c0_i32_1 = arith.constant 0 : i32
    return %arg0, %c0_i32, %c0_i32_0 : i32, i32, i32
  }
  func.func @transform_22(%arg0: i32) -> (i32, i32, i32) {
    %c0_i32 = arith.constant 0 : i32
    %c0_i32_0 = arith.constant 0 : i32
    %c0_i32_1 = arith.constant 0 : i32
    return %arg0, %c0_i32, %c0_i32_0 : i32, i32, i32
  }
}

</mosaic_0001>

<bundles_post_ra>
// kernel: vae_xai_forward.1
= control target key start
LH: loop header
LB: loop body
LE: loop exit
PB: predicated region body
PF: predicated region fallthrough
CT: control target
= control target key end

     0   :  { %s7600_s0 = inlined_call_operand.vmem [shape: f32[2,12,401], index: 0, kind: input, shape index: {}]   ;;  %s7601_s1 = inlined_call_operand.vmem [shape: f32[2,1,8], index: 1, kind: input, shape index: {}]   ;;  %s7602_s2 = inlined_call_operand.vmem [shape: f32[3,32,12], index: 2, kind: input, shape index: {}]   ;;  %s7603_s3 = inlined_call_operand.vmem [shape: f32[32,1], index: 3, kind: input, shape index: {}]   ;;  %s7604_s4 = inlined_call_operand.hbm [shape: f32[3,32,32], index: 4, kind: input, shape index: {}]   ;;  %s7605_s5 = inlined_call_operand.vmem [shape: f32[32,1], index: 5, kind: input, shape index: {}]   ;;  %s7606_s6 = inlined_call_operand.hbm [shape: f32[3,32,32], index: 6, kind: input, shape index: {}]   ;;  %s7607_s7 = inlined_call_operand.vmem [shape: f32[32,1], index: 7, kind: input, shape index: {}]   ;;  %s7608_s8 = inlined_call_operand.vmem [shape: f32[32,8], index: 8, kind: input, shape index: {}]   ;;  %s7609_s9 = inlined_call_operand.hbm [shape: f32[1,8], index: 9, kind: input, shape index: {}]   ;;  %s7610_s10 = inlined_call_operand.vmem [shape: f32[32,8], index: 10, kind: input, shape index: {}]   ;;  %s7611_s11 = inlined_call_operand.hbm [shape: f32[1,8], index: 11, kind: input, shape index: {}]   ;;  %s7612_s12 = inlined_call_operand.vmem [shape: f32[10,3], index: 12, kind: input, shape index: {}]   ;;  %s7613_s13 = inlined_call_operand.hbm [shape: f32[1,3], index: 13, kind: input, shape index: {}]   ;;  %s7614_s14 = inlined_call_operand.hbm [shape: f32[8,16,400], index: 14, kind: input, shape index: {}]   ;;  %s7615_s15 = inlined_call_operand.vmem [shape: f32[16,1], index: 15, kind: input, shape index: {}]   ;;  %s7616_s16 = inlined_call_operand.hbm [shape: f32[3,12,16], index: 16, kind: input, shape index: {}]   ;;  %s7617_s17 = inlined_call_operand.vmem [shape: f32[12,1], index: 17, kind: input, shape index: {}]   ;;  %s7618_s18 = inlined_call_operand.hbm [shape: f32[2,1,8], index: 18, kind: output, shape index: {0}]   ;;  %s7619_s19 = inlined_call_operand.vmem [shape: f32[2,1,8], index: 19, kind: output, shape index: {1}]   ;;  %s7620_s20 = inlined_call_operand.hbm [shape: f32[2,1,8], index: 20, kind: output, shape index: {2}]   ;;  %s7621_s21 = inlined_call_operand.vmem [shape: f32[2,12,400], index: 21, kind: output, shape index: {3}]   ;;  %s7622_s22 = inlined_call_operand.hbm [shape: f32[2,1,3], index: 22, kind: output, shape index: {4}]  }
   0x1   :  { %7656 = sst [smem:[#allocation32_spill]] %s7600_s0 }
   0x2   :  { %7657 = sst [smem:[#allocation33_spill]] %s7601_s1 }
   0x3   :  { %7658 = sst [smem:[#allocation34_spill]] %s7602_s2 }
   0x4   :  { %7659 = sst [smem:[#allocation35_spill]] %s7603_s3 }
   0x5   :  { %7660 = sst [smem:[#allocation36_spill]] %s7604_s4 }
   0x6   :  { %7661 = sst [smem:[#allocation37_spill]] %s7605_s5 }
   0x7   :  { %7662 = sst [smem:[#allocation38_spill]] %s7606_s6 }
   0x8   :  { %7663 = sst [smem:[#allocation39_spill]] %s7607_s7 }
   0x9   :  { %7664 = sst [smem:[#allocation40_spill]] %s7608_s8 }
   0xa   :  { %7665 = sst [smem:[#allocation41_spill]] %s7609_s9 }
   0xb   :  { %7666 = sst [smem:[#allocation42_spill]] %s7610_s10 }
   0xc   :  { %7667 = sst [smem:[#allocation43_spill]] %s7611_s11 }
   0xd   :  { %7668 = sst [smem:[#allocation44_spill]] %s7615_s15 }
   0xe   :  { %7669 = sst [smem:[#allocation45_spill]] %s7617_s17 }
   0xf   :  { %7670 = sst [smem:[#allocation46_spill]] %s7618_s18 }
  0x10   :  { %7671 = sst [smem:[#allocation47_spill]] %s7620_s20 }
  0x11   :  { %7672 = sst [smem:[#allocation48_spill]] %s7621_s21 }
  0x12   :  { %7673 = sst [smem:[#allocation49_spill]] %s7622_s22 }
  0x13   :  { %28 = vsyncpa [#allocation4], 0 }
  0x14   :  { %29 = vsyncpa [#allocation7], 0 }
  0x15   :  { %30 = vsyncpa [#allocation10], 0 }
  0x16   :  { %31 = vsyncpa [#allocation13], 0 }
  0x17   :  { %32 = vsyncpa [#allocation5], 0 }
  0x18   :  { %34 = vsyncpa [#allocation5 + $0x1], 0 }
  0x19   :  { %35 = vsyncpa [#allocation17], 0 }
  0x1a   :  { %37 = vsyncpa [#allocation17 + $0x1], 0  ;;  %s6411_s3 = smov 0   ;;  %s6413_s28 = smov 0  }
  0x1b   :  { %s6415_s29 = smov 0   ;;  %s6417_s30 = smov 0  }
  0x1c LB: > { %7674 = sst [smem:[#allocation25_spill]] %s6254_s3  ;;  %s6432_s4 = sadd.s32 4294967295, %s6266_s30   ;;  %s6266_s30 = sphi %s6417_s30, %s7731_s30   ;;  %s6262_s29 = sphi %s6415_s29, %s7733_s29   ;;  %s6258_s28 = sphi %s6413_s28, %s7735_s28   ;;  %s6254_s3 = sphi %s6411_s3, %s7734_s3  }
  0x1d   : > { %7675 = sst [smem:[#allocation26_spill]] %s6262_s29  ;;  %s7628_s0 = sadd.s32 4294967294, %s6266_s30  }
  0x1e   : > { %7676 = sst [smem:[#allocation27_spill]] %s6266_s30  ;;  %s6436_s23 = sadd.s32 1, %s6266_s30  }
  0x1f   : > { %7677 = sst [smem:[#allocation28_spill]] %s6436_s23  ;;  %s438_s1 = sadd.s32 1, %s6262_s29 }
  0x20   : > { %s435_s5 = ssub.s32 %s6266_s30, %s6436_s23  ;;  %p448_p0 = scmp.ne.s32.totalorder %s6262_s29, %s6258_s28 }
  0x21   : > { %p436_p1 = scmp.eq.s32.totalorder %s435_s5, 0  ;;  %p449_p2 = scmp.eq.s32.totalorder %s6432_s4, 1 }
  0x22   : > { %p454_p3 = scmp.ne.s32.totalorder %s6258_s28, %s6254_s3  ;;  %p455_p4 = scmp.eq.s32.totalorder %s7628_s0, 1 }
  0x23   : > { %s6449_s24 = scalar_select %p436_p1, %s6262_s29, %s438_s1  }
  0x24   : > { %p6451_p5 = por %p449_p2, %p448_p0  ;;  %p6455_p6 = por %p455_p4, %p454_p3 }
  0x25   : > { %7678 = sst [smem:[#allocation29_spill]] %s6449_s24  ;;  %p5043_p7 = scmp.ge.s32.totalorder %s6266_s30, 1 }
  0x26   : > { %s7679_s6 = scalar_select %p6451_p5, 1, 0 }
  0x27   : > { %s7681_s25 = scalar_select %p6455_p6, 1, 0 }
  0x28   : > { %7680 = sst [smem:[#allocation30_spill]] %s7679_s6  ;;  %p566_p8 = scmp.lt.s32.totalorder %s6266_s30, 3 }
  0x29   : > { %7682 = sst [smem:[#allocation31_spill]] %s7681_s25  ;;  %p7638_p9 = scmp.eq.s32.totalorder %s6432_s4, 0 }
  0x2a   : > { %p6462_p10 = pnand %p5043_p7, %p566_p8  ;;  %s6268_s2 = smov [#allocation6]  }
  0x2b   : > { %s600_s27 = sshll.u32 %s6268_s2, 4  ;;  %s6269_s5 = smov [#allocation9]   ;;  %s6468_s27 = int_to_ptr.vmem [resolvable:$true] %s600_s27 }
  0x2c   : > { %s7683_s26 = scalar_select %p6462_p10, 1, 0 }
  0x2d   : > { %p5501_p11 = pneg %p6462_p10  ;;  %s634_s0 = sshll.u32 %s6269_s5, 4  ;;  %s6476_s0 = int_to_ptr.vmem [resolvable:$true] %s634_s0 }
  0x2e   : > { %s6270_s24 = smov [#allocation12]   ;;  %s7685_s3 = sld [smem:[#allocation38_spill]] }
  0x2f   : > { %p6472_p12 = pnand %p7638_p9, %p5501_p11  ;;  %s6478_s29 = sshll.u32 %s6270_s24, 4  ;;  %s659_s29 = int_to_ptr.vmem [resolvable:$true] %s6478_s29 }
  0x31   : > { %p6488_p0 = pneg %p6472_p12 }
  0x34   : > { %s7686_s21 = smov %s7685_s3  ;;  %s5932_s30 = scalar_lea.hbm %s7685_s3, 1536 }
  0x35   : > { %p5933_p13 = scmp.ne.s32.totalorder %s7686_s21, %s5932_s30  ;;  %p5939_p3 = scmp.lt.u32.totalorder %s5932_s30, %s7686_s21 }
  0x37   : > { %p5935_p1 = pnand %p6488_p0, %p5933_p13 }
  0x39   : > { %p5936_p2 = pneg %p5935_p1 }
  0x3b   : > { %p5941_p4 = pnand %p5939_p3, %p5936_p2 }
  0x3d   : > { %5944 = shalt.err (!%p5941_p4)
}
  0x3e   : > { %s5945_s22 = scalar_lea.vmem %s6468_s27, 1536  ;;  %p5953_p9 = scmp.lt.s32.totalorder %s6468_s27, %s6468_s27 }
  0x3f   : > { %p5946_p7 = scmp.ne.s32.totalorder %s6468_s27, %s5945_s22  ;;  %p5954_p6 = scmp.lt.s32.totalorder %s5945_s22, %s5945_s22 }
  0x41   : > { %p5948_p8 = pnand %p5946_p7, %p6488_p0  ;;  %p5955_p13 = por %p5954_p6, %p5953_p9 }
  0x43   : > { %p5949_p11 = pneg %p5948_p8 }
  0x45   : > { %p5956_p1 = pnand %p5955_p13, %p5949_p11 }
  0x47   : > { %5959 = shalt.err (!%p5956_p1)
}
  0x48   : > { %s7645_s3 = smov 128   ;;  %s7647_s30 = smov 8  }
  0x49   : > { %5507 = dma.hbm_to_vmem [thread:$0]  (!%p6472_p12), %s7686_s21, 1536, %s6468_s27, [#allocation7], %s7645_s3, %s7645_s3, %s7647_s30  }
  0x4a   : > { %s7688_s11 = sld [smem:[#allocation43_spill]] }
  0x50   : > { %s5960_s24 = scalar_lea.hbm %s7688_s11, 16 }
  0x51   : > { %p5961_p6 = scmp.ne.s32.totalorder %s7688_s11, %s5960_s24  ;;  %p5967_p3 = scmp.lt.u32.totalorder %s5960_s24, %s7688_s11 }
  0x53   : > { %p5963_p9 = pnand %p5961_p6, %p6488_p0 }
  0x55   : > { %p5964_p2 = pneg %p5963_p9 }
  0x57   : > { %p5969_p4 = pnand %p5967_p3, %p5964_p2 }
  0x59   : > { %5972 = shalt.err (!%p5969_p4)
}
  0x5a   : > { %s5973_s27 = scalar_lea.vmem %s6476_s0, 16  ;;  %s5980_s20 = scalar_lea.vmem %s6476_s0, 32 }
  0x5b   : > { %p5974_p7 = scmp.ne.s32.totalorder %s6476_s0, %s5973_s27  ;;  %p5981_p13 = scmp.lt.s32.totalorder %s6476_s0, %s6476_s0 }
  0x5c   : > { %p5982_p1 = scmp.lt.s32.totalorder %s5980_s20, %s5973_s27 }
  0x5d   : > { %p5976_p8 = pnand %p5974_p7, %p6488_p0 }
  0x5e   : > { %p5983_p6 = por %p5982_p1, %p5981_p13 }
  0x5f   : > { %p5977_p11 = pneg %p5976_p8 }
  0x61   : > { %p5984_p9 = pnand %p5983_p6, %p5977_p11 }
  0x63   : > { %5987 = shalt.err (!%p5984_p9)
}
  0x64   : > { %5513 = dma.hbm_to_vmem [thread:$0]  (!%p6472_p12), %s7688_s11, 16, %s6476_s0, [#allocation10]  }
  0x65   : > { %s5988_s2 = scalar_lea.hbm %s7614_s14, 8192 }
  0x66   : > { %p5989_p2 = scmp.ne.s32.totalorder %s7614_s14, %s5988_s2  ;;  %p5995_p7 = scmp.lt.u32.totalorder %s5988_s2, %s7614_s14 }
  0x68   : > { %p5991_p3 = pnand %p5989_p2, %p6488_p0 }
  0x6a   : > { %p5992_p4 = pneg %p5991_p3 }
  0x6c   : > { %p5997_p8 = pnand %p5995_p7, %p5992_p4 }
  0x6e   : > { %6000 = shalt.err (!%p5997_p8)
}
  0x6f   : > { %s6001_s20 = scalar_lea.vmem %s659_s29, 8192  ;;  %p6009_p6 = scmp.lt.s32.totalorder %s659_s29, %s659_s29 }
  0x70   : > { %p6002_p11 = scmp.ne.s32.totalorder %s659_s29, %s6001_s20  ;;  %p6010_p9 = scmp.lt.s32.totalorder %s6001_s20, %s6001_s20 }
  0x72   : > { %p6004_p13 = pnand %p6002_p11, %p6488_p0  ;;  %p6011_p5 = por %p6010_p9, %p6009_p6 }
  0x74   : > { %p6005_p1 = pneg %p6004_p13 }
  0x76   : > { %p6012_p10 = pnand %p6011_p5, %p6005_p1 }
  0x78   : > { %6015 = shalt.err (!%p6012_p10)
}
  0x79   : > { %s6273_s0 = smov 512   ;;  %s6274_s17 = smov 32  }
  0x7a   : > { %5519 = dma.hbm_to_vmem [thread:$0]  (!%p6472_p12), %s7614_s14, 8192, %s659_s29, [#allocation13], %s6273_s0, %s6273_s0, %s6274_s17  }
  0x7b   : > { %s6275_s25 = smov [#allocation3]   ;;  %s6276_s5 = smov [#allocation8]  }
  0x7c   : > { %s584_s2 = sshll.u32 %s6275_s25, 4  ;;  %s620_s24 = sshll.u32 %s6276_s5, 4  ;;  %s585_s2 = int_to_ptr.vmem [resolvable:$true] %s584_s2  ;;  %s621_s24 = int_to_ptr.vmem [resolvable:$true] %s620_s24 }
  0x7d   : > { %s7689_s20 = sld [smem:[#allocation36_spill]] }
  0x83   : > { %s6016_s3 = scalar_lea.hbm %s7689_s20, 1536 }
  0x84   : > { %p6017_p5 = scmp.ne.s32.totalorder %s7689_s20, %s6016_s3  ;;  %p6023_p3 = scmp.lt.u32.totalorder %s6016_s3, %s7689_s20 }
  0x86   : > { %p6019_p10 = pnand %p6017_p5, %p6488_p0 }
  0x88   : > { %p6020_p2 = pneg %p6019_p10 }
  0x8a   : > { %p6025_p4 = pnand %p6023_p3, %p6020_p2 }
  0x8c   : > { %6028 = shalt.err (!%p6025_p4)
}
  0x8d   : > { %s6029_s29 = scalar_lea.vmem %s585_s2, 1536  ;;  %p6037_p13 = scmp.lt.s32.totalorder %s585_s2, %s585_s2 }
  0x8e   : > { %p6030_p7 = scmp.ne.s32.totalorder %s585_s2, %s6029_s29  ;;  %p6038_p1 = scmp.lt.s32.totalorder %s6029_s29, %s6029_s29 }
  0x90   : > { %p6032_p8 = pnand %p6030_p7, %p6488_p0  ;;  %p6039_p6 = por %p6038_p1, %p6037_p13 }
  0x92   : > { %p6033_p11 = pneg %p6032_p8 }
  0x94   : > { %p6040_p9 = pnand %p6039_p6, %p6033_p11 }
  0x96   : > { %6043 = shalt.err (!%p6040_p9)
}
  0x97   : > { %s7690_s11 = smov 8   ;;  %s7691_s30 = smov 128  }
  0x98   : > { %5504 = dma.hbm_to_vmem [thread:$0]  (!%p6472_p12), %s7689_s20, 1536, %s585_s2, [#allocation4], %s7691_s30, %s7691_s30, %s7690_s11  }
  0x99   : > { %s7692_s9 = sld [smem:[#allocation41_spill]] }
  0x9f   : > { %s6044_s17 = scalar_lea.hbm %s7692_s9, 16 }
  0xa0   : > { %p6045_p5 = scmp.ne.s32.totalorder %s7692_s9, %s6044_s17  ;;  %p6051_p3 = scmp.lt.u32.totalorder %s6044_s17, %s7692_s9 }
  0xa2   : > { %p6047_p10 = pnand %p6045_p5, %p6488_p0 }
  0xa4   : > { %p6048_p2 = pneg %p6047_p10 }
  0xa6   : > { %p6053_p4 = pnand %p6051_p3, %p6048_p2 }
  0xa8   : > { %6056 = shalt.err (!%p6053_p4)
}
  0xa9   : > { %s6057_s22 = scalar_lea.vmem %s621_s24, 16  ;;  %s6064_s2 = scalar_lea.vmem %s621_s24, 32 }
  0xaa   : > { %p6058_p7 = scmp.ne.s32.totalorder %s621_s24, %s6057_s22  ;;  %p6065_p13 = scmp.lt.s32.totalorder %s621_s24, %s621_s24 }
  0xab   : > { %p6066_p1 = scmp.lt.s32.totalorder %s6064_s2, %s6057_s22 }
  0xac   : > { %p6060_p8 = pnand %p6058_p7, %p6488_p0 }
  0xad   : > { %p6067_p6 = por %p6066_p1, %p6065_p13 }
  0xae   : > { %p6061_p11 = pneg %p6060_p8 }
  0xb0   : > { %p6068_p9 = pnand %p6067_p6, %p6061_p11 }
  0xb2   : > { %6071 = shalt.err (!%p6068_p9)
}
  0xb3   : > { %5510 = dma.hbm_to_vmem [thread:$0]  (!%p6472_p12), %s7692_s9, 16, %s621_s24, [#allocation7]  }
  0xb4   : > { %s6277_s15 = smov [#allocation11]   ;;  %s6278_s3 = smov [#allocation14]  }
  0xb5   : > { %s648_s21 = sshll.u32 %s6277_s15, 4  ;;  %s674_s0 = sshll.u32 %s6278_s3, 4  ;;  %s649_s21 = int_to_ptr.vmem [resolvable:$true] %s648_s21  ;;  %s675_s0 = int_to_ptr.vmem [resolvable:$true] %s674_s0 }
  0xb6   : > { %s6072_s23 = scalar_lea.hbm %s7613_s13, 16 }
  0xb7   : > { %p6073_p5 = scmp.ne.s32.totalorder %s7613_s13, %s6072_s23  ;;  %p6079_p3 = scmp.lt.u32.totalorder %s6072_s23, %s7613_s13 }
  0xb9   : > { %p6075_p10 = pnand %p6073_p5, %p6488_p0 }
  0xbb   : > { %p6076_p2 = pneg %p6075_p10 }
  0xbd   : > { %p6081_p4 = pnand %p6079_p3, %p6076_p2 }
  0xbf   : > { %6084 = shalt.err (!%p6081_p4)
}
  0xc0   : > { %s6085_s24 = scalar_lea.vmem %s649_s21, 16  ;;  %s6092_s27 = scalar_lea.vmem %s649_s21, 32 }
  0xc1   : > { %p6086_p7 = scmp.ne.s32.totalorder %s649_s21, %s6085_s24  ;;  %p6093_p13 = scmp.lt.s32.totalorder %s649_s21, %s649_s21 }
  0xc2   : > { %p6094_p1 = scmp.lt.s32.totalorder %s6092_s27, %s6085_s24 }
  0xc3   : > { %p6088_p8 = pnand %p6086_p7, %p6488_p0 }
  0xc4   : > { %p6095_p6 = por %p6094_p1, %p6093_p13 }
  0xc5   : > { %p6089_p11 = pneg %p6088_p8 }
  0xc7   : > { %p6096_p9 = pnand %p6095_p6, %p6089_p11 }
  0xc9   : > { %6099 = shalt.err (!%p6096_p9)
}
  0xca   : > { %5516 = dma.hbm_to_vmem [thread:$0]  (!%p6472_p12), %s7613_s13, 16, %s649_s21, [#allocation10]  }
  0xcb   : > { %s6100_s6 = scalar_lea.hbm %s7616_s16, 768 }
  0xcc   : > { %p6101_p5 = scmp.ne.s32.totalorder %s7616_s16, %s6100_s6  ;;  %p6107_p3 = scmp.lt.u32.totalorder %s6100_s6, %s7616_s16 }
  0xce   : > { %p6103_p10 = pnand %p6101_p5, %p6488_p0 }
  0xd0   : > { %p6104_p2 = pneg %p6103_p10 }
  0xd2   : > { %p6109_p4 = pnand %p6107_p3, %p6104_p2 }
  0xd4   : > { %6112 = shalt.err (!%p6109_p4)
}
  0xd5   : > { %s6113_s2 = scalar_lea.vmem %s675_s0, 768  ;;  %p6121_p13 = scmp.lt.s32.totalorder %s675_s0, %s675_s0 }
  0xd6   : > { %p6114_p7 = scmp.ne.s32.totalorder %s675_s0, %s6113_s2  ;;  %p6122_p1 = scmp.lt.s32.totalorder %s6113_s2, %s6113_s2 }
  0xd8   : > { %p6116_p8 = pnand %p6114_p7, %p6488_p0  ;;  %p6123_p6 = por %p6122_p1, %p6121_p13 }
  0xda   : > { %p6117_p11 = pneg %p6116_p8 }
  0xdc   : > { %p6124_p9 = pnand %p6123_p6, %p6117_p11 }
  0xde   : > { %6127 = shalt.err (!%p6124_p9)
}
  0xdf   : > { %5522 = dma.hbm_to_vmem [thread:$0]  (!%p6472_p12), %s7616_s16, 768, %s675_s0, [#allocation13], %s7691_s30, %s7691_s30, %s7690_s11  }
  0xe0   : > { %p7693_p5 = scmp.ne.s32.totalorder %s7683_s26, 0 }
  0xe1   : > { %p7694_p0 = scmp.eq.s32.totalorder (!%p7693_p5), %s6432_s4, 0 }
  0xe2   : > { %707 = sbr.rel (%p7693_p5) target bundleno = 2714 (0xa9a), region = 92 }
  0xe9   : > { %6229 = dma.done.wait (%p7694_p0), [#allocation4], 1536   ;;  %p7695_p10 = pmov %p7694_p0 }
  0xea   : > { %p7696_p2 = pmov %p7694_p0 }
  0xeb   : > { %6231 = vsyncadd (%p7695_p10), [#allocation4], 4294965760 }
  0xec   : > { %6233 = dma.done.wait (%p7696_p2), [#allocation7], 1552   ;;  %p7697_p3 = pmov %p7694_p0 }
  0xed   : > { %p7698_p4 = pmov %p7694_p0 }
  0xee   : > { %6235 = vsyncadd (%p7697_p3), [#allocation7], 4294965744 }
  0xef   : > { %6237 = dma.done.wait (%p7698_p4), [#allocation10], 32   ;;  %p7699_p12 = pmov %p7694_p0 }
  0xf0   : > { %p7700_p7 = pmov %p7694_p0 }
  0xf1   : > { %6239 = vsyncadd (%p7699_p12), [#allocation10], 4294967264 }
  0xf2   : > { %6241 = dma.done.wait (%p7700_p7), [#allocation13], 8960   ;;  %p7701_p8 = pmov %p7694_p0 }
  0xf3   : > { %p811_p11 = scmp.lt.s32.totalorder %s6432_s4, 1  ;;  %vm827_vm0 = vcmask 64512   ;;  %v6279_v0 = vmov 0.0   ;;  %s7702_s30 = sld [smem:[#allocation32_spill]]  ;;  %vm878_vm1 = vcmask 1047616   ;;  %vm884_vm2 = vcmask 1043520  }
  0xf4   : > { %6243 = vsyncadd (%p7701_p8), [#allocation13], 4294958336  ;;  %828 = vst.msk [vmem:[#allocation2] sm:$0xff] %vm827_vm0, %v6279_v0  ;;  %1028 = vmatprep.mubr.f32.mxu0 %v6279_v0  ;;  %1117 = vmatprep.mubr.f32.mxu1 %v6279_v0  ;;  %s6280_s27 = smov 8   ;;  %s6281_s29 = smov 121   ;;  %vm888_vm3 = vcmask 191488  }
  0xf5   : > { %829 = vst.msk [vmem:[#allocation2 + $0x20] sm:$0xff] %vm827_vm0, %v6279_v0  ;;  %830 = vst.msk [vmem:[#allocation2 + $0x40] sm:$0xff] %vm827_vm0, %v6279_v0  ;;  %s6663_s18 = scalar_select %p811_p11, %s6432_s4, 1  ;;  %vm882_vm4 = vcmask 195584   ;;  %v6284_v35 = vmov 0   ;;  %vm931_vm5 = vcmask 990208  }
  0xf6   : > { %831 = vst.msk [vmem:[#allocation2 + $0x60] sm:$0xff] %vm827_vm0, %v6279_v0  ;;  %s6282_s15 = smov 122   ;;  %s6283_s3 = smov 120   ;;  %5665 = vset.pattern.permute.xlu0 %v6284_v35  ;;  %5666 = vset.pattern.permute.xlu1 %v6284_v35  ;;  %vm955_vm6 = vcmask 1043456   ;;  %vm6285_vm7 = vmmov 1   ;;  %vm942_vm9 = vcmask 97280  }
  0xf7   : > { %s7651_s26 = sshll.u32 %s6663_s18, 6  ;;  %s7703_s23 = sld [smem:[#allocation35_spill]]  ;;  %vm6725_vm8 = vmpackc.low %vm955_vm6, %vm6285_vm7  ;;  %vm1158_vm10 = vcmask 998400   ;;  %vm1388_vm11 = vcmask 982016  }
  0xf8   : > { %s6286_s5 = smov 124   ;;  %s7708_s21 = sld [smem:[#allocation37_spill]] }
  0xf9   : > { %s6671_s0 = scalar_lea.vmem %s7702_s30, %s7651_s26  ;;  %s7706_s30 = sld [smem:[#allocation34_spill]] }
  0xfa   : > { %v834_v1 = vld [vmem:[%s6671_s0 + $0x10] sm:$0xff]  ;;  %v832_v2 = vld [vmem:[%s6671_s0] sm:$0xff]  ;;  %v833_v4 = vld [vmem:[%s6671_s0 + $0x8] sm:$0xff]  ;;  %s7709_s7 = sld [smem:[#allocation39_spill]]  ;;  %s7710_s8 = sld [smem:[#allocation40_spill]] }
  0xfb   : > { %852 = vrot.lane.b32.xlu1 %v834_v1, %s6280_s27  ;;  %848 = vrot.lane.b32.xlu0 %v832_v2, %s6280_s27  ;;  %v836_v3 = vld [vmem:[%s6671_s0 + $0x20] sm:$0xf]  ;;  %v838_v5 = vld [vmem:[%s6671_s0 + $0x30] sm:$0xf]  ;;  %s7711_s10 = sld [smem:[#allocation42_spill]]  ;;  %s7280_s22 = sand.u32 1, %s6258_s28  }
  0xfc   : > { %v837_v6 = vld [vmem:[%s6671_s0 + $0x28] sm:$0xf]  ;;  %v839_v7 = vld [vmem:[%s6671_s0 + $0x38] sm:$0xf]  ;;  %s821_s1 = scalar_lea.vmem %s7619_s19, %s6663_s18  ;;  %s7652_s11 = scalar_lea.vmem [#allocation16], %s7280_s22 }
  0xfd   : > { %v835_v8 = vld [vmem:[%s6671_s0 + $0x18] sm:$0xff]  ;;  %v1613_v33 = vld [vmem:[%s7703_s23] sm:$0xff]  ;;  %v1614_v34 = vld [vmem:[%s7703_s23 + $0x8] sm:$0xff]  ;;  %s7712_s6 = sld [smem:[#allocation33_spill]]  ;;  %s6288_s2 = smov 126  }
  0xfe   : > { %v1616_v36 = vld [vmem:[%s7703_s23 + $0x18] sm:$0xff]  ;;  %v1615_v37 = vld [vmem:[%s7703_s23 + $0x10] sm:$0xff]  ;;  %s6289_s24 = smov 127  }
  0xff   : > { %856 = vrot.lane.b32.xlu1 %v836_v3, %s6280_s27  ;;  %850 = vrot.lane.b32.xlu0 %v833_v4, %s6280_s27  ;;  %s7707_s17 = smov %s7706_s30  ;;  %v5064_v63 = vld [vmem:[%s7706_s30 + $0x20] sm:$0xff]  ;;  %s6291_s30 = smov 123  }
 0x100   : > { %v901_v50 = vld [vmem:[%s7707_s17 + $0x18] sm:$0xff] }
 0x103   : > { %860 = vrot.lane.b32.xlu1 %v838_v5, %s6280_s27  ;;  %858 = vrot.lane.b32.xlu0 %v837_v6, %s6280_s27  ;;  %s818_s25 = scalar_lea.vmem %s7712_s6, %s6663_s18 }
 0x107   : > { %862 = vrot.lane.b32.xlu1 %v839_v7, %s6280_s27  ;;  %854 = vrot.lane.b32.xlu0 %v835_v8, %s6280_s27 }
 0x16d   : > { %v853_v9 = vpop.permute.xlu1 %852  ;;  %v849_v10 = vpop.permute.xlu0 %848 }
 0x16e   : > { %879 = vst.msk [vmem:[#allocation2] sm:$0xff] %vm878_vm1, %v849_v10 }
 0x171   : > { %v857_v11 = vpop.permute.xlu1 %856  ;;  %v851_v12 = vpop.permute.xlu0 %850 }
 0x172   : > { %885 = vst.msk [vmem:[#allocation2 + $0x20] sm:$0xf] %vm884_vm2, %v857_v11  ;;  %v864_v13 = vsel %vm827_vm0, %v849_v10, %v851_v12  ;;  %v865_v14 = vsel %vm827_vm0, %v851_v12, %v853_v9 }
 0x173   : > { %v5605_v15 = vpack.i.bf16 %v865_v14, %v864_v13  ;;  %v5065_v13 = vld [vmem:[%s7707_s17 + $0x28] sm:$0xff] }
 0x175   : > { %v861_v16 = vpop.permute.xlu1 %860  ;;  %v859_v17 = vpop.permute.xlu0 %858  ;;  %5606 = vrot.lane.b32.xlu0 %v5605_v15, %s6281_s29  ;;  %v890_v22 = vld [vmem:[#allocation2] sm:$0xff] }
 0x176   : > { %v867_v18 = vsel %vm827_vm0, %v857_v11, %v859_v17  ;;  %v868_v19 = vsel %vm827_vm0, %v859_v17, %v861_v16 }
 0x177   : > { %886 = vst [vmem:[#allocation2 + $0x28] sm:$0xf] %v867_v18  ;;  %887 = vst [vmem:[#allocation2 + $0x30] sm:$0xf] %v868_v19 }
 0x179   : > { %v863_v20 = vpop.permute.xlu1 %862  ;;  %v855_v21 = vpop.permute.xlu0 %854  ;;  %v894_v23 = vld [vmem:[#allocation2 + $0x20] sm:$0xf] }
 0x17a   : > { %v869_v24 = vsel %vm827_vm0, %v861_v16, %v863_v20  ;;  %v866_v25 = vsel %vm827_vm0, %v853_v9, %v855_v21  ;;  %v5610_v26 = vpack.i.bf16 %v894_v23, %v890_v22 }
 0x17b   : > { %889 = vst.msk [vmem:[#allocation2 + $0x38] sm:$0xf] %vm888_vm3, %v869_v24  ;;  %v5066_v24 = vld [vmem:[%s7707_s17 + $0x30] sm:$0xff] }
 0x17c   : > { %883 = vst.msk [vmem:[#allocation2 + $0x18] sm:$0xff] %vm882_vm4, %v866_v25  ;;  %5611 = vrot.lane.b32.xlu0 %v5610_v26, %s6281_s29 }
 0x17e   : > { %v895_v27 = vld [vmem:[#allocation2 + $0x28] sm:$0xf]  ;;  %v896_v28 = vld [vmem:[#allocation2 + $0x30] sm:$0xf] }
 0x17f   : > { %v5615_v29 = vpack.i.bf16 %v896_v28, %v895_v27 }
 0x180   : > { %5626 = vrot.lane.b32.xlu0 %v5605_v15, %s6282_s15 }
 0x181   : > { %5616 = vrot.lane.b32.xlu1 %v5615_v29, %s6281_s29 }
 0x182   : > { %v897_v31 = vld [vmem:[#allocation2 + $0x38] sm:$0xf] }
 0x183   : > { %v893_v30 = vld [vmem:[#allocation2 + $0x18] sm:$0xff] }
 0x184   : > { %v5620_v32 = vpack.i.bf16 %v897_v31, %v893_v30  ;;  %5631 = vrot.lane.b32.xlu0 %v5610_v26, %s6282_s15 }
 0x186   : > { %5621 = vrot.lane.b32.xlu1 %v5620_v32, %s6281_s29 }
 0x188   : > { %5646 = vrot.lane.b32.xlu0 %v5605_v15, %s6283_s3 }
 0x18a   : > { %5636 = vrot.lane.b32.xlu1 %v5615_v29, %s6282_s15 }
 0x18c   : > { %5651 = vrot.lane.b32.xlu0 %v5610_v26, %s6283_s3 }
 0x18e   : > { %5641 = vrot.lane.b32.xlu1 %v5620_v32, %s6282_s15 }
 0x190   : > { %1619 = vperm.xlu0 %5665, %v1613_v33  }
 0x192   : > { %5656 = vrot.lane.b32.xlu1 %v5615_v29, %s6283_s3 }
 0x194   : > { %1634 = vperm.xlu0 %5665, %v1616_v36  }
 0x196   : > { %5661 = vrot.lane.b32.xlu1 %v5620_v32, %s6283_s3  ;;  %v5067_v32 = vld [vmem:[%s7707_s17 + $0x38] sm:$0xff] }
 0x19a   : > { %1624 = vperm.xlu1 %5666, %v1614_v34  }
 0x19e   : > { %1629 = vperm.xlu1 %5666, %v1615_v37  }
 0x1e7   : > { %v5607_v38 = vpop.permute.xlu0 %5606 }
 0x1e8   : > { %v5609_v40 = vunpack.i.h.bf16 %v5607_v38  ;;  %v5608_v41 = vunpack.i.l.bf16 %v5607_v38 }
 0x1ea   : > { %v933_v48 = vsel %vm931_vm5, %v5608_v41, %v5609_v40 }
 0x1ee   : > { %v5612_v39 = vpop.permute.xlu0 %5611 }
 0x1ef   : > { %v5613_v42 = vunpack.i.l.bf16 %v5612_v39  ;;  %v5614_v47 = vunpack.i.h.bf16 %v5612_v39 }
 0x1f1   : > { %v932_v51 = vsel %vm931_vm5, %v5613_v42, %v5608_v41  ;;  %v898_v42 = vld [vmem:[%s7707_s17] sm:$0xff] }
 0x1f2   : > { %v5627_v43 = vpop.permute.xlu0 %5626 }
 0x1f3   : > { %v5617_v44 = vpop.permute.xlu1 %5616  ;;  %v5629_v59 = vunpack.i.h.bf16 %v5627_v43  ;;  %v5628_v60 = vunpack.i.l.bf16 %v5627_v43 }
 0x1f4   : > { %v5619_v45 = vunpack.i.h.bf16 %v5617_v44  ;;  %v5618_v46 = vunpack.i.l.bf16 %v5617_v44 }
 0x1f5   : > { %v1160_v8 = vsel %vm1158_vm10, %v5628_v60, %v5629_v59 }
 0x1f6   : > { %v936_v49 = vsel %vm931_vm5, %v5618_v46, %v5619_v45  ;;  %v935_v52 = vsel %vm931_vm5, %v5614_v47, %v5618_v46  ;;  %v5632_v56 = vpop.permute.xlu0 %5631  ;;  %v899_v47 = vld [vmem:[%s7707_s17 + $0x8] sm:$0xff] }
 0x1f7   : > { %v5183_v54 = vpack.c.bf16 %v936_v49, %v933_v48  ;;  %v5186_v55 = vpack.c.bf16 %v935_v52, %v932_v51  ;;  %v5633_v61 = vunpack.i.l.bf16 %v5632_v56  ;;  %v5634_v7 = vunpack.i.h.bf16 %v5632_v56  ;;  %v900_v49 = vld [vmem:[%s7707_s17 + $0x10] sm:$0xff]  ;;  %v5092_v51 = vld [vmem:[%s7707_s17 + $0x40] sm:$0xff]  ;;  %v5093_v52 = vld [vmem:[%s7707_s17 + $0x48] sm:$0xff] }
 0x1f8   : > { %v5622_v53 = vpop.permute.xlu1 %5621 }
 0x1f9   : > { %v5624_v57 = vunpack.i.h.bf16 %v5622_v53  ;;  %v5623_v58 = vunpack.i.l.bf16 %v5622_v53  ;;  %5185 = vmatprep.subr.msk.bf16.mxu0 %vm6725_vm8, %v5183_v54  ;;  %v1159_v11 = vsel %vm1158_vm10, %v5633_v61, %v5628_v60  ;;  %v5094_v53 = vld [vmem:[%s7707_s17 + $0x50] sm:$0xff]  ;;  %v5095_v54 = vld [vmem:[%s7707_s17 + $0x58] sm:$0xff] }
 0x1fa   : > { %5188 = vmatpush1.bf16.msk.msra.mxu0 %vm6725_vm8, %v5186_v55  ;;  %v5647_v12 = vpop.permute.xlu0 %5646 }
 0x1fb   : > { %v5189_v62 = vpack.c.bf16 %v5624_v57, %v5623_v58  ;;  %v934_v1 = vsel %vm931_vm5, %v5609_v40, %v5623_v58  ;;  %v937_v2 = vsel %vm931_vm5, %v5619_v45, %v5624_v57  ;;  %v5649_v19 = vunpack.i.h.bf16 %v5647_v12 }
 0x1fc   : > { %v5637_v3 = vpop.permute.xlu1 %5636  ;;  %v5192_v4 = vpack.c.bf16 %v937_v2, %v934_v1  ;;  %v5648_v23 = vunpack.i.l.bf16 %v5647_v12 }
 0x1fd   : > { %v5639_v5 = vunpack.i.h.bf16 %v5637_v3  ;;  %v5638_v6 = vunpack.i.l.bf16 %v5637_v3  ;;  %5191 = vmatprep.subr.msk.bf16.mxu1 %vm6725_vm8, %v5189_v62  ;;  %5070 = vmatmul.mubr.msk.f32.vlgmr.msra.gmra.mrb[0].mxu0 %vm942_vm9, %v5064_v63 }
 0x1fe   : > { %5194 = vmatpush1.bf16.msk.msra.mxu1 %vm6725_vm8, %v5192_v4  ;;  %1034 = vmatprep.mubr.f32.mxu0 %v6279_v0  ;;  %v5652_v29 = vpop.permute.xlu0 %5651  ;;  %v1390_v30 = vsel %vm1388_vm11, %v5648_v23, %v5649_v19 }
 0x1ff   : > { %v1163_v9 = vsel %vm1158_vm10, %v5638_v6, %v5639_v5  ;;  %v1162_v10 = vsel %vm1158_vm10, %v5634_v7, %v5638_v6  ;;  %v5654_v33 = vunpack.i.h.bf16 %v5652_v29  ;;  %v5653_v34 = vunpack.i.l.bf16 %v5652_v29 }
 0x200   : > { %v5198_v14 = vpack.c.bf16 %v1162_v10, %v1159_v11  ;;  %v5642_v15 = vpop.permute.xlu1 %5641  ;;  %v5195_v16 = vpack.c.bf16 %v1163_v9, %v1160_v8 }
 0x201   : > { %v5644_v17 = vunpack.i.h.bf16 %v5642_v15  ;;  %v5643_v18 = vunpack.i.l.bf16 %v5642_v15  ;;  %5076 = vmatmul.mubr.msk.f32.vlgmr.msra.gmra.mrb[0].mxu1 %vm942_vm9, %v5064_v63  ;;  %5071 = vmatmul.mubr.msk.f32.gmra.mrb[2].mxu0 %vm942_vm9, %v5065_v13  ;;  %v1389_v43 = vsel %vm1388_vm11, %v5653_v34, %v5648_v23 }
 0x202   : > { %5197 = vmatprep.subr.msk.bf16.mxu0 %vm6725_vm8, %v5195_v16  ;;  %1123 = vmatprep.mubr.f32.mxu1 %v6279_v0 }
 0x203   : > { %v1161_v20 = vsel %vm1158_vm10, %v5629_v59, %v5643_v18  ;;  %v1164_v21 = vsel %vm1158_vm10, %v5639_v5, %v5644_v17  ;;  %v5201_v22 = vpack.c.bf16 %v5644_v17, %v5643_v18  ;;  %5200 = vmatpush1.bf16.msk.msra.mxu0 %vm6725_vm8, %v5198_v14  ;;  %1040 = vmatprep.mubr.f32.mxu0 %v6279_v0 }
 0x204   : > { %v5204_v25 = vpack.c.bf16 %v1164_v21, %v1161_v20  ;;  %v5657_v26 = vpop.permute.xlu1 %5656 }
 0x205   : > { %v5659_v27 = vunpack.i.h.bf16 %v5657_v26  ;;  %v5658_v28 = vunpack.i.l.bf16 %v5657_v26  ;;  %5077 = vmatmul.mubr.msk.f32.gmra.mrb[2].mxu1 %vm942_vm9, %v5065_v13  ;;  %5203 = vmatprep.subr.msk.bf16.mxu1 %vm6725_vm8, %v5201_v22 }
 0x206   : > { %5072 = vmatmul.mubr.msk.f32.gmra.mrb[4].mxu0 %vm942_vm9, %v5066_v24  ;;  %5206 = vmatpush1.bf16.msk.msra.mxu1 %vm6725_vm8, %v5204_v25 }
 0x207   : > { %v1393_v31 = vsel %vm1388_vm11, %v5658_v28, %v5659_v27  ;;  %1129 = vmatprep.mubr.f32.mxu1 %v6279_v0  ;;  %1046 = vmatprep.mubr.f32.mxu0 %v6279_v0  ;;  %v1392_v40 = vsel %vm1388_vm11, %v5654_v33, %v5658_v28 }
 0x208   : > { %v5662_v36 = vpop.permute.xlu1 %5661  ;;  %v5207_v37 = vpack.c.bf16 %v1393_v31, %v1390_v30  ;;  %v5210_v44 = vpack.c.bf16 %v1392_v40, %v1389_v43 }
 0x209   : > { %v5664_v38 = vunpack.i.h.bf16 %v5662_v36  ;;  %v5663_v39 = vunpack.i.l.bf16 %v5662_v36  ;;  %5078 = vmatmul.mubr.msk.f32.gmra.mrb[4].mxu1 %vm942_vm9, %v5066_v24 }
 0x20a   : > { %5073 = vmatmul.mubr.msk.f32.gmra.mrb[6].mxu0 %vm942_vm9, %v5067_v32  ;;  %5209 = vmatprep.subr.msk.bf16.mxu0 %vm6725_vm8, %v5207_v37 }
 0x20b   : > { %v5213_v41 = vpack.c.bf16 %v5664_v38, %v5663_v39  ;;  %1135 = vmatprep.mubr.f32.mxu1 %v6279_v0  ;;  %1253 = vmatprep.mubr.f32.mxu0 %v6279_v0  ;;  %v1391_v45 = vsel %vm1388_vm11, %v5649_v19, %v5663_v39  ;;  %v1394_v46 = vsel %vm1388_vm11, %v5659_v27, %v5664_v38 }
 0x20c   : > { %v5216_v48 = vpack.c.bf16 %v1394_v46, %v1391_v45 }
 0x20d   : > { %5079 = vmatmul.mubr.msk.f32.gmra.mrb[6].mxu1 %vm942_vm9, %v5067_v32  ;;  %5215 = vmatprep.subr.msk.bf16.mxu1 %vm6725_vm8, %v5213_v41 }
 0x20e   : > { %5082 = vmatmul.mubr.msk.f32.vlgmr.msra.gmra.mrb[0].mxu0 %vm942_vm9, %v898_v42  ;;  %1342 = vmatprep.mubr.f32.mxu1 %v6279_v0 }
 0x20f   : > { %5212 = vmatpush1.bf16.msk.msra.mxu0 %vm6725_vm8, %v5210_v44  ;;  %1259 = vmatprep.mubr.f32.mxu0 %v6279_v0  ;;  %v1620_v55 = vpop.permute.xlu0 %1619 }
 0x211   : > { %5088 = vmatmul.mubr.msk.f32.vlgmr.msra.gmra.mrb[0].mxu1 %vm942_vm9, %v898_v42 }
 0x212   : > { %5218 = vmatpush1.bf16.msk.msra.mxu1 %vm6725_vm8, %v5216_v48  ;;  %5083 = vmatmul.mubr.msk.f32.gmra.mrb[2].mxu0 %vm942_vm9, %v899_v47 }
 0x213   : > { %1348 = vmatprep.mubr.f32.mxu1 %v6279_v0  ;;  %1265 = vmatprep.mubr.f32.mxu0 %v6279_v0  ;;  %v1635_v36 = vpop.permute.xlu0 %1634 }
 0x215   : > { %5089 = vmatmul.mubr.msk.f32.gmra.mrb[2].mxu1 %vm942_vm9, %v899_v47 }
 0x216   : > { %5084 = vmatmul.mubr.msk.f32.gmra.mrb[4].mxu0 %vm942_vm9, %v900_v49  ;;  %1354 = vmatprep.mubr.f32.mxu1 %v6279_v0 }
 0x217   : > { %1271 = vmatprep.mubr.f32.mxu0 %v6279_v0 }
 0x219   : > { %5090 = vmatmul.mubr.msk.f32.gmra.mrb[4].mxu1 %vm942_vm9, %v900_v49  ;;  %v1625_v60 = vpop.permute.xlu1 %1624 }
 0x21a   : > { %5085 = vmatmul.mubr.msk.f32.gmra.mrb[6].mxu0 %vm942_vm9, %v901_v50  ;;  %1360 = vmatprep.mubr.f32.mxu1 %v6279_v0 }
 0x21b   : > { %1483 = vmatprep.mubr.f32.mxu0 %v6279_v0 }
 0x21d   : > { %5091 = vmatmul.mubr.msk.f32.gmra.mrb[6].mxu1 %vm942_vm9, %v901_v50  ;;  %v1630_v27 = vpop.permute.xlu1 %1629 }
 0x21e   : > { %5098 = vmatmul.mubr.msk.f32.vlgmr.msra.gmra.mrb[0].mxu0 %vm942_vm9, %v5092_v51  ;;  %1572 = vmatprep.mubr.f32.mxu1 %v6279_v0 }
 0x21f   : > { %1489 = vmatprep.mubr.f32.mxu0 %v6279_v0 }
 0x221   : > { %5104 = vmatmul.mubr.msk.f32.vlgmr.msra.gmra.mrb[0].mxu1 %vm942_vm9, %v5092_v51 }
 0x222   : > { %5099 = vmatmul.mubr.msk.f32.gmra.mrb[2].mxu0 %vm942_vm9, %v5093_v52  ;;  %1578 = vmatprep.mubr.f32.mxu1 %v6279_v0 }
 0x223   : > { %1495 = vmatprep.mubr.f32.mxu0 %v6279_v0 }
 0x225   : > { %5105 = vmatmul.mubr.msk.f32.gmra.mrb[2].mxu1 %vm942_vm9, %v5093_v52 }
 0x226   : > { %5100 = vmatmul.mubr.msk.f32.gmra.mrb[4].mxu0 %vm942_vm9, %v5094_v53  ;;  %1584 = vmatprep.mubr.f32.mxu1 %v6279_v0 }
 0x227   : > { %1501 = vmatprep.mubr.f32.mxu0 %v6279_v0 }
 0x229   : > { %5106 = vmatmul.mubr.msk.f32.gmra.mrb[4].mxu1 %vm942_vm9, %v5094_v53 }
 0x22a   : > { %5101 = vmatmul.mubr.msk.f32.gmra.mrb[6].mxu0 %vm942_vm9, %v5095_v54  ;;  %1590 = vmatprep.mubr.f32.mxu1 %v6279_v0 }
 0x22b   : > { %1971 = vmatprep.mubr.f32.mxu0 %v6279_v0 }
 0x22d   : > { %5107 = vmatmul.mubr.msk.f32.gmra.mrb[6].mxu1 %vm942_vm9, %v5095_v54 }
 0x22e   : > { %2060 = vmatprep.mubr.f32.mxu1 %v6279_v0 }
 0x2f1   : > { %v1485_v56 = vpop.f32.mrb[0].mxu0 }
 0x2f2   : > { %v1487_v57 = vpop.f32.mrb[1].mxu0  ;;  %v1637_v59 = vadd.f32 %v1620_v55, %v1485_v56 }
 0x2f3   : > { %v1638_v58 = vadd.f32 %v1620_v55, %v1487_v57 }
 0x2f4   : > { %v1574_v61 = vpop.f32.mrb[0].mxu1  ;;  %v1669_v6 = vmul.f32 0.01, %v1637_v59  ;;  %vm1653_vm14 = vcmp.gt.f32.partialorder %v1637_v59, 0.0 }
 0x2f5   : > { %v1670_v62 = vmul.f32 0.01, %v1638_v58  ;;  %v1639_v63 = vadd.f32 %v1620_v55, %v1574_v61  ;;  %v1491_v1 = vpop.f32.mrb[2].mxu0  ;;  %v1576_v2 = vpop.f32.mrb[1].mxu1  ;;  %vm1654_vm12 = vcmp.gt.f32.partialorder %v1638_v58, 0.0 }
 0x2f6   : > { %v1493_v3 = vpop.f32.mrb[3].mxu0  ;;  %v1641_v7 = vadd.f32 %v1625_v60, %v1491_v1  ;;  %v1640_v8 = vadd.f32 %v1620_v55, %v1576_v2  ;;  %v1685_v20 = vsel %vm1653_vm14, %v1637_v59, %v1669_v6 }
 0x2f7   : > { %v1671_v4 = vmul.f32 0.01, %v1639_v63  ;;  %v1686_v5 = vsel %vm1654_vm12, %v1638_v58, %v1670_v62  ;;  %vm1655_vm13 = vcmp.gt.f32.partialorder %v1639_v63, 0.0  ;;  %v1642_v18 = vadd.f32 %v1625_v60, %v1493_v3 }
 0x2f8   : > { %v1580_v9 = vpop.f32.mrb[2].mxu1  ;;  %1719 = vrot.lane.b32.xlu0 %v1686_v5, %s6280_s27  ;;  %v1673_v16 = vmul.f32 0.01, %v1641_v7  ;;  %v1672_v17 = vmul.f32 0.01, %v1640_v8  ;;  %vm1656_vm2 = vcmp.gt.f32.partialorder %v1640_v8, 0.0 }
 0x2f9   : > { %v1643_v10 = vadd.f32 %v1625_v60, %v1580_v9  ;;  %v1497_v11 = vpop.f32.mrb[4].mxu0  ;;  %v1582_v12 = vpop.f32.mrb[3].mxu1  ;;  %v1687_v13 = vsel %vm1655_vm13, %v1639_v63, %v1671_v4  ;;  %vm1657_vm3 = vcmp.gt.f32.partialorder %v1641_v7, 0.0  ;;  %v1674_v26 = vmul.f32 0.01, %v1642_v18 }
 0x2fa   : > { %1721 = vrot.lane.b32.xlu1 %v1687_v13, %s6280_s27  ;;  %v1499_v14 = vpop.f32.mrb[5].mxu0  ;;  %v1644_v21 = vadd.f32 %v1625_v60, %v1582_v12  ;;  %v1688_v29 = vsel %vm1656_vm2, %v1640_v8, %v1672_v17  ;;  %v1689_v30 = vsel %vm1657_vm3, %v1641_v7, %v1673_v16  ;;  %vm1658_vm6 = vcmp.gt.f32.partialorder %v1642_v18, 0.0 }
 0x2fb   : > { %v1675_v15 = vmul.f32 0.01, %v1643_v10  ;;  %vm1659_vm15 = vcmp.gt.f32.partialorder %v1643_v10, 0.0  ;;  %v1646_v32 = vadd.f32 %v1630_v27, %v1499_v14  ;;  %v1645_v37 = vadd.f32 %v1630_v27, %v1497_v11 }
 0x2fc   : > { %v1586_v19 = vpop.f32.mrb[4].mxu1  ;;  %v1676_v31 = vmul.f32 0.01, %v1644_v21  ;;  %vm1660_vm7 = vcmp.gt.f32.partialorder %v1644_v21, 0.0  ;;  %v1690_v38 = vsel %vm1658_vm6, %v1642_v18, %v1674_v26  ;;  %vm1894_vm6 = vcmask 261120  }
 0x2fd   : > { %v1503_v22 = vpop.f32.mrb[6].mxu0  ;;  %v1588_v23 = vpop.f32.mrb[5].mxu1  ;;  %v1691_v24 = vsel %vm1659_vm15, %v1643_v10, %v1675_v15  ;;  %v1647_v33 = vadd.f32 %v1630_v27, %v1586_v19  ;;  %v1678_v39 = vmul.f32 0.01, %v1646_v32  ;;  %vm1662_vm9 = vcmp.gt.f32.partialorder %v1646_v32, 0.0 }
 0x2fe   : > { %1717 = vrot.lane.b32.xlu1 %v1685_v20, %s6280_s27  ;;  %1729 = vrot.lane.b32.xlu0 %v1691_v24, %s6280_s27  ;;  %v1505_v25 = vpop.f32.mrb[7].mxu0  ;;  %v1692_v42 = vsel %vm1660_vm7, %v1644_v21, %v1676_v31  ;;  %v1677_v43 = vmul.f32 0.01, %v1645_v37  ;;  %v1649_v44 = vadd.f32 %v1635_v36, %v1503_v22  ;;  %vm1661_vm12 = vcmp.gt.f32.partialorder %v1645_v37, 0.0 }
 0x2ff   : > { %v1679_v40 = vmul.f32 0.01, %v1647_v33  ;;  %vm1663_vm8 = vcmp.gt.f32.partialorder %v1647_v33, 0.0  ;;  %v1650_v45 = vadd.f32 %v1635_v36, %v1505_v25  ;;  %v1694_v48 = vsel %vm1662_vm9, %v1646_v32, %v1678_v39 }
 0x300   : > { %v1592_v28 = vpop.f32.mrb[6].mxu1  ;;  %v1681_v49 = vmul.f32 0.01, %v1649_v44  ;;  %v1648_v50 = vadd.f32 %v1630_v27, %v1588_v23  ;;  %v1693_v53 = vsel %vm1661_vm12, %v1645_v37, %v1677_v43  ;;  %vm1665_vm14 = vcmp.gt.f32.partialorder %v1649_v44, 0.0  ;;  %v2607_v43 = vld [vmem:[%s7708_s21] sm:$0xff] }
 0x301   : > { %v1594_v34 = vpop.f32.mrb[7].mxu1  ;;  %v1651_v41 = vadd.f32 %v1635_v36, %v1592_v28  ;;  %v1695_v47 = vsel %vm1663_vm8, %v1647_v33, %v1679_v40  ;;  %v1682_v51 = vmul.f32 0.01, %v1650_v45  ;;  %vm1666_vm15 = vcmp.gt.f32.partialorder %v1650_v45, 0.0 }
 0x302   : > { %1723 = vrot.lane.b32.xlu1 %v1688_v29, %s6280_s27  ;;  %1725 = vrot.lane.b32.xlu0 %v1689_v30, %s6280_s27  ;;  %v1652_v52 = vadd.f32 %v1635_v36, %v1594_v34  ;;  %v1680_v55 = vmul.f32 0.01, %v1648_v50  ;;  %v1697_v57 = vsel %vm1665_vm14, %v1649_v44, %v1681_v49  ;;  %vm1664_vm3 = vcmp.gt.f32.partialorder %v1648_v50, 0.0  ;;  %v2609_v44 = vld [vmem:[%s7708_s21 + $0x10] sm:$0xff] }
 0x303   : > { %v1683_v46 = vmul.f32 0.01, %v1651_v41  ;;  %vm1667_vm13 = vcmp.gt.f32.partialorder %v1651_v41, 0.0  ;;  %v1698_v58 = vsel %vm1666_vm15, %v1650_v45, %v1682_v51  ;;  %v2608_v45 = vld [vmem:[%s7708_s21 + $0x8] sm:$0xff]  ;;  %vm2117_vm7 = vcmask 1014784  }
 0x304   : > { %v1684_v56 = vmul.f32 0.01, %v1652_v52  ;;  %vm1668_vm2 = vcmp.gt.f32.partialorder %v1652_v52, 0.0  ;;  %v1696_v60 = vsel %vm1664_vm3, %v1648_v50, %v1680_v55 }
 0x305   : > { %v1699_v54 = vsel %vm1667_vm13, %v1651_v41, %v1683_v46  ;;  %v2610_v46 = vld [vmem:[%s7708_s21 + $0x18] sm:$0xff] }
 0x306   : > { %1731 = vrot.lane.b32.xlu0 %v1692_v42, %s6280_s27  ;;  %1727 = vrot.lane.b32.xlu1 %v1690_v38, %s6280_s27  ;;  %v1700_v59 = vsel %vm1668_vm2, %v1652_v52, %v1684_v56 }
 0x30a   : > { %1737 = vrot.lane.b32.xlu1 %v1695_v47, %s6280_s27  ;;  %1735 = vrot.lane.b32.xlu0 %v1694_v48, %s6280_s27 }
 0x30e   : > { %1733 = vrot.lane.b32.xlu1 %v1693_v53, %s6280_s27  ;;  %1745 = vrot.lane.b32.xlu0 %v1699_v54, %s6280_s27 }
 0x312   : > { %1741 = vrot.lane.b32.xlu0 %v1697_v57, %s6280_s27  ;;  %1743 = vrot.lane.b32.xlu1 %v1698_v58, %s6280_s27 }
 0x316   : > { %1747 = vrot.lane.b32.xlu0 %v1700_v59, %s6280_s27  ;;  %1739 = vrot.lane.b32.xlu1 %v1696_v60, %s6280_s27 }
 0x36a   : > { %v1720_v61 = vpop.permute.xlu0 %1719 }
 0x36c   : > { %v1722_v62 = vpop.permute.xlu1 %1721 }
 0x36d   : > { %v1750_v2 = vsel %vm827_vm0, %v1720_v61, %v1722_v62 }
 0x370   : > { %v1718_v63 = vpop.permute.xlu1 %1717  ;;  %v1730_v1 = vpop.permute.xlu0 %1729 }
 0x371   : > { %v1749_v3 = vsel %vm827_vm0, %v1718_v63, %v1720_v61  ;;  %1777 = vst.msk [vmem:[#allocation2] sm:$0xff] %vm878_vm1, %v1718_v63 }
 0x372   : > { %v5667_v4 = vpack.i.bf16 %v1750_v2, %v1749_v3 }
 0x374   : > { %v1724_v5 = vpop.permute.xlu1 %1723  ;;  %v1726_v6 = vpop.permute.xlu0 %1725  ;;  %5668 = vrot.lane.b32.xlu1 %v5667_v4, %s6282_s15 }
 0x375   : > { %v1751_v7 = vsel %vm827_vm0, %v1722_v62, %v1724_v5  ;;  %1781 = vst.msk [vmem:[#allocation2 + $0x20] sm:$0xff] %vm878_vm1, %v1726_v6 }
 0x376   : > { %1780 = vst.msk [vmem:[#allocation2 + $0x18] sm:$0xff] %vm882_vm4, %v1751_v7 }
 0x378   : > { %v1732_v8 = vpop.permute.xlu0 %1731  ;;  %v1728_v9 = vpop.permute.xlu1 %1727  ;;  %v1793_v13 = vld [vmem:[#allocation2] sm:$0xff] }
 0x379   : > { %v1754_v10 = vsel %vm827_vm0, %v1730_v1, %v1732_v8  ;;  %v1752_v24 = vsel %vm827_vm0, %v1726_v6, %v1728_v9  ;;  %v1753_v25 = vsel %vm827_vm0, %v1728_v9, %v1730_v1 }
 0x37a   : > { %1784 = vst.msk [vmem:[#allocation2 + $0x38] sm:$0xff] %vm882_vm4, %v1754_v10  ;;  %v5682_v28 = vpack.i.bf16 %v1753_v25, %v1752_v24  ;;  %v1814_v25 = vld [vmem:[#allocation3 + $0x20] sm:$0xff] }
 0x37c   : > { %v1738_v11 = vpop.permute.xlu1 %1737  ;;  %v1736_v12 = vpop.permute.xlu0 %1735  ;;  %v1797_v14 = vld [vmem:[#allocation2 + $0x20] sm:$0xff] }
 0x37d   : > { %v5672_v15 = vpack.i.bf16 %v1797_v14, %v1793_v13  ;;  %v1756_v18 = vsel %vm827_vm0, %v1736_v12, %v1738_v11  ;;  %v1796_v20 = vld [vmem:[#allocation2 + $0x18] sm:$0xff] }
 0x37f   : > { %5673 = vrot.lane.b32.xlu1 %v5672_v15, %s6282_s15 }
 0x380   : > { %v1734_v16 = vpop.permute.xlu1 %1733  ;;  %v1746_v17 = vpop.permute.xlu0 %1745 }
 0x381   : > { %v1755_v19 = vsel %vm827_vm0, %v1734_v16, %v1736_v12  ;;  %1785 = vst.msk [vmem:[#allocation2 + $0x40] sm:$0xff] %vm878_vm1, %v1734_v16  ;;  %v1800_v21 = vld [vmem:[#allocation2 + $0x38] sm:$0xff] }
 0x382   : > { %v5677_v22 = vpack.i.bf16 %v1800_v21, %v1796_v20  ;;  %v5687_v23 = vpack.i.bf16 %v1756_v18, %v1755_v19 }
 0x384   : > { %5678 = vrot.lane.b32.xlu0 %v5677_v22, %s6282_s15  ;;  %v1742_v26 = vpop.permute.xlu0 %1741  ;;  %v1744_v27 = vpop.permute.xlu1 %1743  ;;  %5688 = vrot.lane.b32.xlu1 %v5687_v23, %s6282_s15 }
 0x385   : > { %1789 = vst.msk [vmem:[#allocation2 + $0x60] sm:$0xff] %vm878_vm1, %v1742_v26  ;;  %v1758_v29 = vsel %vm827_vm0, %v1742_v26, %v1744_v27  ;;  %v1759_v30 = vsel %vm827_vm0, %v1744_v27, %v1746_v17 }
 0x386   : > { %v5697_v36 = vpack.i.bf16 %v1759_v30, %v1758_v29 }
 0x388   : > { %5683 = vrot.lane.b32.xlu0 %v5682_v28, %s6282_s15  ;;  %v1748_v31 = vpop.permute.xlu0 %1747  ;;  %v1740_v32 = vpop.permute.xlu1 %1739  ;;  %v1801_v37 = vld [vmem:[#allocation2 + $0x40] sm:$0xff] }
 0x389   : > { %v1760_v33 = vsel %vm827_vm0, %v1746_v17, %v1748_v31  ;;  %v1757_v34 = vsel %vm827_vm0, %v1738_v11, %v1740_v32 }
 0x38a   : > { %1792 = vst.msk [vmem:[#allocation2 + $0x78] sm:$0xff] %vm882_vm4, %v1760_v33  ;;  %1788 = vst.msk [vmem:[#allocation2 + $0x58] sm:$0xff] %vm882_vm4, %v1757_v34 }
 0x38c   : > { %v1805_v38 = vld [vmem:[#allocation2 + $0x60] sm:$0xff]  ;;  %5698 = vrot.lane.b32.xlu0 %v5697_v36, %s6282_s15 }
 0x38d   : > { %v5692_v39 = vpack.i.bf16 %v1805_v38, %v1801_v37 }
 0x38f   : > { %5693 = vrot.lane.b32.xlu1 %v5692_v39, %s6282_s15 }
 0x391   : > { %v1804_v40 = vld [vmem:[#allocation2 + $0x58] sm:$0xff] }
 0x392   : > { %v1808_v41 = vld [vmem:[#allocation2 + $0x78] sm:$0xff] }
 0x393   : > { %v5702_v42 = vpack.i.bf16 %v1808_v41, %v1804_v40  ;;  %5708 = vrot.lane.b32.xlu1 %v5667_v4, %s6286_s5 }
 0x395   : > { %5703 = vrot.lane.b32.xlu0 %v5702_v42, %s6282_s15 }
 0x397   : > { %5718 = vrot.lane.b32.xlu1 %v5672_v15, %s6286_s5 }
 0x399   : > { %5713 = vrot.lane.b32.xlu0 %v5682_v28, %s6286_s5 }
 0x39b   : > { %5728 = vrot.lane.b32.xlu1 %v5687_v23, %s6286_s5 }
 0x39d   : > { %5723 = vrot.lane.b32.xlu0 %v5677_v22, %s6286_s5 }
 0x39f   : > { %5733 = vrot.lane.b32.xlu1 %v5692_v39, %s6286_s5 }
 0x3a1   : > { %5738 = vrot.lane.b32.xlu0 %v5697_v36, %s6286_s5 }
 0x3a3   : > { %5748 = vrot.lane.b32.xlu1 %v5667_v4, %s6283_s3 }
 0x3a5   : > { %5743 = vrot.lane.b32.xlu0 %v5702_v42, %s6286_s5 }
 0x3a7   : > { %5758 = vrot.lane.b32.xlu1 %v5672_v15, %s6283_s3 }
 0x3a9   : > { %5753 = vrot.lane.b32.xlu0 %v5682_v28, %s6283_s3 }
 0x3ab   : > { %5768 = vrot.lane.b32.xlu1 %v5687_v23, %s6283_s3 }
 0x3ad   : > { %5763 = vrot.lane.b32.xlu0 %v5677_v22, %s6283_s3 }
 0x3af   : > { %5773 = vrot.lane.b32.xlu1 %v5692_v39, %s6283_s3  ;;  %v1815_v39 = vld [vmem:[#allocation3 + $0x28] sm:$0xff] }
 0x3b1   : > { %5778 = vrot.lane.b32.xlu0 %v5697_v36, %s6283_s3 }
 0x3b3   : > { %2613 = vperm.xlu1 %5666, %v2607_v43  }
 0x3b5   : > { %5783 = vrot.lane.b32.xlu0 %v5702_v42, %s6283_s3 }
 0x3b7   : > { %2623 = vperm.xlu1 %5666, %v2609_v44  }
 0x3b9   : > { %2618 = vperm.xlu0 %5665, %v2608_v45  }
 0x3bd   : > { %2628 = vperm.xlu0 %5665, %v2610_v46  }
 0x3e6   : > { %v5669_v47 = vpop.permute.xlu1 %5668 }
 0x3e7   : > { %v5671_v52 = vunpack.i.h.bf16 %v5669_v47  ;;  %v5670_v53 = vunpack.i.l.bf16 %v5669_v47 }
 0x3e9   : > { %v1867_v1 = vsel %vm1158_vm10, %v5670_v53, %v5671_v52 }
 0x3f1   : > { %v5674_v48 = vpop.permute.xlu1 %5673 }
 0x3f2   : > { %v5675_v54 = vunpack.i.l.bf16 %v5674_v48  ;;  %v5676_v58 = vunpack.i.h.bf16 %v5674_v48 }
 0x3f4   : > { %v1866_v61 = vsel %vm1158_vm10, %v5675_v54, %v5670_v53 }
 0x3f6   : > { %v5679_v49 = vpop.permute.xlu0 %5678  ;;  %v5689_v56 = vpop.permute.xlu1 %5688 }
 0x3f7   : > { %v5681_v50 = vunpack.i.h.bf16 %v5679_v49  ;;  %v5680_v51 = vunpack.i.l.bf16 %v5679_v49  ;;  %v5691_v62 = vunpack.i.h.bf16 %v5689_v56  ;;  %v5690_v63 = vunpack.i.l.bf16 %v5689_v56 }
 0x3f9   : > { %v5227_v55 = vpack.c.bf16 %v5681_v50, %v5680_v51  ;;  %v1868_v2 = vsel %vm1158_vm10, %v5671_v52, %v5680_v51  ;;  %v1873_v13 = vsel %vm1158_vm10, %v5690_v63, %v5691_v62 }
 0x3fa   : > { %v5684_v57 = vpop.permute.xlu0 %5683 }
 0x3fb   : > { %v5686_v59 = vunpack.i.h.bf16 %v5684_v57  ;;  %v5685_v60 = vunpack.i.l.bf16 %v5684_v57  ;;  %5228 = vmatprep.subr.bf16.mxu1 %v5227_v55 }
 0x3fd   : > { %v1869_v3 = vsel %vm1158_vm10, %v5676_v58, %v5685_v60  ;;  %v1871_v4 = vsel %vm1158_vm10, %v5686_v59, %v5681_v50  ;;  %v1870_v5 = vsel %vm1158_vm10, %v5685_v60, %v5686_v59  ;;  %v1816_v50 = vld [vmem:[#allocation3 + $0x30] sm:$0xff] }
 0x3fe   : > { %v5221_v6 = vpack.c.bf16 %v1869_v3, %v1866_v61  ;;  %v5229_v7 = vpack.c.bf16 %v1871_v4, %v1868_v2  ;;  %v5219_v8 = vpack.c.bf16 %v1870_v5, %v1867_v1  ;;  %v5699_v9 = vpop.permute.xlu0 %5698 }
 0x3ff   : > { %v5701_v10 = vunpack.i.h.bf16 %v5699_v9  ;;  %v5700_v11 = vunpack.i.l.bf16 %v5699_v9 }
 0x400   : > { %5220 = vmatprep.subr.bf16.mxu0 %v5219_v8  ;;  %5230 = vmatpush1.bf16.msra.mxu1 %v5229_v7 }
 0x401   : > { %5222 = vmatpush1.bf16.msra.mxu0 %v5221_v6  ;;  %v5694_v12 = vpop.permute.xlu1 %5693  ;;  %v1876_v14 = vsel %vm1158_vm10, %v5700_v11, %v5701_v10 }
 0x402   : > { %v5696_v15 = vunpack.i.h.bf16 %v5694_v12  ;;  %v5695_v16 = vunpack.i.l.bf16 %v5694_v12  ;;  %v5223_v17 = vpack.c.bf16 %v1876_v14, %v1873_v13 }
 0x404   : > { %v1875_v18 = vsel %vm1158_vm10, %v5696_v15, %v5700_v11  ;;  %v1872_v19 = vsel %vm1158_vm10, %v5695_v16, %v5690_v63  ;;  %5224 = vmatprep.subr.bf16.mxu0 %v5223_v17  ;;  %v1817_v63 = vld [vmem:[#allocation3 + $0x38] sm:$0xff]  ;;  %v1809_v17 = vld [vmem:[#allocation3] sm:$0xff] }
 0x405   : > { %v5225_v20 = vpack.c.bf16 %v1875_v18, %v1872_v19  ;;  %v5709_v21 = vpop.permute.xlu1 %5708 }
 0x406   : > { %v5711_v26 = vunpack.i.h.bf16 %v5709_v21  ;;  %v5710_v30 = vunpack.i.l.bf16 %v5709_v21 }
 0x407   : > { %v5704_v22 = vpop.permute.xlu0 %5703  ;;  %5226 = vmatpush1.bf16.msra.mxu0 %v5225_v20 }
 0x408   : > { %v5706_v23 = vunpack.i.h.bf16 %v5704_v22  ;;  %v5705_v24 = vunpack.i.l.bf16 %v5704_v22  ;;  %v2119_v43 = vsel %vm2117_vm7, %v5710_v30, %v5711_v26 }
 0x409   : > { %v5719_v31 = vpop.permute.xlu1 %5718 }
 0x40a   : > { %v1877_v27 = vsel %vm1158_vm10, %v5701_v10, %v5706_v23  ;;  %v1874_v28 = vsel %vm1158_vm10, %v5691_v62, %v5705_v24  ;;  %v5231_v29 = vpack.c.bf16 %v5706_v23, %v5705_v24  ;;  %v5721_v34 = vunpack.i.h.bf16 %v5719_v31  ;;  %5108 = vmatmul.mubr.msk.f32.vlgmr.msra.gmra.mrb[8].mxu0 %vm1894_vm6, %v1814_v25 }
 0x40b   : > { %v5233_v32 = vpack.c.bf16 %v1877_v27, %v1874_v28  ;;  %v5714_v33 = vpop.permute.xlu0 %5713  ;;  %v5720_v36 = vunpack.i.l.bf16 %v5719_v31  ;;  %1977 = vmatprep.mubr.f32.mxu0 %v6279_v0  ;;  %v1810_v27 = vld [vmem:[#allocation3 + $0x8] sm:$0xff] }
 0x40c   : > { %v5716_v37 = vunpack.i.h.bf16 %v5714_v33  ;;  %v5715_v38 = vunpack.i.l.bf16 %v5714_v33  ;;  %5232 = vmatprep.subr.bf16.mxu1 %v5231_v29 }
 0x40d   : > { %v2118_v40 = vsel %vm2117_vm7, %v5720_v36, %v5710_v30  ;;  %5234 = vmatpush1.bf16.msra.mxu1 %v5233_v32  ;;  %v5729_v42 = vpop.permute.xlu1 %5728 }
 0x40e   : > { %v2121_v41 = vsel %vm2117_vm7, %v5721_v34, %v5715_v38  ;;  %v2122_v44 = vsel %vm2117_vm7, %v5715_v38, %v5716_v37  ;;  %5109 = vmatmul.mubr.msk.f32.gmra.mrb[10].mxu0 %vm1894_vm6, %v1815_v39  ;;  %v5731_v51 = vunpack.i.h.bf16 %v5729_v42  ;;  %v5730_v55 = vunpack.i.l.bf16 %v5729_v42  ;;  %v1811_v42 = vld [vmem:[#allocation3 + $0x10] sm:$0xff] }
 0x40f   : > { %v5237_v45 = vpack.c.bf16 %v2121_v41, %v2118_v40  ;;  %v5724_v46 = vpop.permute.xlu0 %5723  ;;  %v5235_v47 = vpack.c.bf16 %v2122_v44, %v2119_v43  ;;  %1983 = vmatprep.mubr.f32.mxu0 %v6279_v0 }
 0x410   : > { %v5726_v48 = vunpack.i.h.bf16 %v5724_v46  ;;  %v5725_v49 = vunpack.i.l.bf16 %v5724_v46  ;;  %5112 = vmatmul.mubr.msk.f32.vlgmr.msra.gmra.mrb[8].mxu1 %vm1894_vm6, %v1814_v25  ;;  %v2125_v4 = vsel %vm2117_vm7, %v5730_v55, %v5731_v51 }
 0x411   : > { %5236 = vmatprep.subr.bf16.mxu0 %v5235_v47  ;;  %2066 = vmatprep.mubr.f32.mxu1 %v6279_v0  ;;  %v5734_v56 = vpop.permute.xlu1 %5733 }
 0x412   : > { %v2120_v52 = vsel %vm2117_vm7, %v5711_v26, %v5725_v49  ;;  %v2123_v53 = vsel %vm2117_vm7, %v5716_v37, %v5726_v48  ;;  %v5243_v54 = vpack.c.bf16 %v5726_v48, %v5725_v49  ;;  %5238 = vmatpush1.bf16.msra.mxu0 %v5237_v45  ;;  %v5736_v59 = vunpack.i.h.bf16 %v5734_v56 }
 0x413   : > { %v5245_v57 = vpack.c.bf16 %v2123_v53, %v2120_v52  ;;  %v5739_v58 = vpop.permute.xlu0 %5738  ;;  %v5735_v60 = vunpack.i.l.bf16 %v5734_v56  ;;  %5110 = vmatmul.mubr.msk.f32.gmra.mrb[12].mxu0 %vm1894_vm6, %v1816_v50 }
 0x414   : > { %v5741_v61 = vunpack.i.h.bf16 %v5739_v58  ;;  %v5740_v62 = vunpack.i.l.bf16 %v5739_v58  ;;  %5113 = vmatmul.mubr.msk.f32.gmra.mrb[10].mxu1 %vm1894_vm6, %v1815_v39  ;;  %5244 = vmatprep.subr.bf16.mxu1 %v5243_v54 }
 0x415   : > { %v2124_v1 = vsel %vm2117_vm7, %v5735_v60, %v5730_v55  ;;  %5246 = vmatpush1.bf16.msra.mxu1 %v5245_v57  ;;  %2072 = vmatprep.mubr.f32.mxu1 %v6279_v0  ;;  %v5749_v3 = vpop.permute.xlu1 %5748 }
 0x416   : > { %v2127_v2 = vsel %vm2117_vm7, %v5736_v59, %v5740_v62  ;;  %1989 = vmatprep.mubr.f32.mxu0 %v6279_v0  ;;  %v2128_v5 = vsel %vm2117_vm7, %v5740_v62, %v5741_v61  ;;  %v5751_v11 = vunpack.i.h.bf16 %v5749_v3  ;;  %v5750_v15 = vunpack.i.l.bf16 %v5749_v3  ;;  %v2337_v62 = vld [vmem:[#allocation3 + $0x40] sm:$0xff]  ;;  %v2340_v3 = vld [vmem:[#allocation3 + $0x58] sm:$0xff] }
 0x417   : > { %v5241_v6 = vpack.c.bf16 %v2127_v2, %v2124_v1  ;;  %v5744_v7 = vpop.permute.xlu0 %5743  ;;  %5111 = vmatmul.mubr.msk.f32.gmra.mrb[14].mxu0 %vm1894_vm6, %v1817_v63  ;;  %v5239_v8 = vpack.c.bf16 %v2128_v5, %v2125_v4  ;;  %v2338_v1 = vld [vmem:[#allocation3 + $0x48] sm:$0xff]  ;;  %v2339_v2 = vld [vmem:[#allocation3 + $0x50] sm:$0xff] }
 0x418   : > { %v5746_v9 = vunpack.i.h.bf16 %v5744_v7  ;;  %v5745_v10 = vunpack.i.l.bf16 %v5744_v7  ;;  %5114 = vmatmul.mubr.msk.f32.gmra.mrb[12].mxu1 %vm1894_vm6, %v1816_v50  ;;  %2222 = vmatprep.mubr.f32.mxu0 %v6279_v0  ;;  %v2374_v28 = vsel %vm1388_vm11, %v5750_v15, %v5751_v11 }
 0x419   : > { %5240 = vmatprep.subr.bf16.mxu0 %v5239_v8  ;;  %2078 = vmatprep.mubr.f32.mxu1 %v6279_v0  ;;  %v5759_v16 = vpop.permute.xlu1 %5758 }
 0x41a   : > { %v2126_v12 = vsel %vm2117_vm7, %v5731_v51, %v5745_v10  ;;  %v2129_v13 = vsel %vm2117_vm7, %v5741_v61, %v5746_v9  ;;  %v5247_v14 = vpack.c.bf16 %v5746_v9, %v5745_v10  ;;  %5242 = vmatpush1.bf16.msra.mxu0 %v5241_v6  ;;  %v5761_v20 = vunpack.i.h.bf16 %v5759_v16  ;;  %v1812_v51 = vld [vmem:[#allocation3 + $0x18] sm:$0xff] }
 0x41b   : > { %v5249_v18 = vpack.c.bf16 %v2129_v13, %v2126_v12  ;;  %v5754_v19 = vpop.permute.xlu0 %5753  ;;  %v5760_v21 = vunpack.i.l.bf16 %v5759_v16 }
 0x41c   : > { %v5756_v22 = vunpack.i.h.bf16 %v5754_v19  ;;  %v5755_v23 = vunpack.i.l.bf16 %v5754_v19  ;;  %5115 = vmatmul.mubr.msk.f32.gmra.mrb[14].mxu1 %vm1894_vm6, %v1817_v63  ;;  %5248 = vmatprep.subr.bf16.mxu1 %v5247_v14 }
 0x41d   : > { %v2373_v24 = vsel %vm1388_vm11, %v5760_v21, %v5750_v15  ;;  %5116 = vmatmul.mubr.msk.f32.vlgmr.msra.gmra.mrb[8].mxu0 %vm1894_vm6, %v1809_v17  ;;  %5250 = vmatpush1.bf16.msra.mxu1 %v5249_v18  ;;  %v5769_v26 = vpop.permute.xlu1 %5768 }
 0x41e   : > { %v2376_v25 = vsel %vm1388_vm11, %v5761_v20, %v5755_v23  ;;  %2311 = vmatprep.mubr.f32.mxu1 %v6279_v0  ;;  %2228 = vmatprep.mubr.f32.mxu0 %v6279_v0  ;;  %v2377_v29 = vsel %vm1388_vm11, %v5755_v23, %v5756_v22  ;;  %v5771_v36 = vunpack.i.h.bf16 %v5769_v26  ;;  %v5770_v40 = vunpack.i.l.bf16 %v5769_v26 }
 0x41f   : > { %v5253_v30 = vpack.c.bf16 %v2376_v25, %v2373_v24  ;;  %v5764_v31 = vpop.permute.xlu0 %5763  ;;  %v5251_v32 = vpack.c.bf16 %v2377_v29, %v2374_v28 }
 0x420   : > { %v5766_v33 = vunpack.i.h.bf16 %v5764_v31  ;;  %v5765_v34 = vunpack.i.l.bf16 %v5764_v31  ;;  %5120 = vmatmul.mubr.msk.f32.vlgmr.msra.gmra.mrb[8].mxu1 %vm1894_vm6, %v1809_v17  ;;  %v2380_v52 = vsel %vm1388_vm11, %v5770_v40, %v5771_v36 }
 0x421   : > { %5117 = vmatmul.mubr.msk.f32.gmra.mrb[10].mxu0 %vm1894_vm6, %v1810_v27  ;;  %5252 = vmatprep.subr.bf16.mxu0 %v5251_v32  ;;  %v5774_v41 = vpop.permute.xlu1 %5773 }
 0x422   : > { %v2375_v37 = vsel %vm1388_vm11, %v5751_v11, %v5765_v34  ;;  %v2378_v38 = vsel %vm1388_vm11, %v5756_v22, %v5766_v33  ;;  %v5259_v39 = vpack.c.bf16 %v5766_v33, %v5765_v34  ;;  %5254 = vmatpush1.bf16.msra.mxu0 %v5253_v30  ;;  %2317 = vmatprep.mubr.f32.mxu1 %v6279_v0  ;;  %v5776_v45 = vunpack.i.h.bf16 %v5774_v41 }
 0x423   : > { %v5261_v43 = vpack.c.bf16 %v2378_v38, %v2375_v37  ;;  %v5779_v44 = vpop.permute.xlu0 %5778  ;;  %v5775_v46 = vunpack.i.l.bf16 %v5774_v41  ;;  %2234 = vmatprep.mubr.f32.mxu0 %v6279_v0 }
 0x424   : > { %v5781_v47 = vunpack.i.h.bf16 %v5779_v44  ;;  %v5780_v48 = vunpack.i.l.bf16 %v5779_v44  ;;  %5121 = vmatmul.mubr.msk.f32.gmra.mrb[10].mxu1 %vm1894_vm6, %v1810_v27  ;;  %5260 = vmatprep.subr.bf16.mxu1 %v5259_v39 }
 0x425   : > { %v2379_v49 = vsel %vm1388_vm11, %v5775_v46, %v5770_v40  ;;  %5118 = vmatmul.mubr.msk.f32.gmra.mrb[12].mxu0 %vm1894_vm6, %v1811_v42  ;;  %5262 = vmatpush1.bf16.msra.mxu1 %v5261_v43 }
 0x426   : > { %v2382_v50 = vsel %vm1388_vm11, %v5776_v45, %v5780_v48  ;;  %2323 = vmatprep.mubr.f32.mxu1 %v6279_v0  ;;  %2240 = vmatprep.mubr.f32.mxu0 %v6279_v0  ;;  %v2383_v53 = vsel %vm1388_vm11, %v5780_v48, %v5781_v47 }
 0x427   : > { %v5257_v54 = vpack.c.bf16 %v2382_v50, %v2379_v49  ;;  %v5784_v55 = vpop.permute.xlu0 %5783  ;;  %v5255_v56 = vpack.c.bf16 %v2383_v53, %v2380_v52 }
 0x428   : > { %v5786_v57 = vunpack.i.h.bf16 %v5784_v55  ;;  %v5785_v58 = vunpack.i.l.bf16 %v5784_v55  ;;  %5122 = vmatmul.mubr.msk.f32.gmra.mrb[12].mxu1 %vm1894_vm6, %v1811_v42 }
 0x429   : > { %5119 = vmatmul.mubr.msk.f32.gmra.mrb[14].mxu0 %vm1894_vm6, %v1812_v51  ;;  %5256 = vmatprep.subr.bf16.mxu0 %v5255_v56 }
 0x42a   : > { %v2381_v59 = vsel %vm1388_vm11, %v5771_v36, %v5785_v58  ;;  %v2384_v60 = vsel %vm1388_vm11, %v5781_v47, %v5786_v57  ;;  %v5263_v61 = vpack.c.bf16 %v5786_v57, %v5785_v58  ;;  %5258 = vmatpush1.bf16.msra.mxu0 %v5257_v54  ;;  %2329 = vmatprep.mubr.f32.mxu1 %v6279_v0 }
 0x42b   : > { %v5265_v63 = vpack.c.bf16 %v2384_v60, %v2381_v59  ;;  %2477 = vmatprep.mubr.f32.mxu0 %v6279_v0 }
 0x42c   : > { %5123 = vmatmul.mubr.msk.f32.gmra.mrb[14].mxu1 %vm1894_vm6, %v1812_v51  ;;  %5264 = vmatprep.subr.bf16.mxu1 %v5263_v61 }
 0x42d   : > { %5124 = vmatmul.mubr.msk.f32.vlgmr.msra.gmra.mrb[8].mxu0 %vm1894_vm6, %v2337_v62  ;;  %5266 = vmatpush1.bf16.msra.mxu1 %v5265_v63 }
 0x42e   : > { %2566 = vmatprep.mubr.f32.mxu1 %v6279_v0  ;;  %2483 = vmatprep.mubr.f32.mxu0 %v6279_v0 }
 0x430   : > { %5128 = vmatmul.mubr.msk.f32.vlgmr.msra.gmra.mrb[8].mxu1 %vm1894_vm6, %v2337_v62 }
 0x431   : > { %5125 = vmatmul.mubr.msk.f32.gmra.mrb[10].mxu0 %vm1894_vm6, %v2338_v1  ;;  %2572 = vmatprep.mubr.f32.mxu1 %v6279_v0 }
 0x432   : > { %2489 = vmatprep.mubr.f32.mxu0 %v6279_v0  ;;  %v2614_v5 = vpop.permute.xlu1 %2613 }
 0x434   : > { %5129 = vmatmul.mubr.msk.f32.gmra.mrb[10].mxu1 %vm1894_vm6, %v2338_v1 }
 0x435   : > { %5126 = vmatmul.mubr.msk.f32.gmra.mrb[12].mxu0 %vm1894_vm6, %v2339_v2  ;;  %2578 = vmatprep.mubr.f32.mxu1 %v6279_v0 }
 0x436   : > { %2495 = vmatprep.mubr.f32.mxu0 %v6279_v0  ;;  %v2624_v39 = vpop.permute.xlu1 %2623 }
 0x438   : > { %5130 = vmatmul.mubr.msk.f32.gmra.mrb[12].mxu1 %vm1894_vm6, %v2339_v2  ;;  %v2619_v15 = vpop.permute.xlu0 %2618 }
 0x439   : > { %5127 = vmatmul.mubr.msk.f32.gmra.mrb[14].mxu0 %vm1894_vm6, %v2340_v3  ;;  %2584 = vmatprep.mubr.f32.mxu1 %v6279_v0 }
 0x43a   : > { %2964 = vmatprep.mubr.f32.mxu0 %v6279_v0 }
 0x43c   : > { %5131 = vmatmul.mubr.msk.f32.gmra.mrb[14].mxu1 %vm1894_vm6, %v2340_v3  ;;  %v2629_v48 = vpop.permute.xlu0 %2628 }
 0x43d   : > { %3053 = vmatprep.mubr.f32.mxu1 %v6279_v0 }
 0x500   : > { %v2479_v4 = vpop.f32.mrb[8].mxu0 }
 0x501   : > { %v2481_v6 = vpop.f32.mrb[9].mxu0  ;;  %v2631_v8 = vadd.f32 %v2614_v5, %v2479_v4 }
 0x502   : > { %v2632_v7 = vadd.f32 %v2614_v5, %v2481_v6 }
 0x503   : > { %v2568_v9 = vpop.f32.mrb[8].mxu1  ;;  %v2663_v18 = vmul.f32 0.01, %v2631_v8  ;;  %vm2647_vm12 = vcmp.gt.f32.partialorder %v2631_v8, 0.0 }
 0x504   : > { %v2664_v10 = vmul.f32 0.01, %v2632_v7  ;;  %v2633_v11 = vadd.f32 %v2614_v5, %v2568_v9  ;;  %v2485_v12 = vpop.f32.mrb[10].mxu0  ;;  %v2570_v13 = vpop.f32.mrb[9].mxu1  ;;  %vm2648_vm8 = vcmp.gt.f32.partialorder %v2632_v7, 0.0 }
 0x505   : > { %v2487_v14 = vpop.f32.mrb[11].mxu0  ;;  %v2635_v19 = vadd.f32 %v2619_v15, %v2485_v12  ;;  %v2634_v20 = vadd.f32 %v2614_v5, %v2570_v13  ;;  %v2679_v32 = vsel %vm2647_vm12, %v2631_v8, %v2663_v18 }
 0x506   : > { %v2665_v16 = vmul.f32 0.01, %v2633_v11  ;;  %v2680_v17 = vsel %vm2648_vm8, %v2632_v7, %v2664_v10  ;;  %vm2649_vm9 = vcmp.gt.f32.partialorder %v2633_v11, 0.0  ;;  %v2636_v30 = vadd.f32 %v2619_v15, %v2487_v14 }
 0x507   : > { %v2574_v21 = vpop.f32.mrb[10].mxu1  ;;  %2713 = vrot.lane.b32.xlu0 %v2680_v17, %s6280_s27  ;;  %v2667_v28 = vmul.f32 0.01, %v2635_v19  ;;  %v2666_v29 = vmul.f32 0.01, %v2634_v20  ;;  %vm2650_vm14 = vcmp.gt.f32.partialorder %v2634_v20, 0.0 }
 0x508   : > { %v2637_v22 = vadd.f32 %v2619_v15, %v2574_v21  ;;  %v2491_v23 = vpop.f32.mrb[12].mxu0  ;;  %v2576_v24 = vpop.f32.mrb[11].mxu1  ;;  %v2681_v25 = vsel %vm2649_vm9, %v2633_v11, %v2665_v16  ;;  %vm2651_vm15 = vcmp.gt.f32.partialorder %v2635_v19, 0.0  ;;  %v2668_v40 = vmul.f32 0.01, %v2636_v30 }
 0x509   : > { %2715 = vrot.lane.b32.xlu1 %v2681_v25, %s6280_s27  ;;  %v2493_v26 = vpop.f32.mrb[13].mxu0  ;;  %v2638_v33 = vadd.f32 %v2619_v15, %v2576_v24  ;;  %v2682_v42 = vsel %vm2650_vm14, %v2634_v20, %v2666_v29  ;;  %v2683_v43 = vsel %vm2651_vm15, %v2635_v19, %v2667_v28  ;;  %vm2652_vm2 = vcmp.gt.f32.partialorder %v2636_v30, 0.0 }
 0x50a   : > { %v2669_v27 = vmul.f32 0.01, %v2637_v22  ;;  %vm2653_vm13 = vcmp.gt.f32.partialorder %v2637_v22, 0.0  ;;  %v2640_v45 = vadd.f32 %v2624_v39, %v2493_v26  ;;  %v2639_v49 = vadd.f32 %v2624_v39, %v2491_v23 }
 0x50b   : > { %v2580_v31 = vpop.f32.mrb[12].mxu1  ;;  %v2670_v44 = vmul.f32 0.01, %v2638_v33  ;;  %vm2654_vm3 = vcmp.gt.f32.partialorder %v2638_v33, 0.0  ;;  %v2684_v50 = vsel %vm2652_vm2, %v2636_v30, %v2668_v40 }
 0x50c   : > { %v2497_v34 = vpop.f32.mrb[14].mxu0  ;;  %v2582_v36 = vpop.f32.mrb[13].mxu1  ;;  %v2685_v37 = vsel %vm2653_vm13, %v2637_v22, %v2669_v27  ;;  %v2641_v46 = vadd.f32 %v2624_v39, %v2580_v31  ;;  %v2672_v51 = vmul.f32 0.01, %v2640_v45  ;;  %vm2656_vm9 = vcmp.gt.f32.partialorder %v2640_v45, 0.0 }
 0x50d   : > { %2711 = vrot.lane.b32.xlu1 %v2679_v32, %s6280_s27  ;;  %2723 = vrot.lane.b32.xlu0 %v2685_v37, %s6280_s27  ;;  %v2499_v38 = vpop.f32.mrb[15].mxu0  ;;  %v2686_v54 = vsel %vm2654_vm3, %v2638_v33, %v2670_v44  ;;  %v2671_v55 = vmul.f32 0.01, %v2639_v49  ;;  %v2643_v56 = vadd.f32 %v2629_v48, %v2497_v34  ;;  %vm2655_vm12 = vcmp.gt.f32.partialorder %v2639_v49, 0.0 }
 0x50e   : > { %v2673_v52 = vmul.f32 0.01, %v2641_v46  ;;  %vm2657_vm8 = vcmp.gt.f32.partialorder %v2641_v46, 0.0  ;;  %v2644_v57 = vadd.f32 %v2629_v48, %v2499_v38  ;;  %v2688_v60 = vsel %vm2656_vm9, %v2640_v45, %v2672_v51 }
 0x50f   : > { %v2586_v41 = vpop.f32.mrb[14].mxu1  ;;  %v2675_v61 = vmul.f32 0.01, %v2643_v56  ;;  %v2642_v62 = vadd.f32 %v2624_v39, %v2582_v36  ;;  %v2687_v2 = vsel %vm2655_vm12, %v2639_v49, %v2671_v55  ;;  %vm2659_vm14 = vcmp.gt.f32.partialorder %v2643_v56, 0.0 }
 0x510   : > { %v2588_v47 = vpop.f32.mrb[15].mxu1  ;;  %v2645_v53 = vadd.f32 %v2629_v48, %v2586_v41  ;;  %v2689_v59 = vsel %vm2657_vm8, %v2641_v46, %v2673_v52  ;;  %v2676_v63 = vmul.f32 0.01, %v2644_v57  ;;  %vm2660_vm15 = vcmp.gt.f32.partialorder %v2644_v57, 0.0 }
 0x511   : > { %2717 = vrot.lane.b32.xlu1 %v2682_v42, %s6280_s27  ;;  %2719 = vrot.lane.b32.xlu0 %v2683_v43, %s6280_s27  ;;  %v2646_v1 = vadd.f32 %v2629_v48, %v2588_v47  ;;  %v2674_v4 = vmul.f32 0.01, %v2642_v62  ;;  %v2691_v6 = vsel %vm2659_vm14, %v2643_v56, %v2675_v61  ;;  %vm2658_vm3 = vcmp.gt.f32.partialorder %v2642_v62, 0.0  ;;  %v3539_v61 = vld [vmem:[%s7709_s7] sm:$0xff] }
 0x512   : > { %v2677_v58 = vmul.f32 0.01, %v2645_v53  ;;  %vm2661_vm13 = vcmp.gt.f32.partialorder %v2645_v53, 0.0  ;;  %v2692_v7 = vsel %vm2660_vm15, %v2644_v57, %v2676_v63  ;;  %v3540_v63 = vld [vmem:[%s7709_s7 + $0x8] sm:$0xff]  ;;  %vm3629_vm14 = vcmask 130048  }
 0x513   : > { %v2678_v5 = vmul.f32 0.01, %v2646_v1  ;;  %vm2662_vm2 = vcmp.gt.f32.partialorder %v2646_v1, 0.0  ;;  %v2690_v9 = vsel %vm2658_vm3, %v2642_v62, %v2674_v4  ;;  %v3541_v62 = vld [vmem:[%s7709_s7 + $0x10] sm:$0xff] }
 0x514   : > { %v2693_v3 = vsel %vm2661_vm13, %v2645_v53, %v2677_v58 }
 0x515   : > { %2725 = vrot.lane.b32.xlu0 %v2686_v54, %s6280_s27  ;;  %2721 = vrot.lane.b32.xlu1 %v2684_v50, %s6280_s27  ;;  %v2694_v8 = vsel %vm2662_vm2, %v2646_v1, %v2678_v5  ;;  %v3542_v1 = vld [vmem:[%s7709_s7 + $0x18] sm:$0xff]  ;;  %s7719_s7 = sld [smem:[#allocation46_spill]] }
 0x519   : > { %2731 = vrot.lane.b32.xlu1 %v2689_v59, %s6280_s27  ;;  %2729 = vrot.lane.b32.xlu0 %v2688_v60, %s6280_s27 }
 0x51d   : > { %2727 = vrot.lane.b32.xlu1 %v2687_v2, %s6280_s27  ;;  %2739 = vrot.lane.b32.xlu0 %v2693_v3, %s6280_s27 }
 0x521   : > { %2735 = vrot.lane.b32.xlu0 %v2691_v6, %s6280_s27  ;;  %2737 = vrot.lane.b32.xlu1 %v2692_v7, %s6280_s27 }
 0x525   : > { %2741 = vrot.lane.b32.xlu0 %v2694_v8, %s6280_s27  ;;  %2733 = vrot.lane.b32.xlu1 %v2690_v9, %s6280_s27 }
 0x579   : > { %v2714_v10 = vpop.permute.xlu0 %2713 }
 0x57b   : > { %v2716_v11 = vpop.permute.xlu1 %2715 }
 0x57c   : > { %v7026_v14 = vsel %vm827_vm0, %v2714_v10, %v2716_v11 }
 0x57f   : > { %v2712_v12 = vpop.permute.xlu1 %2711  ;;  %v2724_v13 = vpop.permute.xlu0 %2723 }
 0x580   : > { %v7029_v15 = vsel %vm827_vm0, %v2712_v12, %v2714_v10  ;;  %2771 = vst.msk [vmem:[#allocation2] sm:$0xff] %vm878_vm1, %v2712_v12 }
 0x581   : > { %v5787_v16 = vpack.i.bf16 %v7026_v14, %v7029_v15 }
 0x583   : > { %v2718_v17 = vpop.permute.xlu1 %2717  ;;  %v2720_v18 = vpop.permute.xlu0 %2719  ;;  %5788 = vrot.lane.b32.xlu1 %v5787_v16, %s6286_s5 }
 0x584   : > { %v2745_v19 = vsel %vm827_vm0, %v2716_v11, %v2718_v17  ;;  %2775 = vst.msk [vmem:[#allocation2 + $0x20] sm:$0xff] %vm878_vm1, %v2720_v18 }
 0x585   : > { %2774 = vst.msk [vmem:[#allocation2 + $0x18] sm:$0xff] %vm882_vm4, %v2745_v19 }
 0x587   : > { %v2726_v20 = vpop.permute.xlu0 %2725  ;;  %v2722_v21 = vpop.permute.xlu1 %2721  ;;  %v7050_v29 = vld [vmem:[#allocation2] sm:$0xff] }
 0x588   : > { %v2748_v22 = vsel %vm827_vm0, %v2724_v13, %v2726_v20  ;;  %v7040_v23 = vsel %vm827_vm0, %v2720_v18, %v2722_v21  ;;  %v7043_v24 = vsel %vm827_vm0, %v2722_v21, %v2724_v13 }
 0x589   : > { %2778 = vst.msk [vmem:[#allocation2 + $0x38] sm:$0xff] %vm882_vm4, %v2748_v22  ;;  %v5283_v25 = vpack.c.bf16 %v7040_v23, %v7029_v15  ;;  %v5293_v26 = vpack.c.bf16 %v7043_v24, %v7026_v14  ;;  %v5802_v45 = vpack.i.bf16 %v7043_v24, %v7040_v23  ;;  %v2809_v23 = vld [vmem:[#allocation6 + $0x28] sm:$0xff] }
 0x58b   : > { %v2732_v27 = vpop.permute.xlu1 %2731  ;;  %v2730_v28 = vpop.permute.xlu0 %2729  ;;  %v7052_v30 = vld [vmem:[#allocation2 + $0x20] sm:$0xff] }
 0x58c   : > { %v7055_v31 = vsel %vm827_vm0, %v2730_v28, %v2732_v27  ;;  %v5792_v32 = vpack.i.bf16 %v7052_v30, %v7050_v29  ;;  %v7064_v37 = vld [vmem:[#allocation2 + $0x18] sm:$0xff] }
 0x58e   : > { %5793 = vrot.lane.b32.xlu1 %v5792_v32, %s6286_s5 }
 0x58f   : > { %v2728_v33 = vpop.permute.xlu1 %2727  ;;  %v2740_v34 = vpop.permute.xlu0 %2739 }
 0x590   : > { %v7061_v36 = vsel %vm827_vm0, %v2728_v33, %v2730_v28  ;;  %2779 = vst.msk [vmem:[#allocation2 + $0x40] sm:$0xff] %vm878_vm1, %v2728_v33  ;;  %v7066_v38 = vld [vmem:[#allocation2 + $0x38] sm:$0xff] }
 0x591   : > { %v5797_v39 = vpack.i.bf16 %v7066_v38, %v7064_v37  ;;  %v5807_v40 = vpack.i.bf16 %v7055_v31, %v7061_v36  ;;  %v5291_v15 = vpack.c.bf16 %v7066_v38, %v7064_v37 }
 0x593   : > { %5798 = vrot.lane.b32.xlu0 %v5797_v39, %s6286_s5  ;;  %v2736_v41 = vpop.permute.xlu0 %2735  ;;  %v2738_v42 = vpop.permute.xlu1 %2737  ;;  %5808 = vrot.lane.b32.xlu1 %v5807_v40, %s6286_s5 }
 0x594   : > { %2783 = vst.msk [vmem:[#allocation2 + $0x60] sm:$0xff] %vm878_vm1, %v2736_v41  ;;  %v7076_v43 = vsel %vm827_vm0, %v2736_v41, %v2738_v42  ;;  %v7079_v44 = vsel %vm827_vm0, %v2738_v42, %v2740_v34 }
 0x595   : > { %v5287_v46 = vpack.c.bf16 %v7076_v43, %v7061_v36  ;;  %v5297_v47 = vpack.c.bf16 %v7079_v44, %v7055_v31  ;;  %v5817_v52 = vpack.i.bf16 %v7079_v44, %v7076_v43  ;;  %v2810_v36 = vld [vmem:[#allocation6 + $0x30] sm:$0xff]  ;;  %v2803_v44 = vld [vmem:[#allocation6] sm:$0xff] }
 0x597   : > { %5803 = vrot.lane.b32.xlu0 %v5802_v45, %s6286_s5  ;;  %v2742_v48 = vpop.permute.xlu0 %2741  ;;  %v2734_v49 = vpop.permute.xlu1 %2733  ;;  %v7094_v53 = vld [vmem:[#allocation2 + $0x40] sm:$0xff] }
 0x598   : > { %v2754_v50 = vsel %vm827_vm0, %v2740_v34, %v2742_v48  ;;  %v2751_v51 = vsel %vm827_vm0, %v2732_v27, %v2734_v49 }
 0x599   : > { %2786 = vst.msk [vmem:[#allocation2 + $0x78] sm:$0xff] %vm882_vm4, %v2754_v50  ;;  %2782 = vst.msk [vmem:[#allocation2 + $0x58] sm:$0xff] %vm882_vm4, %v2751_v51 }
 0x59b   : > { %v7096_v54 = vld [vmem:[#allocation2 + $0x60] sm:$0xff]  ;;  %5818 = vrot.lane.b32.xlu0 %v5817_v52, %s6286_s5 }
 0x59c   : > { %v5812_v55 = vpack.i.bf16 %v7096_v54, %v7094_v53  ;;  %v5289_v56 = vpack.c.bf16 %v7096_v54, %v7094_v53 }
 0x59e   : > { %5813 = vrot.lane.b32.xlu1 %v5812_v55, %s6286_s5 }
 0x5a0   : > { %v7104_v57 = vld [vmem:[#allocation2 + $0x58] sm:$0xff] }
 0x5a1   : > { %v7106_v58 = vld [vmem:[#allocation2 + $0x78] sm:$0xff] }
 0x5a2   : > { %v5822_v59 = vpack.i.bf16 %v7106_v58, %v7104_v57  ;;  %v5295_v60 = vpack.c.bf16 %v7106_v58, %v7104_v57  ;;  %5828 = vrot.lane.b32.xlu1 %v5787_v16, %s6283_s3 }
 0x5a4   : > { %5823 = vrot.lane.b32.xlu0 %v5822_v59, %s6286_s5 }
 0x5a6   : > { %5838 = vrot.lane.b32.xlu1 %v5792_v32, %s6283_s3 }
 0x5a8   : > { %5833 = vrot.lane.b32.xlu0 %v5802_v45, %s6283_s3 }
 0x5aa   : > { %5848 = vrot.lane.b32.xlu1 %v5807_v40, %s6283_s3 }
 0x5ac   : > { %5843 = vrot.lane.b32.xlu0 %v5797_v39, %s6283_s3 }
 0x5ae   : > { %5853 = vrot.lane.b32.xlu1 %v5812_v55, %s6283_s3 }
 0x5b0   : > { %5858 = vrot.lane.b32.xlu0 %v5817_v52, %s6283_s3 }
 0x5b2   : > { %3545 = vperm.xlu1 %5666, %v3539_v61  }
 0x5b4   : > { %5863 = vrot.lane.b32.xlu0 %v5822_v59, %s6283_s3 }
 0x5b6   : > { %3555 = vperm.xlu1 %5666, %v3541_v62  }
 0x5b8   : > { %3550 = vperm.xlu0 %5665, %v3540_v63  }
 0x5bc   : > { %3560 = vperm.xlu0 %5665, %v3542_v1  }
 0x5f5   : > { %v5789_v2 = vpop.permute.xlu1 %5788 }
 0x5f6   : > { %v5791_v7 = vunpack.i.h.bf16 %v5789_v2  ;;  %v5790_v8 = vunpack.i.l.bf16 %v5789_v2 }
 0x5f8   : > { %v2861_v21 = vsel %vm2117_vm7, %v5790_v8, %v5791_v7 }
 0x600   : > { %v5794_v3 = vpop.permute.xlu1 %5793 }
 0x601   : > { %v5795_v9 = vunpack.i.l.bf16 %v5794_v3  ;;  %v5796_v13 = vunpack.i.h.bf16 %v5794_v3  ;;  %v2808_v3 = vld [vmem:[#allocation6 + $0x20] sm:$0xff] }
 0x603   : > { %v2860_v18 = vsel %vm2117_vm7, %v5795_v9, %v5790_v8 }
 0x605   : > { %v5799_v4 = vpop.permute.xlu0 %5798  ;;  %v5809_v11 = vpop.permute.xlu1 %5808 }
 0x606   : > { %v5801_v5 = vunpack.i.h.bf16 %v5799_v4  ;;  %v5800_v6 = vunpack.i.l.bf16 %v5799_v4  ;;  %v5811_v19 = vunpack.i.h.bf16 %v5809_v11  ;;  %v5810_v20 = vunpack.i.l.bf16 %v5809_v11 }
 0x608   : > { %v5275_v10 = vpack.c.bf16 %v5801_v5, %v5800_v6  ;;  %v2862_v22 = vsel %vm2117_vm7, %v5791_v7, %v5800_v6  ;;  %v2867_v48 = vsel %vm2117_vm7, %v5810_v20, %v5811_v19 }
 0x609   : > { %v5804_v12 = vpop.permute.xlu0 %5803 }
 0x60a   : > { %v5806_v16 = vunpack.i.h.bf16 %v5804_v12  ;;  %v5805_v17 = vunpack.i.l.bf16 %v5804_v12  ;;  %5276 = vmatprep.subr.bf16.mxu1 %v5275_v10 }
 0x60c   : > { %v2863_v27 = vsel %vm2117_vm7, %v5796_v13, %v5805_v17  ;;  %v2865_v28 = vsel %vm2117_vm7, %v5806_v16, %v5801_v5  ;;  %v2864_v32 = vsel %vm2117_vm7, %v5805_v17, %v5806_v16  ;;  %v5285_v5 = vpack.c.bf16 %v7052_v30, %v7050_v29 }
 0x60d   : > { %v5269_v33 = vpack.c.bf16 %v2863_v27, %v2860_v18  ;;  %v5277_v34 = vpack.c.bf16 %v2865_v28, %v2862_v22  ;;  %v5267_v39 = vpack.c.bf16 %v2864_v32, %v2861_v21  ;;  %v5819_v40 = vpop.permute.xlu0 %5818 }
 0x60e   : > { %v5821_v41 = vunpack.i.h.bf16 %v5819_v40  ;;  %v5820_v42 = vunpack.i.l.bf16 %v5819_v40 }
 0x60f   : > { %5268 = vmatprep.subr.bf16.mxu0 %v5267_v39  ;;  %5278 = vmatpush1.bf16.msra.mxu1 %v5277_v34 }
 0x610   : > { %5270 = vmatpush1.bf16.msra.mxu0 %v5269_v33  ;;  %v5814_v45 = vpop.permute.xlu1 %5813  ;;  %v2870_v49 = vsel %vm2117_vm7, %v5820_v42, %v5821_v41 }
 0x611   : > { %v5816_v50 = vunpack.i.h.bf16 %v5814_v45  ;;  %v5815_v51 = vunpack.i.l.bf16 %v5814_v45  ;;  %v5271_v52 = vpack.c.bf16 %v2870_v49, %v2867_v48 }
 0x613   : > { %v2869_v55 = vsel %vm2117_vm7, %v5816_v50, %v5820_v42  ;;  %v2866_v59 = vsel %vm2117_vm7, %v5815_v51, %v5810_v20  ;;  %5272 = vmatprep.subr.bf16.mxu0 %v5271_v52  ;;  %v2804_v42 = vld [vmem:[#allocation6 + $0x8] sm:$0xff]  ;;  %v2805_v52 = vld [vmem:[#allocation6 + $0x10] sm:$0xff] }
 0x614   : > { %v5273_v61 = vpack.c.bf16 %v2869_v55, %v2866_v59  ;;  %v7143_v62 = vpop.permute.xlu1 %5828  ;;  %v2806_v59 = vld [vmem:[#allocation6 + $0x18] sm:$0xff] }
 0x615   : > { %v5831_v4 = vunpack.i.h.bf16 %v7143_v62  ;;  %v5830_v9 = vunpack.i.l.bf16 %v7143_v62  ;;  %v3270_v62 = vld [vmem:[#allocation6 + $0x48] sm:$0xff] }
 0x616   : > { %v5824_v63 = vpop.permute.xlu0 %5823  ;;  %5274 = vmatpush1.bf16.msra.mxu0 %v5273_v61  ;;  %v3269_v61 = vld [vmem:[#allocation6 + $0x40] sm:$0xff] }
 0x617   : > { %v5826_v1 = vunpack.i.h.bf16 %v5824_v63  ;;  %v5825_v2 = vunpack.i.l.bf16 %v5824_v63  ;;  %5284 = vmatprep.subr.bf16.mxu0 %v5283_v25  ;;  %v3306_v29 = vsel %vm1388_vm11, %v5830_v9, %v5831_v4  ;;  %v3271_v63 = vld [vmem:[#allocation6 + $0x50] sm:$0xff] }
 0x618   : > { %v5839_v10 = vpop.permute.xlu1 %5838 }
 0x619   : > { %v2871_v6 = vsel %vm2117_vm7, %v5821_v41, %v5826_v1  ;;  %v2868_v7 = vsel %vm2117_vm7, %v5811_v19, %v5825_v2  ;;  %v5279_v8 = vpack.c.bf16 %v5826_v1, %v5825_v2  ;;  %5132 = vmatmul.mubr.msk.f32.vlgmr.msra.gmra.mrb[16].mxu0 %vm1894_vm6, %v2808_v3  ;;  %v5840_v43 = vunpack.i.l.bf16 %v5839_v10  ;;  %v3272_v1 = vld [vmem:[#allocation6 + $0x58] sm:$0xff] }
 0x61a   : > { %v5281_v11 = vpack.c.bf16 %v2871_v6, %v2868_v7  ;;  %v5834_v12 = vpop.permute.xlu0 %5833  ;;  %5286 = vmatpush1.bf16.msra.mxu0 %v5285_v5  ;;  %2970 = vmatprep.mubr.f32.mxu0 %v6279_v0 }
 0x61b   : > { %v5836_v13 = vunpack.i.h.bf16 %v5834_v12  ;;  %v5835_v16 = vunpack.i.l.bf16 %v5834_v12  ;;  %5280 = vmatprep.subr.bf16.mxu1 %v5279_v8  ;;  %5288 = vmatprep.subr.bf16.mxu0 %v5287_v46  ;;  %v5841_v46 = vunpack.i.h.bf16 %v5839_v10  ;;  %v3305_v54 = vsel %vm1388_vm11, %v5840_v43, %v5830_v9 }
 0x61c   : > { %5282 = vmatpush1.bf16.msra.mxu1 %v5281_v11  ;;  %v7160_v25 = vpop.permute.xlu1 %5848 }
 0x61d   : > { %5292 = vmatprep.subr.bf16.mxu1 %v5291_v15  ;;  %v3309_v30 = vsel %vm1388_vm11, %v5835_v16, %v5836_v13  ;;  %5133 = vmatmul.mubr.msk.f32.gmra.mrb[18].mxu0 %vm1894_vm6, %v2809_v23  ;;  %v5851_v57 = vunpack.i.h.bf16 %v7160_v25  ;;  %v5850_v58 = vunpack.i.l.bf16 %v7160_v25 }
 0x61e   : > { %v5844_v17 = vpop.permute.xlu0 %5843  ;;  %v5299_v37 = vpack.c.bf16 %v3309_v30, %v3306_v29  ;;  %5290 = vmatpush1.bf16.msra.mxu0 %v5289_v56  ;;  %2976 = vmatprep.mubr.f32.mxu0 %v6279_v0  ;;  %v3308_v56 = vsel %vm1388_vm11, %v5841_v46, %v5835_v16 }
 0x61f   : > { %v5846_v38 = vunpack.i.h.bf16 %v5844_v17  ;;  %v5845_v18 = vunpack.i.l.bf16 %v5844_v17  ;;  %5136 = vmatmul.mubr.msk.f32.vlgmr.msra.gmra.mrb[16].mxu1 %vm1894_vm6, %v2808_v3  ;;  %v5301_v22 = vpack.c.bf16 %v3308_v56, %v3305_v54  ;;  %v3312_v33 = vsel %vm1388_vm11, %v5850_v58, %v5851_v57 }
 0x620   : > { %5294 = vmatpush1.bf16.msra.mxu1 %v5293_v26  ;;  %3059 = vmatprep.mubr.f32.mxu1 %v6279_v0  ;;  %v5854_v53 = vpop.permute.xlu1 %5853  ;;  %v2811_v26 = vld [vmem:[#allocation6 + $0x38] sm:$0xff] }
 0x621   : > { %5296 = vmatprep.subr.bf16.mxu1 %v5295_v60  ;;  %5300 = vmatprep.subr.bf16.mxu0 %v5299_v37  ;;  %v5307_v20 = vpack.c.bf16 %v5846_v38, %v5845_v18  ;;  %v5855_v60 = vunpack.i.l.bf16 %v5854_v53  ;;  %v5856_v21 = vunpack.i.h.bf16 %v5854_v53  ;;  %v3307_v27 = vsel %vm1388_vm11, %v5831_v4, %v5845_v18 }
 0x622   : > { %v5859_v19 = vpop.permute.xlu0 %5858  ;;  %5134 = vmatmul.mubr.msk.f32.gmra.mrb[20].mxu0 %vm1894_vm6, %v2810_v36  ;;  %v3310_v28 = vsel %vm1388_vm11, %v5836_v13, %v5846_v38 }
 0x623   : > { %5137 = vmatmul.mubr.msk.f32.gmra.mrb[18].mxu1 %vm1894_vm6, %v2809_v23  ;;  %v5861_v14 = vunpack.i.h.bf16 %v5859_v19  ;;  %v5860_v24 = vunpack.i.l.bf16 %v5859_v19  ;;  %2982 = vmatprep.mubr.f32.mxu0 %v6279_v0  ;;  %v3311_v32 = vsel %vm1388_vm11, %v5855_v60, %v5850_v58  ;;  %v5309_v45 = vpack.c.bf16 %v3310_v28, %v3307_v27 }
 0x624   : > { %5298 = vmatpush1.bf16.msra.mxu1 %v5297_v47  ;;  %3065 = vmatprep.mubr.f32.mxu1 %v6279_v0 }
 0x625   : > { %5308 = vmatprep.subr.bf16.mxu1 %v5307_v20  ;;  %v3315_v47 = vsel %vm1388_vm11, %v5860_v24, %v5861_v14  ;;  %v3314_v34 = vsel %vm1388_vm11, %v5856_v21, %v5860_v24 }
 0x626   : > { %5135 = vmatmul.mubr.msk.f32.gmra.mrb[22].mxu0 %vm1894_vm6, %v2811_v26  ;;  %v5864_v31 = vpop.permute.xlu0 %5863  ;;  %v5303_v41 = vpack.c.bf16 %v3315_v47, %v3312_v33  ;;  %v5305_v48 = vpack.c.bf16 %v3314_v34, %v3311_v32 }
 0x627   : > { %5138 = vmatmul.mubr.msk.f32.gmra.mrb[20].mxu1 %vm1894_vm6, %v2810_v36  ;;  %3154 = vmatprep.mubr.f32.mxu0 %v6279_v0  ;;  %v5866_v39 = vunpack.i.h.bf16 %v5864_v31  ;;  %v5865_v40 = vunpack.i.l.bf16 %v5864_v31 }
 0x628   : > { %3071 = vmatprep.mubr.f32.mxu1 %v6279_v0 }
 0x629   : > { %v3313_v49 = vsel %vm1388_vm11, %v5851_v57, %v5865_v40  ;;  %v3316_v50 = vsel %vm1388_vm11, %v5861_v14, %v5866_v39  ;;  %v5311_v51 = vpack.c.bf16 %v5866_v39, %v5865_v40 }
 0x62a   : > { %5140 = vmatmul.mubr.msk.f32.vlgmr.msra.gmra.mrb[16].mxu0 %vm1894_vm6, %v2803_v44  ;;  %v5313_v55 = vpack.c.bf16 %v3316_v50, %v3313_v49 }
 0x62b   : > { %5139 = vmatmul.mubr.msk.f32.gmra.mrb[22].mxu1 %vm1894_vm6, %v2811_v26  ;;  %5302 = vmatpush1.bf16.msra.mxu0 %v5301_v22 }
 0x62c   : > { %3243 = vmatprep.mubr.f32.mxu1 %v6279_v0  ;;  %5304 = vmatprep.subr.bf16.mxu0 %v5303_v41 }
 0x62d   : > { %3160 = vmatprep.mubr.f32.mxu0 %v6279_v0 }
 0x62e   : > { %5141 = vmatmul.mubr.msk.f32.gmra.mrb[18].mxu0 %vm1894_vm6, %v2804_v42 }
 0x62f   : > { %5144 = vmatmul.mubr.msk.f32.vlgmr.msra.gmra.mrb[16].mxu1 %vm1894_vm6, %v2803_v44  ;;  %5306 = vmatpush1.bf16.msra.mxu0 %v5305_v48 }
 0x630   : > { %5310 = vmatpush1.bf16.msra.mxu1 %v5309_v45  ;;  %3249 = vmatprep.mubr.f32.mxu1 %v6279_v0 }
 0x631   : > { %5312 = vmatprep.subr.bf16.mxu1 %v5311_v51  ;;  %3166 = vmatprep.mubr.f32.mxu0 %v6279_v0  ;;  %v3546_v2 = vpop.permute.xlu1 %3545 }
 0x632   : > { %5178 = vmatprep.subr.mxu0 %v6279_v0  ;;  %5142 = vmatmul.mubr.msk.f32.gmra.mrb[20].mxu0 %vm1894_vm6, %v2805_v52 }
 0x633   : > { %5145 = vmatmul.mubr.msk.f32.gmra.mrb[18].mxu1 %vm1894_vm6, %v2804_v42  ;;  %3172 = vmatprep.mubr.f32.mxu0 %v6279_v0 }
 0x634   : > { %5314 = vmatpush1.bf16.msra.mxu1 %v5313_v55  ;;  %3255 = vmatprep.mubr.f32.mxu1 %v6279_v0 }
 0x635   : > { %v3556_v38 = vpop.permute.xlu1 %3555 }
 0x636   : > { %5143 = vmatmul.mubr.msk.f32.gmra.mrb[22].mxu0 %vm1894_vm6, %v2806_v59 }
 0x637   : > { %5146 = vmatmul.mubr.msk.f32.gmra.mrb[20].mxu1 %vm1894_vm6, %v2805_v52  ;;  %3409 = vmatprep.mubr.f32.mxu0 %v6279_v0  ;;  %v3551_v7 = vpop.permute.xlu0 %3550 }
 0x638   : > { %3261 = vmatprep.mubr.f32.mxu1 %v6279_v0 }
 0x63a   : > { %5148 = vmatmul.mubr.msk.f32.vlgmr.msra.gmra.mrb[16].mxu0 %vm1894_vm6, %v3269_v61 }
 0x63b   : > { %5147 = vmatmul.mubr.msk.f32.gmra.mrb[22].mxu1 %vm1894_vm6, %v2806_v59  ;;  %3415 = vmatprep.mubr.f32.mxu0 %v6279_v0  ;;  %v3561_v27 = vpop.permute.xlu0 %3560 }
 0x63c   : > { %3498 = vmatprep.mubr.f32.mxu1 %v6279_v0 }
 0x63e   : > { %5149 = vmatmul.mubr.msk.f32.gmra.mrb[18].mxu0 %vm1894_vm6, %v3270_v62 }
 0x63f   : > { %5152 = vmatmul.mubr.msk.f32.vlgmr.msra.gmra.mrb[16].mxu1 %vm1894_vm6, %v3269_v61  ;;  %3421 = vmatprep.mubr.f32.mxu0 %v6279_v0 }
 0x640   : > { %3504 = vmatprep.mubr.f32.mxu1 %v6279_v0 }
 0x642   : > { %5150 = vmatmul.mubr.msk.f32.gmra.mrb[20].mxu0 %vm1894_vm6, %v3271_v63 }
 0x643   : > { %5153 = vmatmul.mubr.msk.f32.gmra.mrb[18].mxu1 %vm1894_vm6, %v3270_v62  ;;  %3427 = vmatprep.mubr.f32.mxu0 %v6279_v0 }
 0x644   : > { %3510 = vmatprep.mubr.f32.mxu1 %v6279_v0 }
 0x646   : > { %5151 = vmatmul.mubr.msk.f32.gmra.mrb[22].mxu0 %vm1894_vm6, %v3272_v1 }
 0x647   : > { %5154 = vmatmul.mubr.msk.f32.gmra.mrb[20].mxu1 %vm1894_vm6, %v3271_v63 }
 0x648   : > { %3516 = vmatprep.mubr.f32.mxu1 %v6279_v0 }
 0x64b   : > { %5155 = vmatmul.mubr.msk.f32.gmra.mrb[22].mxu1 %vm1894_vm6, %v3272_v1 }
 0x64c   : > { %4235 = vmatprep.mubr.f32.mxu1 %v6279_v0 }
 0x70d   : > { %v3411_v3 = vpop.f32.mrb[16].mxu0 }
 0x70e   : > { %v3563_v4 = vadd.f32 %v3546_v2, %v3411_v3  ;;  %v3413_v5 = vpop.f32.mrb[17].mxu0 }
 0x70f   : > { %v3564_v6 = vadd.f32 %v3546_v2, %v3413_v5 }
 0x710   : > { %vm3579_vm7 = vcmp.gt.f32.partialorder %v3563_v4, 0.0  ;;  %v3595_v8 = vmul.f32 0.01, %v3563_v4 }
 0x711   : > { %vm3580_vm8 = vcmp.gt.f32.partialorder %v3564_v6, 0.0  ;;  %v3596_v9 = vmul.f32 0.01, %v3564_v6  ;;  %v3417_v11 = vpop.f32.mrb[18].mxu0 }
 0x712   : > { %v3500_v10 = vpop.f32.mrb[16].mxu1  ;;  %v3611_v12 = vsel %vm3579_vm7, %v3563_v4, %v3595_v8  ;;  %v3567_v16 = vadd.f32 %v3551_v7, %v3417_v11  ;;  %v3419_v23 = vpop.f32.mrb[19].mxu0 }
 0x713   : > { %v3565_v13 = vadd.f32 %v3546_v2, %v3500_v10  ;;  %v3502_v15 = vpop.f32.mrb[17].mxu1  ;;  %v3612_v25 = vsel %vm3580_vm8, %v3564_v6, %v3596_v9  ;;  %v3568_v30 = vadd.f32 %v3551_v7, %v3419_v23 }
 0x714   : > { %v3566_v29 = vadd.f32 %v3546_v2, %v3502_v15  ;;  %v3627_v17 = vmax.f32 %v3611_v12, %v3612_v25  ;;  %vm3583_vm9 = vcmp.gt.f32.partialorder %v3567_v16, 0.0  ;;  %v3599_v18 = vmul.f32 0.01, %v3567_v16 }
 0x715   : > { %vm3581_vm6 = vcmp.gt.f32.partialorder %v3565_v13, 0.0  ;;  %v3597_v37 = vmul.f32 0.01, %v3565_v13  ;;  %vm3584_vm13 = vcmp.gt.f32.partialorder %v3568_v30, 0.0  ;;  %v3600_v46 = vmul.f32 0.01, %v3568_v30 }
 0x716   : > { %vm3582_vm12 = vcmp.gt.f32.partialorder %v3566_v29, 0.0  ;;  %v3598_v36 = vmul.f32 0.01, %v3566_v29  ;;  %v3506_v19 = vpop.f32.mrb[18].mxu1  ;;  %v3423_v20 = vpop.f32.mrb[20].mxu0  ;;  %v3615_v53 = vsel %vm3583_vm9, %v3567_v16, %v3599_v18 }
 0x717   : > { %v3613_v43 = vsel %vm3581_vm6, %v3565_v13, %v3597_v37  ;;  %v3569_v24 = vadd.f32 %v3551_v7, %v3506_v19  ;;  %v3571_v26 = vadd.f32 %v3556_v38, %v3423_v20  ;;  %v3508_v54 = vpop.f32.mrb[19].mxu1  ;;  %v3425_v56 = vpop.f32.mrb[21].mxu0  ;;  %v3616_v57 = vsel %vm3584_vm13, %v3568_v30, %v3600_v46  ;;  %v3675_v46 = vld [vmem:[%s7711_s10] sm:$0xff]  ;;  %v3653_v20 = vld [vmem:[%s7710_s8 + $0x8] sm:$0xff] }
 0x718   : > { %v3614_v14 = vsel %vm3582_vm12, %v3566_v29, %v3598_v36  ;;  %v3570_v58 = vadd.f32 %v3551_v7, %v3508_v54  ;;  %v3572_v60 = vadd.f32 %v3556_v38, %v3425_v56  ;;  %v3628_v21 = vmax.f32 %v3627_v17, %v3613_v43  ;;  %v3704_v36 = vld [vmem:[%s7612_s12] sm:$0xff] }
 0x719   : > { %v3634_v31 = vmax.f32 %v3615_v53, %v3616_v57  ;;  %vm3585_vm15 = vcmp.gt.f32.partialorder %v3569_v24, 0.0  ;;  %v3601_v44 = vmul.f32 0.01, %v3569_v24  ;;  %vm3587_vm2 = vcmp.gt.f32.partialorder %v3571_v26, 0.0  ;;  %v3429_v22 = vpop.f32.mrb[22].mxu0  ;;  %5179 = vmatpush3.msra.mxu0 %v3704_v36  ;;  %v3652_v43 = vld [vmem:[%s7710_s8] sm:$0xff] }
 0x71a   : > { %v3512_v47 = vpop.f32.mrb[20].mxu1  ;;  %v3603_v28 = vmul.f32 0.01, %v3571_v26  ;;  %vm3586_vm3 = vcmp.gt.f32.partialorder %v3570_v58, 0.0  ;;  %v3602_v32 = vmul.f32 0.01, %v3570_v58  ;;  %v3575_v40 = vadd.f32 %v3561_v27, %v3429_v22 }
 0x71b   : > { %vm3588_vm7 = vcmp.gt.f32.partialorder %v3572_v60, 0.0  ;;  %v3617_v33 = vsel %vm3585_vm15, %v3569_v24, %v3601_v44  ;;  %v3604_v34 = vmul.f32 0.01, %v3572_v60  ;;  %v3573_v39 = vadd.f32 %v3556_v38, %v3512_v47  ;;  %v3514_v41 = vpop.f32.mrb[21].mxu1  ;;  %v3431_v42 = vpop.f32.mrb[23].mxu0  ;;  %v3676_v53 = vld [vmem:[%s7711_s10 + $0x8] sm:$0xff] }
 0x71c   : > { %v3619_v45 = vsel %vm3587_vm2, %v3571_v26, %v3603_v28  ;;  %v3618_v48 = vsel %vm3586_vm3, %v3570_v58, %v3602_v32  ;;  %v3574_v49 = vadd.f32 %v3556_v38, %v3514_v41  ;;  %v3630_v50 = vsel %vm3629_vm14, %v3614_v14, -inf  ;;  %v3654_v57 = vld [vmem:[%s7710_s8 + $0x10] sm:$0xff]  ;;  %v3678_v44 = vld [vmem:[%s7711_s10 + $0x18] sm:$0xff] }
 0x71d   : > { %v3620_v51 = vsel %vm3588_vm7, %v3572_v60, %v3604_v34  ;;  %vm3589_vm8 = vcmp.gt.f32.partialorder %v3573_v39, 0.0  ;;  %v3605_v52 = vmul.f32 0.01, %v3573_v39  ;;  %vm3591_vm6 = vcmp.gt.f32.partialorder %v3575_v40, 0.0  ;;  %v3677_v58 = vld [vmem:[%s7711_s10 + $0x10] sm:$0xff] }
 0x71e   : > { %v3518_v55 = vpop.f32.mrb[22].mxu1  ;;  %v3640_v59 = vmax.f32 %v3619_v45, %v3620_v51  ;;  %v3607_v61 = vmul.f32 0.01, %v3575_v40  ;;  %vm3590_vm9 = vcmp.gt.f32.partialorder %v3574_v49, 0.0  ;;  %v3606_v62 = vmul.f32 0.01, %v3574_v49 }
 0x71f   : > { %v3520_v63 = vpop.f32.mrb[23].mxu1  ;;  %v3621_v1 = vsel %vm3589_vm8, %v3573_v39, %v3605_v52  ;;  %v3631_v2 = vmax.f32 %v3628_v21, %v3630_v50  ;;  %v3576_v3 = vadd.f32 %v3561_v27, %v3431_v42  ;;  %v3577_v4 = vadd.f32 %v3561_v27, %v3518_v55 }
 0x720   : > { %v3623_v5 = vsel %vm3591_vm6, %v3575_v40, %v3607_v61  ;;  %v3622_v6 = vsel %vm3590_vm9, %v3574_v49, %v3606_v62  ;;  %v3578_v7 = vadd.f32 %v3561_v27, %v3520_v63  ;;  %v3635_v8 = vmax.f32 %v3634_v31, %v3617_v33  ;;  %v3655_v31 = vld [vmem:[%s7710_s8 + $0x18] sm:$0xff] }
 0x721   : > { %3632 = vmax.xlane.f32.xlu1 %v3631_v2  ;;  %vm3592_vm12 = vcmp.gt.f32.partialorder %v3576_v3, 0.0  ;;  %v3608_v9 = vmul.f32 0.01, %v3576_v3  ;;  %vm3593_vm13 = vcmp.gt.f32.partialorder %v3577_v4, 0.0  ;;  %v3609_v10 = vmul.f32 0.01, %v3577_v4 }
 0x722   : > { %vm3594_vm15 = vcmp.gt.f32.partialorder %v3578_v7, 0.0  ;;  %v3610_v11 = vmul.f32 0.01, %v3578_v7  ;;  %v3636_v12 = vsel %vm3629_vm14, %v3618_v48, -inf  ;;  %v3641_v13 = vmax.f32 %v3640_v59, %v3621_v1 }
 0x723   : > { %v3624_v16 = vsel %vm3592_vm12, %v3576_v3, %v3608_v9  ;;  %v3625_v15 = vsel %vm3593_vm13, %v3577_v4, %v3609_v10  ;;  %v3637_v23 = vmax.f32 %v3635_v8, %v3636_v12  ;;  %v3642_v25 = vsel %vm3629_vm14, %v3622_v6, -inf  ;;  %v3696_v8 = vld [vmem:[#allocation9] sm:$0x1] }
 0x724   : > { %v3646_v29 = vmax.f32 %v3623_v5, %v3624_v16  ;;  %v3626_v30 = vsel %vm3594_vm15, %v3578_v7, %v3610_v11  ;;  %v3643_v17 = vmax.f32 %v3641_v13, %v3642_v25  ;;  %vm6287_vm2 = vmmov 0   ;;  %v3673_v7 = vld [vmem:[#allocation8] sm:$0x1] }
 0x725   : > { %3638 = vmax.xlane.f32.xlu0 %v3637_v23  ;;  %v3648_v37 = vsel %vm3629_vm14, %v3626_v30, -inf  ;;  %5180 = vmatprep.mubr.msk.f32.mxu0 %vm6287_vm2, %v6279_v0  ;;  %vm4736_vm3 = vcmask 57344  }
 0x726   : > { %v3647_v38 = vmax.f32 %v3646_v29, %v3625_v15  ;;  %v3698_v15 = vld [vmem:[%s818_s25] sm:$0x1]  ;;  %s7713_s25 = sld [smem:[#allocation44_spill]] }
 0x728   : > { %v3649_v18 = vmax.f32 %v3647_v38, %v3648_v37 }
 0x729   : > { %3644 = vmax.xlane.f32.xlu0 %v3643_v17 }
 0x72a   : > { %3650 = vmax.xlane.f32.xlu1 %v3649_v18 }
 0x72c   : > { %v4024_v30 = vld [vmem:[%s7713_s25] sm:$0xff]  ;;  %v4025_v17 = vld [vmem:[%s7713_s25 + $0x8] sm:$0xff] }
 0x7ae   : > { %v3633_v19 = vpop.xlane.xlu1 %3632 }
 0x7af   : > { %v3656_v24 = vmul.f32 %v3652_v43, %v3633_v19  ;;  %v3679_v26 = vmul.f32 %v3675_v46, %v3633_v19 }
 0x7b1   : > { %v3660_v22 = vsel %vm827_vm0, %v3656_v24, 0.0  ;;  %v3683_v27 = vsel %vm827_vm0, %v3679_v26, 0.0  ;;  %v3798_v24 = vld [vmem:[#allocation12 + $0x18] sm:$0xff]  ;;  %v3799_v26 = vld [vmem:[#allocation12 + $0x20] sm:$0xff] }
 0x7b2   : > { %v3639_v14 = vpop.xlane.xlu0 %3638 }
 0x7b3   : > { %v3657_v54 = vmul.f32 %v3653_v20, %v3639_v14  ;;  %v3680_v56 = vmul.f32 %v3676_v53, %v3639_v14  ;;  %v3795_v20 = vld [vmem:[#allocation12] sm:$0xff]  ;;  %v3796_v53 = vld [vmem:[#allocation12 + $0x8] sm:$0xff]  ;;  %v3797_v14 = vld [vmem:[#allocation12 + $0x10] sm:$0xff] }
 0x7b5   : > { %v3661_v60 = vsel %vm827_vm0, %v3657_v54, 0.0  ;;  %v3684_v21 = vsel %vm827_vm0, %v3680_v56, 0.0  ;;  %v3800_v56 = vld [vmem:[#allocation12 + $0x28] sm:$0xff] }
 0x7b6   : > { %v3645_v47 = vpop.xlane.xlu0 %3644  ;;  %v3662_v34 = vadd.f32 %v3661_v60, %v3660_v22  ;;  %v3685_v39 = vadd.f32 %v3684_v21, %v3683_v27  ;;  %v3817_v60 = vld [vmem:[#allocation12 + $0x50] sm:$0xff]  ;;  %v3818_v21 = vld [vmem:[#allocation12 + $0x58] sm:$0xff]  ;;  %v3820_v27 = vld [vmem:[#allocation12 + $0x68] sm:$0xff] }
 0x7b7   : > { %v3658_v28 = vmul.f32 %v3654_v57, %v3645_v47  ;;  %v3681_v32 = vmul.f32 %v3677_v58, %v3645_v47  ;;  %v3651_v33 = vpop.xlane.xlu1 %3650  ;;  %v3815_v57 = vld [vmem:[#allocation12 + $0x40] sm:$0xff]  ;;  %v3816_v58 = vld [vmem:[#allocation12 + $0x48] sm:$0xff] }
 0x7b8   : > { %v3659_v40 = vmul.f32 %v3655_v31, %v3651_v33  ;;  %v3682_v41 = vmul.f32 %v3678_v44, %v3651_v33  ;;  %v3819_v31 = vld [vmem:[#allocation12 + $0x60] sm:$0xff]  ;;  %v3801_v33 = vld [vmem:[#allocation12 + $0x30] sm:$0xff] }
 0x7b9   : > { %v3663_v42 = vsel %vm827_vm0, %v3658_v28, 0.0  ;;  %v3686_v45 = vsel %vm827_vm0, %v3681_v32, 0.0  ;;  %v3821_v28 = vld [vmem:[#allocation12 + $0x70] sm:$0xff]  ;;  %v3822_v32 = vld [vmem:[#allocation12 + $0x78] sm:$0xff] }
 0x7ba   : > { %v3664_v48 = vadd.f32 %v3663_v42, %v3662_v34  ;;  %v3687_v49 = vadd.f32 %v3686_v45, %v3685_v39  ;;  %v3665_v50 = vsel %vm827_vm0, %v3659_v40, 0.0  ;;  %v3688_v51 = vsel %vm827_vm0, %v3682_v41, 0.0  ;;  %v3802_v34 = vld [vmem:[#allocation12 + $0x38] sm:$0xff] }
 0x7bc   : > { %v3666_v52 = vadd.f32 %v3665_v50, %v3664_v48  ;;  %v3689_v55 = vadd.f32 %v3688_v51, %v3687_v49 }
 0x7be   : > { %v3667_v59 = vrot.slane %v3666_v52, 4  ;;  %v3690_v61 = vrot.slane %v3689_v55, 4 }
 0x7c0   : > { %v3668_v62 = vadd.f32 %v3667_v59, %v3666_v52  ;;  %v3691_v63 = vadd.f32 %v3690_v61, %v3689_v55  ;;  %v3845_v61 = vld [vmem:[#allocation12 + $0x80] sm:$0xff] }
 0x7c2   : > { %v3669_v1 = vrot.slane %v3668_v62, 2  ;;  %v3692_v2 = vrot.slane %v3691_v63, 2 }
 0x7c4   : > { %v3670_v3 = vadd.f32 %v3669_v1, %v3668_v62  ;;  %v3693_v4 = vadd.f32 %v3692_v2, %v3691_v63 }
 0x7c6   : > { %v3671_v5 = vrot.slane %v3670_v3, 1  ;;  %v3694_v6 = vrot.slane %v3693_v4, 1 }
 0x7c8   : > { %v3672_v9 = vadd.f32 %v3671_v5, %v3670_v3  ;;  %v3695_v10 = vadd.f32 %v3694_v6, %v3693_v4  ;;  %v3846_v3 = vld [vmem:[#allocation12 + $0x88] sm:$0xff]  ;;  %v3847_v4 = vld [vmem:[#allocation12 + $0x90] sm:$0xff]  ;;  %v3848_v5 = vld [vmem:[#allocation12 + $0x98] sm:$0xff] }
 0x7ca   : > { %v3674_v11 = vadd.f32 %v3673_v7, %v3672_v9  ;;  %v3697_v12 = vadd.f32 %v3696_v8, %v3695_v10  ;;  %v3849_v10 = vld [vmem:[#allocation12 + $0xa0] sm:$0xff] }
 0x7cc   : > { %v3699_v13 = vmul.f32 0.5, %v3697_v12  ;;  %4738 = vst.msk [vmem:[%s821_s1] sm:$0x1] %vm4736_vm3, %v3674_v11  ;;  %4739 = vst.msk [vmem:[%s7652_s11] sm:$0x1] %vm4736_vm3, %v3697_v12  ;;  %s7653_s1 = scalar_lea.vmem [#allocation15], %s7280_s22 }
 0x7cd   : > { %s6290_s11 = smov 125   ;;  %v3851_v12 = vld [vmem:[#allocation12 + $0xb0] sm:$0xff] }
 0x7ce   : > { %v3700_v16 = vmul.f32 1.442695, %v3699_v13 }
 0x7d0   : > { %5929 = vpow2.f32 %v3700_v16 }
 0x7da   : > { %v5930_v23 = vpop.eup %5929 }
 0x7db   : > { %v3702_v25 = vmul.f32 %v5930_v23, %v3698_v15  ;;  %v3852_v15 = vld [vmem:[#allocation12 + $0xb8] sm:$0xff] }
 0x7dd   : > { %v3703_v29 = vadd.f32 %v3702_v25, %v3674_v11  ;;  %v3850_v11 = vld [vmem:[#allocation12 + $0xa8] sm:$0xff] }
 0x7df   : > { %3853 = vrot.lane.b32.xlu1 %v3703_v29, %s6288_s2  ;;  %3823 = vrot.lane.b32.xlu0 %v3703_v29, %s6289_s24  ;;  %5451 = vpush %v3703_v29 }
 0x7e0   : > { %4737 = vst.msk [vmem:[%s7653_s1] sm:$0x1] %vm4736_vm3, %v3703_v29  ;;  %5181 = vmatmul.mubr.msk.f32.vlgmr.msra.gmra.mrb[24].mxu0 %vm827_vm0, %v3703_v29 }
 0x7e1   : > { %4312 = vmatprep.mubr.f32.mxu0 %v6279_v0 }
 0x7e3   : > { %3883 = vrot.lane.b32.xlu1 %v3703_v29, %s6290_s11  ;;  %3913 = vrot.lane.b32.xlu0 %v3703_v29, %s6286_s5 }
 0x7e7   : > { %3943 = vrot.lane.b32.xlu1 %v3703_v29, %s6291_s30  ;;  %3973 = vrot.lane.b32.xlu0 %v3703_v29, %s6282_s15 }
 0x7eb   : > { %4003 = vrot.lane.b32.xlu1 %v3703_v29, %s6281_s29  ;;  %4028 = vperm.xlu0 %5665, %v4024_v30  }
 0x7ef   : > { %4033 = vperm.xlu1 %5666, %v4025_v17  }
 0x810   : > { %s5452_s5 = spop %5451 }
 0x811   : > { %v3804_v54 = vstv %s5452_s5 }
 0x812   : > { %v3806_v44 = vmul.f32 %v3804_v54, %v3795_v20  ;;  %v3807_v47 = vmul.f32 %v3804_v54, %v3796_v53  ;;  %v3808_v22 = vmul.f32 %v3804_v54, %v3797_v14  ;;  %v3809_v39 = vmul.f32 %v3804_v54, %v3798_v24  ;;  %v3878_v53 = vld [vmem:[#allocation12 + $0xd8] sm:$0xff]  ;;  %v3879_v14 = vld [vmem:[#allocation12 + $0xe0] sm:$0xff]  ;;  %v3880_v24 = vld [vmem:[#allocation12 + $0xe8] sm:$0xff] }
 0x813   : > { %v3810_v40 = vmul.f32 %v3804_v54, %v3799_v26  ;;  %v3811_v41 = vmul.f32 %v3804_v54, %v3800_v56  ;;  %v3812_v62 = vmul.f32 %v3804_v54, %v3801_v33  ;;  %v3813_v63 = vmul.f32 %v3804_v54, %v3802_v34 }
 0x851   : > { %v3854_v37 = vpop.permute.xlu1 %3853  ;;  %v3824_v38 = vpop.permute.xlu0 %3823 }
 0x852   : > { %5453 = vpush %v3824_v38  ;;  %v3876_v38 = vld [vmem:[#allocation12 + $0xc8] sm:$0xff] }
 0x853   : > { %5455 = vpush %v3854_v37  ;;  %v3875_v37 = vld [vmem:[#allocation12 + $0xc0] sm:$0xff] }
 0x855   : > { %v3884_v18 = vpop.permute.xlu1 %3883  ;;  %v3914_v36 = vpop.permute.xlu0 %3913 }
 0x856   : > { %5457 = vpush %v3884_v18  ;;  %v3877_v18 = vld [vmem:[#allocation12 + $0xd0] sm:$0xff] }
 0x857   : > { %5459 = vpush %v3914_v36 }
 0x859   : > { %v3944_v43 = vpop.permute.xlu1 %3943  ;;  %v3974_v46 = vpop.permute.xlu0 %3973 }
 0x85a   : > { %5461 = vpush %v3944_v43 }
 0x85b   : > { %5463 = vpush %v3974_v46 }
 0x85d   : > { %v4004_v19 = vpop.permute.xlu1 %4003 }
 0x85e   : > { %5465 = vpush %v4004_v19 }
 0x883   : > { %s5454_s11 = spop %5453 }
 0x884   : > { %v3826_v42 = vstv %s5454_s11  ;;  %s5456_s30 = spop %5455  ;;  %s7478_s11 = sshll.u32 %s6432_s4, 4 }
 0x885   : > { %v3828_v45 = vmul.f32 %v3826_v42, %v3815_v57  ;;  %v3829_v48 = vmul.f32 %v3826_v42, %v3816_v58  ;;  %v3830_v49 = vmul.f32 %v3826_v42, %v3817_v60  ;;  %v3831_v50 = vmul.f32 %v3826_v42, %v3818_v21  ;;  %v3881_v58 = vld [vmem:[#allocation12 + $0xf0] sm:$0xff]  ;;  %v3882_v60 = vld [vmem:[#allocation12 + $0xf8] sm:$0xff]  ;;  %v3905_v21 = vld [vmem:[#allocation12 + $0x100] sm:$0xff] }
 0x886   : > { %v3832_v51 = vmul.f32 %v3826_v42, %v3819_v31  ;;  %v3833_v52 = vmul.f32 %v3826_v42, %v3820_v27  ;;  %v3834_v55 = vmul.f32 %v3826_v42, %v3821_v28  ;;  %v3835_v59 = vmul.f32 %v3826_v42, %v3822_v32  ;;  %v3906_v27 = vld [vmem:[#allocation12 + $0x108] sm:$0xff]  ;;  %v3907_v28 = vld [vmem:[#allocation12 + $0x110] sm:$0xff]  ;;  %v3909_v32 = vld [vmem:[#allocation12 + $0x120] sm:$0xff] }
 0x887   : > { %v3836_v1 = vadd.f32 %v3828_v45, %v3806_v44  ;;  %v3837_v2 = vadd.f32 %v3829_v48, %v3807_v47  ;;  %s5458_s26 = spop %5457  ;;  %v3838_v6 = vadd.f32 %v3830_v49, %v3808_v22  ;;  %v3839_v7 = vadd.f32 %v3831_v50, %v3809_v39  ;;  %v3911_v42 = vld [vmem:[#allocation12 + $0x130] sm:$0xff]  ;;  %v3912_v45 = vld [vmem:[#allocation12 + $0x138] sm:$0xff] }
 0x888   : > { %v3840_v8 = vadd.f32 %v3832_v51, %v3810_v40  ;;  %v3841_v9 = vadd.f32 %v3833_v52, %v3811_v41  ;;  %s5460_s6 = spop %5459  ;;  %v3842_v13 = vadd.f32 %v3834_v55, %v3812_v62  ;;  %v3843_v16 = vadd.f32 %v3835_v59, %v3813_v63  ;;  %v3910_v41 = vld [vmem:[#allocation12 + $0x128] sm:$0xff] }
 0x889   : > { %v3856_v23 = vstv %s5456_s30  ;;  %v3886_v25 = vstv %s5458_s26  ;;  %v7310_v36 = vstv %s5460_s6  ;;  %v3936_v62 = vld [vmem:[#allocation12 + $0x148] sm:$0xff]  ;;  %s7714_s30 = sld [smem:[#allocation45_spill]]  ;;  %s7717_s6 = sld [smem:[#allocation47_spill]] }
 0x88a   : > { %v3858_v29 = vmul.f32 %v3856_v23, %v3845_v61  ;;  %v3859_v30 = vmul.f32 %v3856_v23, %v3846_v3  ;;  %v3860_v17 = vmul.f32 %v3856_v23, %v3847_v4  ;;  %v3861_v43 = vmul.f32 %v3856_v23, %v3848_v5  ;;  %v3966_v63 = vld [vmem:[#allocation12 + $0x188] sm:$0xff] }
 0x88b   : > { %v3862_v46 = vmul.f32 %v3856_v23, %v3849_v10  ;;  %v3863_v19 = vmul.f32 %v3856_v23, %v3850_v11  ;;  %v3864_v20 = vmul.f32 %v3856_v23, %v3851_v12  ;;  %v3865_v26 = vmul.f32 %v3856_v23, %v3852_v15  ;;  %s7314_s2 = spop %5461 }
 0x88c   : > { %v3866_v54 = vadd.f32 %v3858_v29, %v3836_v1  ;;  %v3867_v56 = vadd.f32 %v3859_v30, %v3837_v2  ;;  %v7312_v57 = vadd.f32 %v3860_v17, %v3838_v6  ;;  %v7316_v31 = vadd.f32 %v3861_v43, %v3839_v7  ;;  %s5464_s24 = spop %5463  ;;  %v3996_v1 = vld [vmem:[#allocation12 + $0x1c8] sm:$0xff]  ;;  %v3935_v6 = vld [vmem:[#allocation12 + $0x140] sm:$0xff]  ;;  %v3937_v17 = vld [vmem:[#allocation12 + $0x150] sm:$0xff] }
 0x88d   : > { %v3870_v44 = vadd.f32 %v3862_v46, %v3840_v8  ;;  %v7318_v47 = vadd.f32 %v3863_v19, %v3841_v9  ;;  %v7320_v22 = vadd.f32 %v3864_v20, %v3842_v13  ;;  %v7322_v33 = vadd.f32 %v3865_v26, %v3843_v16  ;;  %v3965_v7 = vld [vmem:[#allocation12 + $0x180] sm:$0xff]  ;;  %v3967_v46 = vld [vmem:[#allocation12 + $0x190] sm:$0xff] }
 0x88e   : > { %v3888_v34 = vmul.f32 %v3886_v25, %v3875_v37  ;;  %v3889_v39 = vmul.f32 %v3886_v25, %v3876_v38  ;;  %v3890_v40 = vmul.f32 %v3886_v25, %v3877_v18  ;;  %v7324_v48 = vmul.f32 %v3886_v25, %v3878_v53  ;;  %v3995_v8 = vld [vmem:[#allocation12 + $0x1c0] sm:$0xff]  ;;  %v3997_v19 = vld [vmem:[#allocation12 + $0x1d0] sm:$0xff] }
 0x88f   : > { %v3892_v49 = vmul.f32 %v3886_v25, %v3879_v14  ;;  %v7326_v50 = vmul.f32 %v3886_v25, %v3880_v24  ;;  %v3894_v51 = vmul.f32 %v3886_v25, %v3881_v58  ;;  %s5466_s5 = spop %5465  ;;  %v7328_v52 = vmul.f32 %v3886_v25, %v3882_v60  ;;  %v3939_v13 = vld [vmem:[#allocation12 + $0x160] sm:$0xff]  ;;  %v3941_v26 = vld [vmem:[#allocation12 + $0x170] sm:$0xff]  ;;  %s7715_s26 = smov %s7714_s30 }
 0x890   : > { %v3918_v55 = vmul.f32 %v7310_v36, %v3905_v21  ;;  %v3919_v59 = vmul.f32 %v7310_v36, %v3906_v27  ;;  %v3920_v61 = vmul.f32 %v7310_v36, %v3907_v28  ;;  %v3922_v2 = vmul.f32 %v7310_v36, %v3909_v32  ;;  %v3969_v16 = vld [vmem:[#allocation12 + $0x1a0] sm:$0xff]  ;;  %v3971_v21 = vld [vmem:[#allocation12 + $0x1b0] sm:$0xff] }
 0x891   : > { %v3923_v3 = vmul.f32 %v7310_v36, %v3910_v41  ;;  %v3924_v4 = vmul.f32 %v7310_v36, %v3911_v42  ;;  %v7337_v5 = vmul.f32 %v7310_v36, %v3912_v45  ;;  %v7340_v9 = vstv %s7314_s2  ;;  %v3999_v30 = vld [vmem:[#allocation12 + $0x1e0] sm:$0xff]  ;;  %v4001_v27 = vld [vmem:[#allocation12 + $0x1f0] sm:$0xff] }
 0x892   : > { %v7342_v10 = vstv %s5464_s24  ;;  %v7344_v11 = vstv %s5466_s5  ;;  %v3897_v12 = vadd.f32 %v3889_v39, %v3867_v56  ;;  %v3949_v15 = vmul.f32 %v7340_v9, %v3936_v62  ;;  %s7716_s24 = sld [smem:[#allocation30_spill]]  ;;  %s7654_s5 = scalar_lea.vmem [#allocation18], %s7280_s22 }
 0x893   : > { %v3979_v23 = vmul.f32 %v7342_v10, %v3966_v63  ;;  %v4009_v25 = vmul.f32 %v7344_v11, %v3996_v1  ;;  %v3896_v29 = vadd.f32 %v3888_v34, %v3866_v54  ;;  %v3948_v38 = vmul.f32 %v7340_v9, %v3935_v6 }
 0x894   : > { %v3927_v37 = vadd.f32 %v3919_v59, %v3897_v12  ;;  %v3978_v18 = vmul.f32 %v7342_v10, %v3965_v7  ;;  %v4008_v43 = vmul.f32 %v7344_v11, %v3995_v8  ;;  %v3900_v53 = vadd.f32 %v3892_v49, %v3870_v44  ;;  %v3940_v49 = vld [vmem:[#allocation12 + $0x168] sm:$0xff] }
 0x895   : > { %v3926_v20 = vadd.f32 %v3918_v55, %v3896_v29  ;;  %v3952_v14 = vmul.f32 %v7340_v9, %v3939_v13  ;;  %v3982_v24 = vmul.f32 %v7342_v10, %v3969_v16  ;;  %v4012_v54 = vmul.f32 %v7344_v11, %v3999_v30  ;;  %v3970_v55 = vld [vmem:[#allocation12 + $0x1a8] sm:$0xff] }
 0x896   : > { %v3957_v56 = vadd.f32 %v3949_v15, %v3927_v37  ;;  %v3898_v58 = vadd.f32 %v3890_v40, %v7312_v57  ;;  %v3950_v60 = vmul.f32 %v7340_v9, %v3937_v17  ;;  %v3930_v32 = vadd.f32 %v3922_v2, %v3900_v53  ;;  %v4000_v7 = vld [vmem:[#allocation12 + $0x1e8] sm:$0xff] }
 0x897   : > { %v3956_v28 = vadd.f32 %v3948_v38, %v3926_v20  ;;  %v3980_v34 = vmul.f32 %v7342_v10, %v3967_v46  ;;  %v4010_v44 = vmul.f32 %v7344_v11, %v3997_v19  ;;  %v3902_v42 = vadd.f32 %v3894_v51, %v7320_v22  ;;  %v3942_v46 = vld [vmem:[#allocation12 + $0x178] sm:$0xff] }
 0x898   : > { %v3987_v39 = vadd.f32 %v3979_v23, %v3957_v56  ;;  %v3928_v41 = vadd.f32 %v3920_v61, %v3898_v58  ;;  %v3954_v45 = vmul.f32 %v7340_v9, %v3941_v26  ;;  %v3960_v57 = vadd.f32 %v3952_v14, %v3930_v32  ;;  %v7365_v61 = vpop.permute.xlu0 %4028  ;;  %v3908_v19 = vld [vmem:[#allocation12 + $0x118] sm:$0xff]  ;;  %p7720_p1 = scmp.ne.s32.totalorder %s7716_s24, 0 }
 0x899   : > { %v3986_v59 = vadd.f32 %v3978_v18, %v3956_v28  ;;  %v3984_v40 = vmul.f32 %v7342_v10, %v3971_v21  ;;  %v4014_v62 = vmul.f32 %v7344_v11, %v4001_v27  ;;  %v3932_v2 = vadd.f32 %v3924_v4, %v3902_v42  ;;  %v4002_v56 = vld [vmem:[#allocation12 + $0x1f8] sm:$0xff] }
 0x89a   : > { %v4017_v63 = vadd.f32 %v4009_v25, %v3987_v39  ;;  %v3958_v1 = vadd.f32 %v3950_v60, %v3928_v41  ;;  %v3901_v6 = vadd.f32 %v7326_v50, %v7318_v47  ;;  %v3990_v51 = vadd.f32 %v3982_v24, %v3960_v57  ;;  %v4034_v50 = vpop.permute.xlu1 %4033  ;;  %v3972_v24 = vld [vmem:[#allocation12 + $0x1b8] sm:$0xff] }
 0x89b   : > { %v4016_v22 = vadd.f32 %v4008_v43, %v3986_v59  ;;  %v3953_v8 = vmul.f32 %v7340_v9, %v3940_v49  ;;  %v3983_v12 = vmul.f32 %v7342_v10, %v3970_v55  ;;  %v3962_v15 = vadd.f32 %v3954_v45, %v3932_v2  ;;  %v3938_v21 = vld [vmem:[#allocation12 + $0x158] sm:$0xff] }
 0x89c   : > { %v4037_v13 = vadd.f32 %v7365_v61, %v4017_v63  ;;  %v3988_v16 = vadd.f32 %v3980_v34, %v3958_v1  ;;  %v3931_v23 = vadd.f32 %v3923_v3, %v3901_v6  ;;  %v4020_v4 = vadd.f32 %v4012_v54, %v3990_v51  ;;  %v3968_v55 = vld [vmem:[#allocation12 + $0x198] sm:$0xff] }
 0x89d   : > { %v4036_v25 = vadd.f32 %v7365_v61, %v4016_v22  ;;  %v4013_v29 = vmul.f32 %v7344_v11, %v4000_v7  ;;  %v3903_v47 = vadd.f32 %v7328_v52, %v7322_v33  ;;  %v3992_v37 = vadd.f32 %v3984_v40, %v3962_v15  ;;  %v3998_v59 = vld [vmem:[#allocation12 + $0x1d8] sm:$0xff] }
 0x89e   : > { %vm4045_vm7 = vcmp.gt.f32.partialorder %v4037_v13, 0.0  ;;  %v4053_v30 = vmul.f32 0.01, %v4037_v13  ;;  %v4018_v17 = vadd.f32 %v4010_v44, %v3988_v16  ;;  %v4040_v18 = vadd.f32 %v4034_v50, %v4020_v4 }
 0x89f   : > { %vm4044_vm8 = vcmp.gt.f32.partialorder %v4036_v25, 0.0  ;;  %v4052_v38 = vmul.f32 0.01, %v4036_v25  ;;  %v3961_v43 = vadd.f32 %v3953_v8, %v3931_v23  ;;  %v4022_v53 = vadd.f32 %v4014_v62, %v3992_v37 }
 0x8a0   : > { %v4061_v3 = vsel %vm4045_vm7, %v4037_v13, %v4053_v30  ;;  %v4038_v20 = vadd.f32 %v7365_v61, %v4018_v17  ;;  %v3933_v14 = vadd.f32 %v7337_v5, %v3903_v47  ;;  %vm4048_vm6 = vcmp.gt.f32.partialorder %v4040_v18, 0.0 }
 0x8a1   : > { %4078 = vrot.lane.b32.xlu1 %v4061_v3, %s6280_s27  ;;  %v4060_v33 = vsel %vm4044_vm8, %v4036_v25, %v4052_v38  ;;  %v4056_v52 = vmul.f32 0.01, %v4040_v18  ;;  %v3991_v26 = vadd.f32 %v3983_v12, %v3961_v43  ;;  %v4042_v58 = vadd.f32 %v4034_v50, %v4022_v53 }
 0x8a2   : > { %4076 = vrot.lane.b32.xlu0 %v4060_v33, %s6280_s27  ;;  %vm4046_vm9 = vcmp.gt.f32.partialorder %v4038_v20, 0.0  ;;  %v4054_v54 = vmul.f32 0.01, %v4038_v20  ;;  %v3955_v60 = vmul.f32 %v7340_v9, %v3942_v46  ;;  %v3921_v27 = vmul.f32 %v7310_v36, %v3908_v19 }
 0x8a3   : > { %v4064_v28 = vsel %vm4048_vm6, %v4040_v18, %v4056_v52  ;;  %v4021_v5 = vadd.f32 %v4013_v29, %v3991_v26  ;;  %v3985_v32 = vmul.f32 %v7342_v10, %v3972_v24  ;;  %v4058_v44 = vmul.f32 0.01, %v4042_v58  ;;  %v4716_v52 = vld [vmem:[%s7714_s30] sm:$0xff]  ;;  %v4717_v26 = vld [vmem:[%s7715_s26 + $0x8] sm:$0xf]  ;;  %s6293_s30 = smov [#allocation16]  }
 0x8a4   : > { %v4062_v34 = vsel %vm4046_vm9, %v4038_v20, %v4054_v54  ;;  %v3963_v39 = vadd.f32 %v3955_v60, %v3933_v14  ;;  %v4015_v41 = vmul.f32 %v7344_v11, %v4002_v56  ;;  %vm4050_vm12 = vcmp.gt.f32.partialorder %v4042_v58, 0.0  ;;  %v5931_v56 = vld [vmem:[%s6671_s0 + $0x18] sm:$0xff]  ;;  %s7484_s0 = scalar_lea.hbm %s7717_s6, %s7478_s11 }
 0x8a5   : > { %4084 = vrot.lane.b32.xlu1 %v4064_v28, %s6280_s27  ;;  %v4041_v42 = vadd.f32 %v4034_v50, %v4021_v5  ;;  %v3899_v45 = vadd.f32 %v7324_v48, %v7316_v31  ;;  %v3951_v49 = vmul.f32 %v7340_v9, %v3938_v21  ;;  %v4066_v62 = vsel %vm4050_vm12, %v4042_v58, %v4058_v44 }
 0x8a6   : > { %4080 = vrot.lane.b32.xlu0 %v4062_v34, %s6280_s27  ;;  %v3993_v36 = vadd.f32 %v3985_v32, %v3963_v39  ;;  %v3981_v6 = vmul.f32 %v7342_v10, %v3968_v55  ;;  %v4011_v31 = vmul.f32 %v7344_v11, %v3998_v59  ;;  %v6292_v11 = vmov 16  }
 0x8a7   : > { %vm4049_vm13 = vcmp.gt.f32.partialorder %v4041_v42, 0.0  ;;  %v4057_v57 = vmul.f32 0.01, %v4041_v42  ;;  %v3929_v40 = vadd.f32 %v3921_v27, %v3899_v45  ;;  %5927 = vset.pattern.permute.xlu0 %v6292_v11 }
 0x8a8   : > { %v4023_v63 = vadd.f32 %v4015_v41, %v3993_v36 }
 0x8a9   : > { %4088 = vrot.lane.b32.xlu1 %v4066_v62, %s6280_s27  ;;  %v4065_v1 = vsel %vm4049_vm13, %v4041_v42, %v4057_v57  ;;  %v3959_v2 = vadd.f32 %v3951_v49, %v3929_v40 }
 0x8aa   : > { %4086 = vrot.lane.b32.xlu0 %v4065_v1, %s6280_s27  ;;  %v4043_v48 = vadd.f32 %v4034_v50, %v4023_v63 }
 0x8ab   : > { %v3989_v9 = vadd.f32 %v3981_v6, %v3959_v2 }
 0x8ac   : > { %vm4051_vm15 = vcmp.gt.f32.partialorder %v4043_v48, 0.0  ;;  %v4059_v7 = vmul.f32 0.01, %v4043_v48 }
 0x8ad   : > { %v4019_v22 = vadd.f32 %v4011_v31, %v3989_v9 }
 0x8ae   : > { %v4067_v51 = vsel %vm4051_vm15, %v4043_v48, %v4059_v7 }
 0x8af   : > { %4090 = vrot.lane.b32.xlu1 %v4067_v51, %s6280_s27  ;;  %v4039_v8 = vadd.f32 %v7365_v61, %v4019_v22 }
 0x8b1   : > { %vm4047_vm2 = vcmp.gt.f32.partialorder %v4039_v8, 0.0  ;;  %v4055_v12 = vmul.f32 0.01, %v4039_v8 }
 0x8b3   : > { %v4063_v13 = vsel %vm4047_vm2, %v4039_v8, %v4055_v12  ;;  %v7393_v16 = vpop.f32.mrb[24].mxu0  ;;  %v4125_v8 = vld [vmem:[#allocation14 + $0x10] sm:$0xff] }
 0x8b4   : > { %4082 = vrot.lane.b32.xlu0 %v4063_v13, %s6280_s27  ;;  %v5182_v10 = vpop.f32.mrb[25].mxu0  ;;  %s4758_s27 = sand.u32 1, %s6432_s4  }
 0x8b5   : > { %s7496_s4 = scalar_lea.sflag [#allocation17], %s4758_s27 }
 0x913   : > { %v4079_v15 = vpop.permute.xlu1 %4078 }
 0x914   : > { %v4077_v23 = vpop.permute.xlu0 %4076 }
 0x915   : > { %v4092_v25 = vsel %vm827_vm0, %v4077_v23, %v4079_v15  ;;  %4106 = vst.msk [vmem:[#allocation2] sm:$0xff] %vm878_vm1, %v4077_v23 }
 0x917   : > { %v4085_v4 = vpop.permute.xlu1 %4084 }
 0x918   : > { %4110 = vst.msk [vmem:[#allocation2 + $0x20] sm:$0xff] %vm878_vm1, %v4085_v4  ;;  %v4081_v61 = vpop.permute.xlu0 %4080 }
 0x919   : > { %v4093_v29 = vsel %vm827_vm0, %v4079_v15, %v4081_v61 }
 0x91a   : > { %v5867_v47 = vpack.i.bf16 %v4093_v29, %v4092_v25 }
 0x91b   : > { %v4089_v50 = vpop.permute.xlu1 %4088 }
 0x91c   : > { %v4087_v30 = vpop.permute.xlu0 %4086  ;;  %5868 = vrot.lane.b32.xlu0 %v5867_v47, %s6281_s29  ;;  %v4114_v14 = vld [vmem:[#allocation2] sm:$0xff] }
 0x91d   : > { %v4095_v17 = vsel %vm827_vm0, %v4085_v4, %v4087_v30  ;;  %v4096_v37 = vsel %vm827_vm0, %v4087_v30, %v4089_v50 }
 0x91e   : > { %4111 = vst [vmem:[#allocation2 + $0x28] sm:$0xff] %v4095_v17  ;;  %4112 = vst [vmem:[#allocation2 + $0x30] sm:$0xff] %v4096_v37  ;;  %v5872_v38 = vpack.i.bf16 %v4096_v37, %v4095_v17 }
 0x91f   : > { %v4118_v3 = vld [vmem:[#allocation2 + $0x20] sm:$0xff] }
 0x920   : > { %5873 = vrot.lane.b32.xlu1 %v5872_v38, %s6281_s29 }
 0x921   : > { %v4091_v18 = vpop.permute.xlu1 %4090 }
 0x922   : > { %v4097_v43 = vsel %vm827_vm0, %v4089_v50, %v4091_v18 }
 0x923   : > { %4113 = vst.msk [vmem:[#allocation2 + $0x38] sm:$0xff] %vm882_vm4, %v4097_v43 }
 0x926   : > { %v4083_v46 = vpop.permute.xlu0 %4082 }
 0x927   : > { %v4094_v19 = vsel %vm827_vm0, %v4081_v61, %v4083_v46  ;;  %vm4740_vm0 = vcmask 16384  }
 0x928   : > { %4109 = vst.msk [vmem:[#allocation2 + $0x18] sm:$0xff] %vm882_vm4, %v4094_v19 }
 0x92a   : > { %v4121_v20 = vld [vmem:[#allocation2 + $0x38] sm:$0xff] }
 0x92b   : > { %v5882_v53 = vpack.i.bf16 %v4121_v20, %v4118_v3 }
 0x92d   : > { %5883 = vrot.lane.b32.xlu1 %v5882_v53, %s6281_s29 }
 0x92f   : > { %v4117_v24 = vld [vmem:[#allocation2 + $0x18] sm:$0xff] }
 0x930   : > { %v5877_v33 = vpack.i.bf16 %v4117_v24, %v4114_v14  ;;  %v4122_v14 = vld [vmem:[#allocation14] sm:$0xff] }
 0x931   : > { %5893 = vrot.lane.b32.xlu1 %v5872_v38, %s6282_s15 }
 0x932   : > { %5878 = vrot.lane.b32.xlu0 %v5877_v33, %s6281_s29  ;;  %s6132_s29 = sshll.u32 %s6293_s30, 4  ;;  %s6133_s29 = int_to_ptr.vmem [resolvable:$false] %s6132_s29 }
 0x935   : > { %5903 = vrot.lane.b32.xlu1 %v5882_v53, %s6282_s15 }
 0x936   : > { %5888 = vrot.lane.b32.xlu0 %v5867_v47, %s6282_s15 }
 0x939   : > { %5913 = vrot.lane.b32.xlu1 %v5872_v38, %s6283_s3 }
 0x93a   : > { %5898 = vrot.lane.b32.xlu0 %v5877_v33, %s6282_s15  ;;  %s7718_s15 = scalar_lea.vmem [#allocation16], %s7280_s22 }
 0x93d   : > { %5923 = vrot.lane.b32.xlu1 %v5882_v53, %s6283_s3 }
 0x93e   : > { %5908 = vrot.lane.b32.xlu0 %v5867_v47, %s6283_s3  ;;  %v4126_v47 = vld [vmem:[#allocation14 + $0x18] sm:$0xf] }
 0x941   : > { %4720 = vperm.xlu1 %5666, %v4716_v52  }
 0x942   : > { %5918 = vrot.lane.b32.xlu0 %v5877_v33, %s6283_s3  ;;  %s4796_s3 = sshll.u32 %s7718_s15, 4  ;;  %s6134_s15 = scalar_lea.vmem %s6133_s29, 32  ;;  %s7488_s3 = int_to_ptr.vmem [resolvable:$true] %s4796_s3 }
 0x943   : > { %s6128_s8 = scalar_lea.vmem %s7488_s3, 16  ;;  %p6135_p5 = scmp.lt.s32.totalorder %s7488_s3, %s6133_s29 }
 0x944   : > { %p6129_p13 = scmp.ne.s32.totalorder %s7488_s3, %s6128_s8  ;;  %p6136_p0 = scmp.lt.s32.totalorder %s6134_s15, %s6128_s8 }
 0x945   : > { %4725 = vperm.xlu1 %5666, %v4717_v26  }
 0x946   : > { %3707 = vperm.xlu0 %5927, %v5931_v56   ;;  %p6130_p6 = pnand %p6129_p13, %p7720_p1  ;;  %p6137_p10 = por %p6136_p0, %p6135_p5 }
 0x948   : > { %p6131_p9 = pneg %p6130_p6 }
 0x94a   : > { %5928 = vset.pattern.permute.xlu0 %v6284_v35  ;;  %p6138_p2 = pnand %p6137_p10, %p6131_p9 }
 0x98e   : > { %v5869_v54 = vpop.permute.xlu0 %5868 }
 0x98f   : > { %v5871_v58 = vunpack.i.h.bf16 %v5869_v54  ;;  %v5870_v60 = vunpack.i.l.bf16 %v5869_v54 }
 0x991   : > { %v4152_v5 = vsel %vm931_vm5, %v5870_v60, %v5871_v58 }
 0x992   : > { %v5874_v21 = vpop.permute.xlu1 %5873 }
 0x993   : > { %v5876_v27 = vunpack.i.h.bf16 %v5874_v21  ;;  %v5875_v28 = vunpack.i.l.bf16 %v5874_v21 }
 0x995   : > { %v4155_v32 = vsel %vm931_vm5, %v5875_v28, %v5876_v27 }
 0x996   : > { %v5315_v34 = vpack.c.bf16 %v4155_v32, %v4152_v5 }
 0x998   : > { %5316 = vmatprep.subr.bf16.mxu1 %v5315_v34  ;;  %v4516_v34 = vld [vmem:[#allocation14 + $0x20] sm:$0xff] }
 0x99f   : > { %v5884_v44 = vpop.permute.xlu1 %5883 }
 0x9a0   : > { %v5886_v39 = vunpack.i.h.bf16 %v5884_v44  ;;  %v5885_v41 = vunpack.i.l.bf16 %v5884_v44  ;;  %v4517_v44 = vld [vmem:[#allocation14 + $0x28] sm:$0xf] }
 0x9a2   : > { %v4154_v35 = vsel %vm931_vm5, %v5885_v41, %v5875_v28  ;;  %v4156_v55 = vsel %vm931_vm5, %v5876_v27, %v5886_v39 }
 0x9a3   : > { %v5894_v42 = vpop.permute.xlu1 %5893 }
 0x9a4   : > { %v5879_v45 = vpop.permute.xlu0 %5878  ;;  %v5896_v49 = vunpack.i.h.bf16 %v5894_v42  ;;  %v5895_v36 = vunpack.i.l.bf16 %v5894_v42  ;;  %v3705_v42 = vld [vmem:[%s7612_s12 + $0x8] sm:$0x1] }
 0x9a5   : > { %v5881_v59 = vunpack.i.h.bf16 %v5879_v45  ;;  %v5880_v57 = vunpack.i.l.bf16 %v5879_v45 }
 0x9a6   : > { %v4345_v48 = vsel %vm1158_vm10, %v5895_v36, %v5896_v49 }
 0x9a7   : > { %v5319_v40 = vpack.c.bf16 %v5886_v39, %v5881_v59  ;;  %v4151_v62 = vsel %vm931_vm5, %v5880_v57, %v5870_v60  ;;  %v4153_v63 = vsel %vm931_vm5, %v5871_v58, %v5881_v59  ;;  %v5904_v1 = vpop.permute.xlu1 %5903  ;;  %v4123_v60 = vld [vmem:[#allocation14 + $0x8] sm:$0xf]  ;;  %v3784_v39 = vld [vmem:[%s7612_s12 + $0x9] sm:$0x1] }
 0x9a8   : > { %v5317_v2 = vpack.c.bf16 %v4154_v35, %v4151_v62  ;;  %v5321_v6 = vpack.c.bf16 %v4156_v55, %v4153_v63  ;;  %v5889_v31 = vpop.permute.xlu0 %5888  ;;  %v5906_v22 = vunpack.i.h.bf16 %v5904_v1  ;;  %v5905_v51 = vunpack.i.l.bf16 %v5904_v1  ;;  %v3793_v55 = vld [vmem:[#allocation11] sm:$0x1] }
 0x9a9   : > { %v5891_v9 = vunpack.i.h.bf16 %v5889_v31  ;;  %v5890_v7 = vunpack.i.l.bf16 %v5889_v31  ;;  %5320 = vmatprep.subr.bf16.mxu0 %v5319_v40  ;;  %v3786_v41 = vrot.slane %v3784_v39, 2 }
 0x9aa   : > { %5318 = vmatpush1.bf16.msra.mxu1 %v5317_v2  ;;  %5322 = vmatpush1.bf16.msra.mxu0 %v5321_v6  ;;  %v4344_v25 = vsel %vm1158_vm10, %v5905_v51, %v5895_v36  ;;  %v4346_v4 = vsel %vm1158_vm10, %v5896_v49, %v5906_v22 }
 0x9ab   : > { %v4342_v12 = vsel %vm1158_vm10, %v5890_v7, %v5891_v9  ;;  %v5914_v13 = vpop.permute.xlu1 %5913 }
 0x9ac   : > { %v5899_v10 = vpop.permute.xlu0 %5898  ;;  %v5323_v11 = vpack.c.bf16 %v4345_v48, %v4342_v12  ;;  %v5916_v15 = vunpack.i.h.bf16 %v5914_v13  ;;  %v5915_v23 = vunpack.i.l.bf16 %v5914_v13 }
 0x9ad   : > { %v5901_v61 = vunpack.i.h.bf16 %v5899_v10  ;;  %v5900_v29 = vunpack.i.l.bf16 %v5899_v10  ;;  %5157 = vmatmul.mubr.msk.f32.vlgmr.msra.gmra.mrb[24].mxu1 %vm3629_vm14, %v4125_v8  ;;  %5159 = vmatmul.mubr.msk.f32.vlgmr.msra.gmra.mrb[26].mxu0 %vm3629_vm14, %v4125_v8 }
 0x9ae   : > { %5324 = vmatprep.subr.bf16.mxu1 %v5323_v11  ;;  %4241 = vmatprep.mubr.f32.mxu1 %v6279_v0  ;;  %v4538_v46 = vsel %vm1388_vm11, %v5915_v23, %v5916_v15 }
 0x9af   : > { %v5327_v50 = vpack.c.bf16 %v5906_v22, %v5901_v61  ;;  %v4341_v30 = vsel %vm1158_vm10, %v5900_v29, %v5890_v7  ;;  %v4343_v17 = vsel %vm1158_vm10, %v5891_v9, %v5901_v61  ;;  %4318 = vmatprep.mubr.f32.mxu0 %v6279_v0  ;;  %v5924_v37 = vpop.permute.xlu1 %5923 }
 0x9b0   : > { %v5325_v38 = vpack.c.bf16 %v4344_v25, %v4341_v30  ;;  %v5329_v18 = vpack.c.bf16 %v4346_v4, %v4343_v17  ;;  %v5909_v43 = vpop.permute.xlu0 %5908  ;;  %v5926_v20 = vunpack.i.h.bf16 %v5924_v37  ;;  %v5925_v53 = vunpack.i.l.bf16 %v5924_v37 }
 0x9b1   : > { %v5911_v19 = vunpack.i.h.bf16 %v5909_v43  ;;  %v5910_v3 = vunpack.i.l.bf16 %v5909_v43  ;;  %5158 = vmatmul.mubr.msk.f32.gmra.mrb[26].mxu1 %vm3629_vm14, %v4126_v47  ;;  %5160 = vmatmul.mubr.msk.f32.gmra.mrb[28].mxu0 %vm3629_vm14, %v4126_v47 }
 0x9b2   : > { %5328 = vmatprep.subr.bf16.mxu0 %v5327_v50  ;;  %5326 = vmatpush1.bf16.msra.mxu1 %v5325_v38  ;;  %v4537_v26 = vsel %vm1388_vm11, %v5925_v53, %v5915_v23  ;;  %v4539_v56 = vsel %vm1388_vm11, %v5916_v15, %v5926_v20 }
 0x9b3   : > { %5330 = vmatpush1.bf16.msra.mxu0 %v5329_v18  ;;  %4425 = vmatprep.mubr.f32.mxu1 %v6279_v0  ;;  %v4535_v24 = vsel %vm1388_vm11, %v5910_v3, %v5911_v19 }
 0x9b4   : > { %v5919_v33 = vpop.permute.xlu0 %5918  ;;  %4502 = vmatprep.mubr.f32.mxu0 %v6279_v0  ;;  %v5331_v52 = vpack.c.bf16 %v4538_v46, %v4535_v24 }
 0x9b5   : > { %v5921_v54 = vunpack.i.h.bf16 %v5919_v33  ;;  %v5920_v58 = vunpack.i.l.bf16 %v5919_v33  ;;  %5161 = vmatmul.mubr.msk.f32.vlgmr.msra.gmra.mrb[24].mxu1 %vm3629_vm14, %v4122_v14 }
 0x9b6   : > { %5163 = vmatmul.mubr.msk.f32.vlgmr.msra.gmra.mrb[26].mxu0 %vm3629_vm14, %v4122_v14  ;;  %5332 = vmatprep.subr.bf16.mxu1 %v5331_v52 }
 0x9b7   : > { %v5335_v21 = vpack.c.bf16 %v5926_v20, %v5921_v54  ;;  %v4534_v27 = vsel %vm1388_vm11, %v5920_v58, %v5910_v3  ;;  %v4536_v28 = vsel %vm1388_vm11, %v5911_v19, %v5921_v54  ;;  %4431 = vmatprep.mubr.f32.mxu1 %v6279_v0  ;;  %4508 = vmatprep.mubr.f32.mxu0 %v6279_v0 }
 0x9b8   : > { %v5333_v5 = vpack.c.bf16 %v4537_v26, %v4534_v27  ;;  %v5337_v32 = vpack.c.bf16 %v4539_v56, %v4536_v28 }
 0x9b9   : > { %5162 = vmatmul.mubr.msk.f32.gmra.mrb[26].mxu1 %vm3629_vm14, %v4123_v60  ;;  %5336 = vmatprep.subr.bf16.mxu0 %v5335_v21 }
 0x9ba   : > { %5164 = vmatmul.mubr.msk.f32.gmra.mrb[28].mxu0 %vm3629_vm14, %v4123_v60  ;;  %5334 = vmatpush1.bf16.msra.mxu1 %v5333_v5 }
 0x9bb   : > { %5338 = vmatpush1.bf16.msra.mxu0 %v5337_v32  ;;  %4618 = vmatprep.mubr.f32.mxu1 %v6279_v0 }
 0x9bc   : > { %4695 = vmatprep.mubr.f32.mxu0 %v6279_v0 }
 0x9bd   : > { %5165 = vmatmul.mubr.msk.f32.vlgmr.msra.gmra.mrb[24].mxu1 %vm3629_vm14, %v4516_v34 }
 0x9be   : > { %5167 = vmatmul.mubr.msk.f32.vlgmr.msra.gmra.mrb[26].mxu0 %vm3629_vm14, %v4516_v34  ;;  %4624 = vmatprep.mubr.f32.mxu1 %v6279_v0 }
 0x9bf   : > { %4701 = vmatprep.mubr.f32.mxu0 %v6279_v0 }
 0x9c1   : > { %5166 = vmatmul.mubr.msk.f32.gmra.mrb[26].mxu1 %vm3629_vm14, %v4517_v44 }
 0x9c2   : > { %5168 = vmatmul.mubr.msk.f32.gmra.mrb[28].mxu0 %vm3629_vm14, %v4517_v44 }
 0x9c5   : > { %v3708_v45 = vpop.permute.xlu0 %3707 }
 0x9c6   : > { %v3710_v49 = vmul.f32 %v3708_v45, %v3705_v42  ;;  %v3788_v0 = vmul.f32 %v3786_v41, %v3708_v45 }
 0x9c8   : > { %v3781_v36 = vadd.f32 %v7393_v16, %v3710_v49  ;;  %v3790_v35 = vrot.slane %v3788_v0, 6 }
 0x9ca   : > { %v3792_v59 = vadd.f32 %v3790_v35, %v3781_v36 }
 0x9cc   : > { %v3794_v57 = vadd.f32 %v3793_v55, %v3792_v59 }
 0x9ce   : > { %4741 = vst.msk [vmem:[%s7654_s5] sm:$0x1] %vm4740_vm0, %v3794_v57  ;;  %s7494_s5 = scalar_lea.hbm %s7719_s7, %s7478_s11 }
 0x9cf   : > { %6141 = shalt.err (!%p6138_p2)
}
 0x9d0   : > { %s6142_s1 = scalar_lea.hbm %s7484_s0, 16  ;;  %s6146_s30 = scalar_lea.hbm %s7717_s6, 32 }
 0x9d1   : > { %p6143_p3 = scmp.ne.s32.totalorder %s7484_s0, %s6142_s1  ;;  %p6147_p7 = scmp.lt.u32.totalorder %s7484_s0, %s7717_s6 }
 0x9d2   : > { %p6148_p8 = scmp.lt.u32.totalorder %s6146_s30, %s6142_s1  ;;  %p6150_p13 = scmp.lt.u32.totalorder %s6142_s1, %s7484_s0 }
 0x9d3   : > { %p6144_p4 = pnand %p6143_p3, %p7720_p1 }
 0x9d4   : > { %p6149_p11 = por %p6148_p8, %p6147_p7 }
 0x9d5   : > { %p6145_p12 = pneg %p6144_p4 }
 0x9d6   : > { %p6151_p6 = por %p6150_p13, %p6149_p11 }
 0x9d8   : > { %p6152_p9 = pnand %p6151_p6, %p6145_p12 }
 0x9da   : > { %6155 = shalt.err (!%p6152_p9)
}
 0x9db   : > { %5496 = dma.vmem_to_hbm [thread:$0]  (%p7720_p1), %s7488_s3, 16, %s7484_s0, %s7496_s4  }
 0x9dc   : > { %s7721_s8 = scalar_lea.vmem [#allocation15], %s7280_s22  ;;  %s7722_s2 = sld [smem:[#allocation49_spill]] }
 0x9dd   : > { %s4780_s9 = sshll.u32 %s7721_s8, 4  ;;  %s7723_s30 = scalar_lea.vmem [#allocation18], %s7280_s22  ;;  %s7528_s9 = int_to_ptr.vmem [resolvable:$true] %s4780_s9 }
 0x9de   : > { %s7532_s29 = sshll.u32 %s7723_s30, 4  ;;  %s4752_s6 = scalar_lea.sflag [#allocation5], %s7280_s22  ;;  %s4813_s29 = int_to_ptr.vmem [resolvable:$true] %s7532_s29 }
 0x9df   : > { %s6156_s10 = scalar_lea.vmem %s7528_s9, 16  ;;  %s6294_s0 = smov [#allocation15]  }
 0x9e0   : > { %p6157_p5 = scmp.ne.s32.totalorder %s7528_s9, %s6156_s10  ;;  %s6160_s3 = sshll.u32 %s6294_s0, 4  ;;  %s6161_s3 = int_to_ptr.vmem [resolvable:$false] %s6160_s3 }
 0x9e1   : > { %s6162_s8 = scalar_lea.vmem %s6161_s3, 32  ;;  %p6163_p2 = scmp.lt.s32.totalorder %s7528_s9, %s6161_s3 }
 0x9e2   : > { %s7526_s1 = scalar_lea.hbm %s7722_s2, %s7478_s11  ;;  %p6158_p0 = pnand %p6157_p5, %p7720_p1 }
 0x9e3   : > { %p6164_p3 = scmp.lt.s32.totalorder %s6162_s8, %s6156_s10 }
 0x9e4   : > { %p6159_p10 = pneg %p6158_p0 }
 0x9e5   : > { %p6165_p4 = por %p6164_p3, %p6163_p2 }
 0x9e7   : > { %p6166_p12 = pnand %p6165_p4, %p6159_p10 }
 0x9e9   : > { %6169 = shalt.err (!%p6166_p12)
}
 0x9ea   : > { %s6170_s22 = scalar_lea.hbm %s7494_s5, 16  ;;  %s6174_s27 = scalar_lea.hbm %s7719_s7, 32 }
 0x9eb   : > { %p6171_p7 = scmp.ne.s32.totalorder %s7494_s5, %s6170_s22  ;;  %p6175_p13 = scmp.lt.u32.totalorder %s7494_s5, %s7719_s7 }
 0x9ec   : > { %p6176_p6 = scmp.lt.u32.totalorder %s6174_s27, %s6170_s22  ;;  %p6178_p5 = scmp.lt.u32.totalorder %s6170_s22, %s7494_s5 }
 0x9ed   : > { %p6172_p8 = pnand %p6171_p7, %p7720_p1 }
 0x9ee   : > { %p6177_p9 = por %p6176_p6, %p6175_p13 }
 0x9ef   : > { %p6173_p11 = pneg %p6172_p8 }
 0x9f0   : > { %p6179_p0 = por %p6178_p5, %p6177_p9 }
 0x9f2   : > { %p6180_p10 = pnand %p6179_p0, %p6173_p11 }
 0x9f4   : > { %6183 = shalt.err (!%p6180_p10)
}
 0x9f5   : > { %5495 = dma.vmem_to_hbm [thread:$0]  (%p7720_p1), %s7528_s9, 16, %s7494_s5, %s4752_s6  }
 0x9f6   : > { %s6184_s10 = scalar_lea.vmem %s4813_s29, 16  ;;  %s6295_s3 = smov [#allocation18]  }
 0x9f7   : > { %p6185_p2 = scmp.ne.s32.totalorder %s4813_s29, %s6184_s10  ;;  %s6188_s8 = sshll.u32 %s6295_s3, 4  ;;  %s6189_s8 = int_to_ptr.vmem [resolvable:$false] %s6188_s8 }
 0x9f8   : > { %s6190_s22 = scalar_lea.vmem %s6189_s8, 32  ;;  %p6191_p12 = scmp.lt.s32.totalorder %s4813_s29, %s6189_s8 }
 0x9f9   : > { %p6186_p3 = pnand %p6185_p2, %p7720_p1  ;;  %p6192_p7 = scmp.lt.s32.totalorder %s6190_s22, %s6184_s10 }
 0x9fb   : > { %p6187_p4 = pneg %p6186_p3  ;;  %p6193_p8 = por %p6192_p7, %p6191_p12 }
 0x9fd   : > { %p6194_p11 = pnand %p6193_p8, %p6187_p4 }
 0x9ff   : > { %6197 = shalt.err (!%p6194_p11)
}
 0xa00   : > { %s6198_s5 = scalar_lea.hbm %s7526_s1, 16  ;;  %s6202_s11 = scalar_lea.hbm %s7722_s2, 32 }
 0xa01   : > { %p6199_p13 = scmp.ne.s32.totalorder %s7526_s1, %s6198_s5  ;;  %p6203_p5 = scmp.lt.u32.totalorder %s7526_s1, %s7722_s2 }
 0xa02   : > { %p6204_p0 = scmp.lt.u32.totalorder %s6202_s11, %s6198_s5  ;;  %p6206_p2 = scmp.lt.u32.totalorder %s6198_s5, %s7526_s1 }
 0xa03   : > { %p6200_p6 = pnand %p6199_p13, %p7720_p1 }
 0xa04   : > { %p6205_p10 = por %p6204_p0, %p6203_p5 }
 0xa05   : > { %p6201_p9 = pneg %p6200_p6 }
 0xa06   : > { %p6207_p3 = por %p6206_p2, %p6205_p10 }
 0xa08   : > { %p6208_p4 = pnand %p6207_p3, %p6201_p9 }
 0xa0a   : > { %6211 = shalt.err (!%p6208_p4)
}
 0xa0b   : > { %5497 = dma.vmem_to_hbm [thread:$0]  (%p7720_p1), %s4813_s29, 16, %s7526_s1, %s7496_s4   ;;  %v4721_v16 = vpop.permute.xlu1 %4720  ;;  %vm4749_vm1 = vcmask 125952  }
 0xa0c   : > { %s7724_s30 = sshll.u32 %s6663_s18, 6  ;;  %s7725_s3 = sld [smem:[#allocation48_spill]] }
 0xa0f   : > { %v4726_v9 = vpop.permute.xlu1 %4725 }
 0xa12   : > { %s826_s8 = scalar_lea.vmem %s7725_s3, %s7724_s30 }
 0xa90   : > { %v4620_v40 = vpop.f32.mrb[24].mxu1 }
 0xa91   : > { %v4728_v62 = vadd.f32 %v4721_v16, %v4620_v40  ;;  %v4697_v63 = vpop.f32.mrb[26].mxu0  ;;  %v4622_v1 = vpop.f32.mrb[25].mxu1 }
 0xa92   : > { %v4730_v2 = vadd.f32 %v4721_v16, %v4697_v63  ;;  %v4729_v6 = vadd.f32 %v4721_v16, %v4622_v1  ;;  %v4699_v31 = vpop.f32.mrb[27].mxu0 }
 0xa93   : > { %4742 = vst [vmem:[%s826_s8] sm:$0xff] %v4728_v62  ;;  %v4731_v48 = vadd.f32 %v4721_v16, %v4699_v31 }
 0xa94   : > { %4744 = vst [vmem:[%s826_s8 + $0x10] sm:$0xff] %v4730_v2  ;;  %4743 = vst [vmem:[%s826_s8 + $0x8] sm:$0xff] %v4729_v6  ;;  %v4626_v7 = vpop.f32.mrb[26].mxu1 }
 0xa95   : > { %4745 = vst.msk [vmem:[%s826_s8 + $0x18] sm:$0xff] %vm3629_vm14, %v4731_v48  ;;  %v4732_v22 = vadd.f32 %v4726_v9, %v4626_v7  ;;  %v4703_v51 = vpop.f32.mrb[28].mxu0  ;;  %v4628_v8 = vpop.f32.mrb[27].mxu1 }
 0xa96   : > { %v4734_v12 = vadd.f32 %v4726_v9, %v4703_v51  ;;  %v4733_v13 = vadd.f32 %v4726_v9, %v4628_v8  ;;  %v4705_v10 = vpop.f32.mrb[29].mxu0 }
 0xa97   : > { %4746 = vst [vmem:[%s826_s8 + $0x20] sm:$0xf] %v4732_v22  ;;  %v4735_v11 = vadd.f32 %v4726_v9, %v4705_v10 }
 0xa98   : > { %4748 = vst [vmem:[%s826_s8 + $0x30] sm:$0xf] %v4734_v12  ;;  %4747 = vst [vmem:[%s826_s8 + $0x28] sm:$0xf] %v4733_v13 }
 0xa99   : > { %4750 = vst.msk [vmem:[%s826_s8 + $0x38] sm:$0xf] %vm4749_vm1, %v4735_v11 }
 0xa9a PF: > { %s7726_s18 = sld [smem:[#allocation27_spill]]  ;;  %s7727_s24 = sld [smem:[#allocation25_spill]] }
 0xa9b   : > { %s7728_s4 = sld [smem:[#allocation31_spill]] }
 0xaa0   : > { %p5547_p1 = scmp.ge.s32.totalorder %s7726_s18, 2  ;;  %s4824_s1 = sand.u32 1, %s7727_s24  }
 0xaa1   : > { %p7729_p12 = scmp.ne.s32.totalorder %s7728_s4, 0  ;;  %s4825_s29 = scalar_lea.sflag [#allocation5], %s4824_s1 }
 0xaa3   : > { %p5524_p7 = pnand %p5547_p1, %p7729_p12 }
 0xaa5   : > { %6245 = dma.done.wait (!%p5524_p7), %s4825_s29, 16  }
 0xaa6   : > { %6247 = vsyncadd (!%p5524_p7), %s4825_s29, 4294967280  ;;  %s7730_s22 = sadd.s32 4294967294, %s7726_s18  }
 0xaa7   : > { %s4838_s5 = sand.u32 1, %s7730_s22  }
 0xaa8   : > { %s4839_s6 = scalar_lea.sflag [#allocation17], %s4838_s5 }
 0xaa9   : > { %6249 = dma.done.wait (!%p5524_p7), %s4839_s6, 32  }
 0xaaa   : > { %6251 = vsyncadd (!%p5524_p7), %s4839_s6, 4294967264  ;;  %s7731_s30 = sld [smem:[#allocation28_spill]]  ;;  %s7732_s9 = sld [smem:[#allocation26_spill]] }
 0xaab   : > { %s7733_s29 = sld [smem:[#allocation29_spill]]  ;;  %s7734_s3 = smov %s6258_s28 }
 0xab0   : > { %p40_p8 = scmp.ge.s32.totalorder %s7731_s30, 4   ;;  %s7735_s28 = smov %s7732_s9 }
 0xab2   :  { %42 = sbr.rel (!%p40_p8) target bundleno = 28 (0x1c), region = 230 }
 0xab9   :  { %4859 = vsyncpa [#allocation4], 1 }
 0xaba   :  { %4861 = vsyncpa [#allocation4 + $0x1], 1 }
 0xabb   :  { %4862 = vsyncpa [#allocation7], 1 }
 0xabc   :  { %4863 = vsyncpa [#allocation10], 1 }
 0xabd   :  { %4864 = vsyncpa [#allocation13], 1 }
 0xabe   :  { %4865 = vsyncpa [#allocation5], 1 }
 0xabf   :  { %4867 = vsyncpa [#allocation5 + $0x1], 1 }
 0xac0   :  { %4868 = vsyncpa [#allocation17], 1 }
 0xac1   :  { %4870 = vsyncpa [#allocation17 + $0x1], 1 }

</bundles_post_ra>
